<compile_context>
chip_gen: v5e
topology: v5e:2x2
jax: 0.10.0
libtpu: 0.0.40
codegen_flags: <defaults>
</compile_context>

<pallas_src>
import functools

import jax
import jax.numpy as jnp
from jax import lax
from jax.experimental import pallas as pl
from jax.experimental.pallas import tpu as pltpu

EPS = 1e-5                      # PyTorch GroupNorm default eps
MATMUL_DTYPE = jnp.bfloat16     # MXU operand dtype (accumulation is f32)
H_DTYPE = jnp.bfloat16          # intermediate h storage dtype (HBM round trip)
VMEM_LIMIT_BYTES = 40 * 1024 * 1024


# ---------------------------------------------------------------------------
# Pallas kernels
# ---------------------------------------------------------------------------
def _stage1_kernel(xc_ref, xt_ref, xb_ref, a1_ref, c1_ref, w1_ref, bias1_ref,
                   h_ref, part_ref, pad_ref, col_ref,
                   *, TH, W, Cin, Cout):
    """GN1(x)+SiLU -> 3x3 conv (+ conv bias + noise projection) on one tile.

    Also emits per-tile per-channel (sum, sum of squares) of h (in f32) so the
    wrapper can finalize the second GroupNorm's statistics without re-reading h.
    """
    t = pl.program_id(1)
    n_t = pl.num_programs(1)

    # Assemble haloed raw tile (TH+2, W, Cin) and apply the pre-folded
    # GroupNorm affine + SiLU in float32.
    raw = jnp.concatenate([xt_ref[...], xc_ref[0], xb_ref[...]], axis=0)
    y = raw * a1_ref[0] + c1_ref[0]
    act = y * jax.nn.sigmoid(y)                       # SiLU, f32

    # Padded activation buffer: write interior, zero only the W-border strips.
    pad_ref[:, pl.ds(1, W), :] = act
    zcol = jnp.zeros((TH + 2, 1, Cin), jnp.float32)
    pad_ref[:, 0:1, :] = zcol
    pad_ref[:, W + 1:W + 2, :] = zcol

    # 'same'-padding: activations outside the image must be zero.
    @pl.when(t == 0)
    def _():
        pad_ref[0:1, :, :] = jnp.zeros((1, W + 2, Cin), jnp.float32)

    @pl.when(t == n_t - 1)
    def _():
        pad_ref[TH + 1:TH + 2, :, :] = jnp.zeros((1, W + 2, Cin), jnp.float32)

    # im2col -> one K = 9*Cin matmul instead of nine K = Cin taps.
    # The scratch is bf16 (matmul operand dtype) to halve its footprint and
    # VMEM traffic; rounding is identical to casting the assembled patches.
    for k in range(9):
        dy, dx = divmod(k, 3)
        col_ref[:, :, k * Cin:(k + 1) * Cin] = (
            pad_ref[pl.ds(dy, TH), pl.ds(dx, W), :].astype(MATMUL_DTYPE))
    patches = col_ref[...].reshape(TH * W, 9 * Cin)
    h2 = jnp.dot(patches, w1_ref[...], preferred_element_type=jnp.float32)
    h2 = h2 + bias1_ref[0]        # conv1 bias + Conv1x1(SiLU(noise)) + bn

    # Per-tile partial statistics for the second GroupNorm (per channel, f32).
    hsum = jnp.sum(h2, axis=0, keepdims=True)
    hsq = jnp.sum(h2 * h2, axis=0, keepdims=True)
    part_ref[0] = jnp.concatenate([hsum, hsq], axis=0)

    h_ref[0] = h2.reshape(TH, W, Cout).astype(h_ref.dtype)


def _stage2_kernel(hc_ref, ht_ref, hb_ref, xc_ref, a2_ref, c2_ref,
                   w2_ref, wr_ref, bias2_ref, o_ref, pad_ref, col_ref,
                   *, TH, W, Cin, Cout):
    """GN2(h)+SiLU -> 3x3 conv, plus residual 1x1 projection of x, on one tile."""
    t = pl.program_id(1)
    n_t = pl.num_programs(1)

    raw = jnp.concatenate([ht_ref[...], hc_ref[0], hb_ref[...]],
                          axis=0).astype(jnp.float32)
    y = raw * a2_ref[0] + c2_ref[0]
    act = y * jax.nn.sigmoid(y)

    pad_ref[:, pl.ds(1, W), :] = act
    zcol = jnp.zeros((TH + 2, 1, Cout), jnp.float32)
    pad_ref[:, 0:1, :] = zcol
    pad_ref[:, W + 1:W + 2, :] = zcol

    @pl.when(t == 0)
    def _():
        pad_ref[0:1, :, :] = jnp.zeros((1, W + 2, Cout), jnp.float32)

    @pl.when(t == n_t - 1)
    def _():
        pad_ref[TH + 1:TH + 2, :, :] = jnp.zeros((1, W + 2, Cout), jnp.float32)

    for k in range(9):
        dy, dx = divmod(k, 3)
        col_ref[:, :, k * Cout:(k + 1) * Cout] = (
            pad_ref[pl.ds(dy, TH), pl.ds(dx, W), :].astype(MATMUL_DTYPE))
    patches = col_ref[...].reshape(TH * W, 9 * Cout)
    out = jnp.dot(patches, w2_ref[...], preferred_element_type=jnp.float32)

    # Residual 1x1 projection on the raw input tile (already bf16, no halo).
    xres = xc_ref[0].reshape(TH * W, Cin)
    out = out + jnp.dot(xres, wr_ref[...], preferred_element_type=jnp.float32)
    out = out + bias2_ref[...]                         # b2 + br

    o_ref[0] = out.reshape(TH, W, Cout)


# ---------------------------------------------------------------------------
# Wrapper helpers
# ---------------------------------------------------------------------------
def _pick_tile_h(H, W, Cin, Cout, tile_h=None, budget_bytes=8 * 1024 * 1024):
    """Largest divisor of H whose per-tile VMEM footprint fits the budget."""
    if tile_h is not None:
        if H % tile_h != 0:
            raise ValueError(f"tile_h={tile_h} must divide H={H}")
        return tile_h
    # double-buffered blocks (f32 x, f32 out, bf16 h) + padded f32 scratch
    per_row = W * (Cin * 4 + Cout * 4 + Cout * 2) * 2
    per_row += W * (Cin + Cout) * 4                    # padded GN scratches
    per_row += W * 9 * (Cin + Cout) * 2                # im2col scratches (bf16)
    divisors = [d for d in range(1, H + 1) if H % d == 0]
    fitting = [d for d in divisors if d * per_row <= budget_bytes]
    return max(fitting) if fitting else min(divisors)


def _halo_rows(tiled5):
    """Row above / below each spatial tile (zeros at the image boundary)."""
    N, nT, TH, W, C = tiled5.shape
    zero = jnp.zeros((N, 1, W, C), tiled5.dtype)
    if nT == 1:
        return zero, zero
    top = jnp.concatenate([zero, tiled5[:, :-1, TH - 1]], axis=1)
    bot = jnp.concatenate([tiled5[:, 1:, 0], zero], axis=1)
    return top, bot


def _fold_groupnorm(mean, var, gamma, beta, C, G):
    """Fold GroupNorm stats + affine into per-(image, channel) scale/shift."""
    cpg = C // G
    inv = lax.rsqrt(var + EPS)                     # (N, G)
    inv_c = jnp.repeat(inv, cpg, axis=1)           # (N, C)
    mean_c = jnp.repeat(mean, cpg, axis=1)
    scale = inv_c * gamma[None, :]
    shift = beta[None, :] - mean_c * scale
    return scale, shift


# ---------------------------------------------------------------------------
# Public forward passes
# ---------------------------------------------------------------------------
def unet_block_forward_nhwc(x_nhwc, noise, params, *, tile_h=None):
    """x_nhwc: (N, H, W, Cin); noise: (N, Cnoise). Returns (N, H, W, Cout)."""
    N, H, W, Cin = x_nhwc.shape
    Cn = noise.shape[-1]
    Cout = params["b1"].shape[0]
    G1 = min(32, Cin // 4)
    G2 = min(32, Cout // 4)
    assert G1 >= 1 and Cin % G1 == 0, (Cin, G1)
    assert G2 >= 1 and Cout % G2 == 0, (Cout, G2)

    TH = _pick_tile_h(H, W, Cin, Cout, tile_h)
    nT = H // TH

    x = x_nhwc.astype(jnp.float32)
    x5 = x.reshape(N, nT, TH, W, Cin)
    x_flat = x5.reshape(N * nT, TH, W, Cin)
    x_top, x_bot = _halo_rows(x5)
    x_top = x_top.reshape(N * nT, W, Cin)
    x_bot = x_bot.reshape(N * nT, W, Cin)
    # Residual copy consumed by stage 2 (bf16 matmul operand anyway).
    x_res_flat = x_flat.astype(MATMUL_DTYPE)

    # --- GroupNorm-1 statistics (one cheap pass over x) + fold --------------
    xg = x.reshape(N, H * W, G1, Cin // G1)
    mean1 = jnp.mean(xg, axis=(1, 3))
    var1 = jnp.var(xg, axis=(1, 3))                   # biased, like PyTorch
    A1, B1 = _fold_groupnorm(mean1, var1, params["g1"], params["bt1"], Cin, G1)

    # --- Noise-level projection folded into the stage-1 bias (per image) ----
    nz = noise.astype(jnp.float32)
    nz = nz * jax.nn.sigmoid(nz)
    noise_bias = nz @ params["Wn"].reshape(Cn, Cout) + params["bn"]
    bias1 = (noise_bias + params["b1"][None, :]).reshape(N, 1, Cout)

    w1 = params["W1"].reshape(9 * Cin, Cout).astype(MATMUL_DTYPE)

    cparams = pltpu.CompilerParams(
        dimension_semantics=("parallel", "parallel"),
        vmem_limit_bytes=VMEM_LIMIT_BYTES)

    # ------------------------------ stage 1 ---------------------------------
    k1 = functools.partial(_stage1_kernel, TH=TH, W=W, Cin=Cin, Cout=Cout)
    h_flat, part_flat = pl.pallas_call(
        k1,
        grid=(N, nT),
        in_specs=[
            pl.BlockSpec((1, TH, W, Cin), lambda n, t: (n * nT + t, 0, 0, 0)),
            pl.BlockSpec((1, W, Cin), lambda n, t: (n * nT + t, 0, 0)),
            pl.BlockSpec((1, W, Cin), lambda n, t: (n * nT + t, 0, 0)),
            pl.BlockSpec((1, 1, Cin), lambda n, t: (n, 0, 0)),     # GN1 scale
            pl.BlockSpec((1, 1, Cin), lambda n, t: (n, 0, 0)),     # GN1 shift
            pl.BlockSpec((9 * Cin, Cout), lambda n, t: (0, 0)),    # W1 (bf16)
            pl.BlockSpec((1, 1, Cout), lambda n, t: (n, 0, 0)),    # b1 + noise
        ],
        out_specs=[
            pl.BlockSpec((1, TH, W, Cout), lambda n, t: (n * nT + t, 0, 0, 0)),
            pl.BlockSpec((1, 2, Cout), lambda n, t: (n * nT + t, 0, 0)),
        ],
        out_shape=[
            jax.ShapeDtypeStruct((N * nT, TH, W, Cout), H_DTYPE),
            jax.ShapeDtypeStruct((N * nT, 2, Cout), jnp.float32),
        ],
        scratch_shapes=[
            pltpu.VMEM((TH + 2, W + 2, Cin), jnp.float32),   # padded GN1 act
            pltpu.VMEM((TH, W, 9 * Cin), MATMUL_DTYPE),      # im2col patches
        ],
        compiler_params=cparams,
    )(x_flat, x_top, x_bot,
      A1.reshape(N, 1, Cin), B1.reshape(N, 1, Cin), w1, bias1)

    # --- Finalize GroupNorm-2 statistics from the per-tile partial sums -----
    part = part_flat.reshape(N, nT, 2, Cout)
    csum = jnp.sum(part[:, :, 0, :], axis=1)          # (N, Cout)
    csq = jnp.sum(part[:, :, 1, :], axis=1)
    cpg2 = Cout // G2
    cnt = float(H * W * cpg2)
    mean2 = jnp.sum(csum.reshape(N, G2, cpg2), axis=2) / cnt
    ex2 = jnp.sum(csq.reshape(N, G2, cpg2), axis=2) / cnt
    var2 = jnp.maximum(ex2 - jnp.square(mean2), 0.0)
    A2, B2 = _fold_groupnorm(mean2, var2, params["g2"], params["bt2"], Cout, G2)

    h5 = h_flat.reshape(N, nT, TH, W, Cout)
    h_top, h_bot = _halo_rows(h5)
    h_top = h_top.reshape(N * nT, W, Cout)
    h_bot = h_bot.reshape(N * nT, W, Cout)

    w2 = params["W2"].reshape(9 * Cout, Cout).astype(MATMUL_DTYPE)
    wr = params["Wr"].reshape(Cin, Cout).astype(MATMUL_DTYPE)
    bias2 = (params["b2"] + params["br"]).reshape(1, Cout)

    # ------------------------------ stage 2 ---------------------------------
    k2 = functools.partial(_stage2_kernel, TH=TH, W=W, Cin=Cin, Cout=Cout)
    out_flat = pl.pallas_call(
        k2,
        grid=(N, nT),
        in_specs=[
            pl.BlockSpec((1, TH, W, Cout), lambda n, t: (n * nT + t, 0, 0, 0)),
            pl.BlockSpec((1, W, Cout), lambda n, t: (n * nT + t, 0, 0)),
            pl.BlockSpec((1, W, Cout), lambda n, t: (n * nT + t, 0, 0)),
            pl.BlockSpec((1, TH, W, Cin), lambda n, t: (n * nT + t, 0, 0, 0)),
            pl.BlockSpec((1, 1, Cout), lambda n, t: (n, 0, 0)),    # GN2 scale
            pl.BlockSpec((1, 1, Cout), lambda n, t: (n, 0, 0)),    # GN2 shift
            pl.BlockSpec((9 * Cout, Cout), lambda n, t: (0, 0)),   # W2 (bf16)
            pl.BlockSpec((Cin, Cout), lambda n, t: (0, 0)),        # Wr (bf16)
            pl.BlockSpec((1, Cout), lambda n, t: (0, 0)),          # b2 + br
        ],
        out_specs=pl.BlockSpec((1, TH, W, Cout),
                               lambda n, t: (n * nT + t, 0, 0, 0)),
        out_shape=jax.ShapeDtypeStruct((N * nT, TH, W, Cout), jnp.float32),
        scratch_shapes=[
            pltpu.VMEM((TH + 2, W + 2, Cout), jnp.float32),  # padded GN2 act
            pltpu.VMEM((TH, W, 9 * Cout), MATMUL_DTYPE),     # im2col patches
        ],
        compiler_params=cparams,
    )(h_flat, h_top, h_bot, x_res_flat,
      A2.reshape(N, 1, Cout), B2.reshape(N, 1, Cout), w2, wr, bias2)

    return out_flat.reshape(N, H, W, Cout)


def unet_block_forward(x_nchw, noise_nchw, params, *, tile_h=None):
    """PyTorch-compatible interface: x (N,Cin,H,W), noise (N,Cnoise,1,1) -> NCHW.

    The NCHW<->NHWC transposes live only at this boundary; callers inside a
    JAX model should use unet_block_forward_nhwc directly to avoid them.
    """
    N, Cin, H, W = x_nchw.shape
    x_nhwc = jnp.transpose(x_nchw, (0, 2, 3, 1))
    noise = noise_nchw.reshape(N, noise_nchw.shape[1])
    out_nhwc = unet_block_forward_nhwc(x_nhwc, noise, params, tile_h=tile_h)
    return jnp.transpose(out_nhwc, (0, 3, 1, 2))


# ---------------------------------------------------------------------------
# Deterministic parameter init + pure-JAX reference for verification
# ---------------------------------------------------------------------------
def init_params(key, Cin, Cout, Cn):
    ks = jax.random.split(key, 12)
    nrm = lambda k, s, sc: sc * jax.random.normal(k, s, jnp.float32)
    return dict(
        g1=1.0 + nrm(ks[0], (Cin,), 0.1), bt1=nrm(ks[1], (Cin,), 0.1),
        W1=nrm(ks[2], (3, 3, Cin, Cout), 0.2), b1=nrm(ks[3], (Cout,), 0.1),
        Wn=nrm(ks[4], (1, 1, Cn, Cout), 0.2), bn=nrm(ks[5], (Cout,), 0.1),
        g2=1.0 + nrm(ks[6], (Cout,), 0.1), bt2=nrm(ks[7], (Cout,), 0.1),
        W2=nrm(ks[8], (3, 3, Cout, Cout), 0.2), b2=nrm(ks[9], (Cout,), 0.1),
        Wr=nrm(ks[10], (1, 1, Cin, Cout), 0.3), br=nrm(ks[11], (Cout,), 0.1),
    )


def ref_forward(x_nchw, noise_nchw, params):
    Cin = x_nchw.shape[1]
    Cout = params["b1"].shape[0]
    G1, G2 = min(32, Cin // 4), min(32, Cout // 4)
    x = jnp.transpose(x_nchw, (0, 2, 3, 1))
    nz = jnp.transpose(noise_nchw, (0, 2, 3, 1))        # (N,1,1,Cn)

    def gn(t, gamma, beta, G):
        n, h, w, c = t.shape
        tg = t.reshape(n, h, w, G, c // G)
        mu = tg.mean(axis=(1, 2, 4), keepdims=True)
        var = ((tg - mu) ** 2).mean(axis=(1, 2, 4), keepdims=True)
        tn = ((tg - mu) / jnp.sqrt(var + EPS)).reshape(n, h, w, c)
        return tn * gamma + beta

    silu = lambda t: t * jax.nn.sigmoid(t)

    def conv(t, wgt, b, pad):
        y = lax.conv_general_dilated(t, wgt, (1, 1), pad,
                                     dimension_numbers=("NHWC", "HWIO", "NHWC"))
        return y + b

    p = params
    h = conv(silu(gn(x, p["g1"], p["bt1"], G1)), p["W1"], p["b1"], "SAME")
    h = h + conv(silu(nz), p["Wn"], p["bn"], "VALID")
    out = conv(silu(gn(h, p["g2"], p["bt2"], G2)), p["W2"], p["b2"], "SAME")
    out = out + conv(x, p["Wr"], p["br"], "VALID")
    return jnp.transpose(out, (0, 3, 1, 2))


if __name__ == "__main__":
    N, Cin, Cout, Cn, H, W = 2, 8, 16, 8, 16, 16
    key = jax.random.PRNGKey(0)
    kx, kn, kp = jax.random.split(key, 3)

    x = jax.random.normal(kx, (N, Cin, H, W), jnp.float32)
    noise = jax.random.normal(kn, (N, Cn, 1, 1), jnp.float32)
    params = init_params(kp, Cin, Cout, Cn)

    # tile_h=8 forces two spatial tiles per image so the halo path is exercised.
    fwd = jax.jit(functools.partial(unet_block_forward, tile_h=8))
    out = jax.block_until_ready(fwd(x, noise, params))

    ref = jax.block_until_ready(ref_forward(x, noise, params))
    assert out.shape == (N, Cout, H, W), out.shape
    # bf16 MXU operands + bf16 intermediate h (f32 accumulation throughout) ->
    # compare against the pure-f32 reference with a bf16-level tolerance.
    max_err = float(jnp.max(jnp.abs(out - ref)))
    assert jnp.allclose(out, ref, atol=1e-1, rtol=5e-2), f"max abs err {max_err}"

    print("KERNEL_OK")
</pallas_src>

<mosaic_0001>
module attributes {stable_mosaic.version = 11 : i64} {
  func.func @_stage2_kernel(%arg0: i32, %arg1: i32, %arg2: memref<1x8x16x16xbf16, #tpu.memory_space<vmem>>, %arg3: memref<1x16x16xbf16, #tpu.memory_space<vmem>>, %arg4: memref<1x16x16xbf16, #tpu.memory_space<vmem>>, %arg5: memref<1x8x16x8xbf16, #tpu.memory_space<vmem>>, %arg6: memref<1x1x16xf32, #tpu.memory_space<vmem>>, %arg7: memref<1x1x16xf32, #tpu.memory_space<vmem>>, %arg8: memref<144x16xbf16, #tpu.memory_space<vmem>>, %arg9: memref<8x16xbf16, #tpu.memory_space<vmem>>, %arg10: memref<1x16xf32, #tpu.memory_space<vmem>>, %arg11: memref<1x8x16x16xf32, #tpu.memory_space<vmem>>, %arg12: memref<10x18x16xf32, #tpu.memory_space<vmem>>, %arg13: memref<8x16x144xbf16, #tpu.memory_space<vmem>>) attributes {dimension_semantics = [#tpu.dimension_semantics<parallel>, #tpu.dimension_semantics<parallel>], iteration_bounds = array<i64: 2, 2>, scalar_prefetch = 0 : i64, scratch_operands = 2 : i64, tpu.core_type = #tpu.core_type<tc>, window_params = [{transform_indices = @transform_0, window_bounds = array<i64: 1, 8, 16, 16>}, {transform_indices = @transform_1, window_bounds = array<i64: 1, 16, 16>}, {transform_indices = @transform_2, window_bounds = array<i64: 1, 16, 16>}, {transform_indices = @transform_3, window_bounds = array<i64: 1, 8, 16, 8>}, {transform_indices = @transform_4, window_bounds = array<i64: 1, 1, 16>}, {transform_indices = @transform_5, window_bounds = array<i64: 1, 1, 16>}, {pipeline_mode = #tpu.pipeline_mode<synchronous>, transform_indices = @transform_6, window_bounds = array<i64: 144, 16>}, {pipeline_mode = #tpu.pipeline_mode<synchronous>, transform_indices = @transform_7, window_bounds = array<i64: 8, 16>}, {pipeline_mode = #tpu.pipeline_mode<synchronous>, transform_indices = @transform_8, window_bounds = array<i64: 1, 16>}, {transform_indices = @transform_9, window_bounds = array<i64: 1, 8, 16, 16>}]} {
    %c0 = arith.constant 0 : index
    %c0_0 = arith.constant 0 : index
    %c0_1 = arith.constant 0 : index
    %0 = vector.load %arg3[%c0, %c0_0, %c0_1] : memref<1x16x16xbf16, #tpu.memory_space<vmem>>, vector<1x16x16xbf16>
    %c0_2 = arith.constant 0 : index
    %c0_3 = arith.constant 0 : index
    %c0_4 = arith.constant 0 : index
    %c0_5 = arith.constant 0 : index
    %1 = vector.load %arg2[%c0_2, %c0_3, %c0_4, %c0_5] : memref<1x8x16x16xbf16, #tpu.memory_space<vmem>>, vector<1x8x16x16xbf16>
    %2 = vector.shape_cast %1 : vector<1x8x16x16xbf16> to vector<8x16x16xbf16>
    %c0_6 = arith.constant 0 : index
    %c0_7 = arith.constant 0 : index
    %c0_8 = arith.constant 0 : index
    %3 = vector.load %arg4[%c0_6, %c0_7, %c0_8] : memref<1x16x16xbf16, #tpu.memory_space<vmem>>, vector<1x16x16xbf16>
    %4 = tpu.concatenate %0, %2, %3 in 0 : vector<1x16x16xbf16>, vector<8x16x16xbf16>, vector<1x16x16xbf16> -> vector<10x16x16xbf16>
    %5 = arith.extf %4 : vector<10x16x16xbf16> to vector<10x16x16xf32>
    %c0_9 = arith.constant 0 : index
    %c0_10 = arith.constant 0 : index
    %c0_11 = arith.constant 0 : index
    %6 = vector.load %arg6[%c0_9, %c0_10, %c0_11] : memref<1x1x16xf32, #tpu.memory_space<vmem>>, vector<1x1x16xf32>
    %7 = vector.shape_cast %6 : vector<1x1x16xf32> to vector<1x16xf32>
    %8 = vector.shape_cast %7 : vector<1x16xf32> to vector<1x1x16xf32>
    %9 = vector.broadcast %8 : vector<1x1x16xf32> to vector<10x16x16xf32>
    %10 = arith.mulf %5, %9 : vector<10x16x16xf32>
    %c0_12 = arith.constant 0 : index
    %c0_13 = arith.constant 0 : index
    %c0_14 = arith.constant 0 : index
    %11 = vector.load %arg7[%c0_12, %c0_13, %c0_14] : memref<1x1x16xf32, #tpu.memory_space<vmem>>, vector<1x1x16xf32>
    %12 = vector.shape_cast %11 : vector<1x1x16xf32> to vector<1x16xf32>
    %13 = vector.shape_cast %12 : vector<1x16xf32> to vector<1x1x16xf32>
    %14 = vector.broadcast %13 : vector<1x1x16xf32> to vector<10x16x16xf32>
    %15 = arith.addf %10, %14 : vector<10x16x16xf32>
    %16 = arith.negf %15 : vector<10x16x16xf32>
    %17 = math.exp %16 : vector<10x16x16xf32>
    %cst = arith.constant 1.000000e+00 : f32
    %18 = vector.broadcast %cst : f32 to vector<10x16x16xf32>
    %19 = arith.addf %18, %17 : vector<10x16x16xf32>
    %20 = arith.divf %18, %19 : vector<10x16x16xf32>
    %21 = arith.mulf %15, %20 : vector<10x16x16xf32>
    %c0_15 = arith.constant 0 : index
    %c1 = arith.constant 1 : index
    %c0_16 = arith.constant 0 : index
    %22 = vector.load %arg12[%c0_15, %c1, %c0_16] : memref<10x18x16xf32, #tpu.memory_space<vmem>>, vector<10x16x16xf32>
    tpu.vector_store %arg12[%c0_15, %c1, %c0_16], %21 {strides = array<i32>} : memref<10x18x16xf32, #tpu.memory_space<vmem>>, vector<10x16x16xf32>,
    %cst_17 = arith.constant 0.000000e+00 : f32
    %23 = vector.broadcast %cst_17 : f32 to vector<10x1x16xf32>
    %c0_18 = arith.constant 0 : index
    %c0_19 = arith.constant 0 : index
    %c0_20 = arith.constant 0 : index
    %24 = vector.load %arg12[%c0_18, %c0_19, %c0_20] : memref<10x18x16xf32, #tpu.memory_space<vmem>>, vector<10x1x16xf32>
    tpu.vector_store %arg12[%c0_18, %c0_19, %c0_20], %23 {strides = array<i32>} : memref<10x18x16xf32, #tpu.memory_space<vmem>>, vector<10x1x16xf32>,
    %c0_21 = arith.constant 0 : index
    %c17 = arith.constant 17 : index
    %c0_22 = arith.constant 0 : index
    %25 = vector.load %arg12[%c0_21, %c17, %c0_22] : memref<10x18x16xf32, #tpu.memory_space<vmem>>, vector<10x1x16xf32>
    tpu.vector_store %arg12[%c0_21, %c17, %c0_22], %23 {strides = array<i32>} : memref<10x18x16xf32, #tpu.memory_space<vmem>>, vector<10x1x16xf32>,
    %c0_i32 = arith.constant 0 : i32
    %26 = arith.cmpi eq, %arg1, %c0_i32 : i32
    %27 = arith.extui %26 : i1 to i32
    %c0_i32_23 = arith.constant 0 : i32
    %28 = arith.cmpi ne, %27, %c0_i32_23 : i32
    scf.if %28 {
      %cst_89 = arith.constant 0.000000e+00 : f32
      %76 = vector.broadcast %cst_89 : f32 to vector<1x18x16xf32>
      %c0_90 = arith.constant 0 : index
      %c0_91 = arith.constant 0 : index
      %c0_92 = arith.constant 0 : index
      %77 = vector.load %arg12[%c0_90, %c0_91, %c0_92] : memref<10x18x16xf32, #tpu.memory_space<vmem>>, vector<1x18x16xf32>
      tpu.vector_store %arg12[%c0_90, %c0_91, %c0_92], %76 {strides = array<i32>} : memref<10x18x16xf32, #tpu.memory_space<vmem>>, vector<1x18x16xf32>,
    } else {
    }
    %c1_i32 = arith.constant 1 : i32
    %29 = arith.cmpi eq, %arg1, %c1_i32 : i32
    %30 = arith.extui %29 : i1 to i32
    %c0_i32_24 = arith.constant 0 : i32
    %31 = arith.cmpi ne, %30, %c0_i32_24 : i32
    scf.if %31 {
      %cst_89 = arith.constant 0.000000e+00 : f32
      %76 = vector.broadcast %cst_89 : f32 to vector<1x18x16xf32>
      %c9 = arith.constant 9 : index
      %c0_90 = arith.constant 0 : index
      %c0_91 = arith.constant 0 : index
      %77 = vector.load %arg12[%c9, %c0_90, %c0_91] : memref<10x18x16xf32, #tpu.memory_space<vmem>>, vector<1x18x16xf32>
      tpu.vector_store %arg12[%c9, %c0_90, %c0_91], %76 {strides = array<i32>} : memref<10x18x16xf32, #tpu.memory_space<vmem>>, vector<1x18x16xf32>,
    } else {
    }
    %c0_25 = arith.constant 0 : index
    %c0_26 = arith.constant 0 : index
    %c0_27 = arith.constant 0 : index
    %32 = vector.load %arg12[%c0_25, %c0_26, %c0_27] : memref<10x18x16xf32, #tpu.memory_space<vmem>>, vector<8x16x16xf32>
    %33 = arith.truncf %32 : vector<8x16x16xf32> to vector<8x16x16xbf16>
    %c0_28 = arith.constant 0 : index
    %c0_29 = arith.constant 0 : index
    %c0_30 = arith.constant 0 : index
    %34 = vector.load %arg13[%c0_28, %c0_29, %c0_30] : memref<8x16x144xbf16, #tpu.memory_space<vmem>>, vector<8x16x16xbf16>
    tpu.vector_store %arg13[%c0_28, %c0_29, %c0_30], %33 {strides = array<i32>} : memref<8x16x144xbf16, #tpu.memory_space<vmem>>, vector<8x16x16xbf16>,
    %c0_31 = arith.constant 0 : index
    %c1_32 = arith.constant 1 : index
    %c0_33 = arith.constant 0 : index
    %35 = vector.load %arg12[%c0_31, %c1_32, %c0_33] : memref<10x18x16xf32, #tpu.memory_space<vmem>>, vector<8x16x16xf32>
    %36 = arith.truncf %35 : vector<8x16x16xf32> to vector<8x16x16xbf16>
    %c0_34 = arith.constant 0 : index
    %c0_35 = arith.constant 0 : index
    %c16 = arith.constant 16 : index
    %37 = vector.load %arg13[%c0_34, %c0_35, %c16] : memref<8x16x144xbf16, #tpu.memory_space<vmem>>, vector<8x16x16xbf16>
    tpu.vector_store %arg13[%c0_34, %c0_35, %c16], %36 {strides = array<i32>} : memref<8x16x144xbf16, #tpu.memory_space<vmem>>, vector<8x16x16xbf16>,
    %c0_36 = arith.constant 0 : index
    %c2 = arith.constant 2 : index
    %c0_37 = arith.constant 0 : index
    %38 = vector.load %arg12[%c0_36, %c2, %c0_37] : memref<10x18x16xf32, #tpu.memory_space<vmem>>, vector<8x16x16xf32>
    %39 = arith.truncf %38 : vector<8x16x16xf32> to vector<8x16x16xbf16>
    %c0_38 = arith.constant 0 : index
    %c0_39 = arith.constant 0 : index
    %c32 = arith.constant 32 : index
    %40 = vector.load %arg13[%c0_38, %c0_39, %c32] : memref<8x16x144xbf16, #tpu.memory_space<vmem>>, vector<8x16x16xbf16>
    tpu.vector_store %arg13[%c0_38, %c0_39, %c32], %39 {strides = array<i32>} : memref<8x16x144xbf16, #tpu.memory_space<vmem>>, vector<8x16x16xbf16>,
    %c1_40 = arith.constant 1 : index
    %c0_41 = arith.constant 0 : index
    %c0_42 = arith.constant 0 : index
    %41 = vector.load %arg12[%c1_40, %c0_41, %c0_42] : memref<10x18x16xf32, #tpu.memory_space<vmem>>, vector<8x16x16xf32>
    %42 = arith.truncf %41 : vector<8x16x16xf32> to vector<8x16x16xbf16>
    %c0_43 = arith.constant 0 : index
    %c0_44 = arith.constant 0 : index
    %c48 = arith.constant 48 : index
    %43 = vector.load %arg13[%c0_43, %c0_44, %c48] : memref<8x16x144xbf16, #tpu.memory_space<vmem>>, vector<8x16x16xbf16>
    tpu.vector_store %arg13[%c0_43, %c0_44, %c48], %42 {strides = array<i32>} : memref<8x16x144xbf16, #tpu.memory_space<vmem>>, vector<8x16x16xbf16>,
    %c1_45 = arith.constant 1 : index
    %c1_46 = arith.constant 1 : index
    %c0_47 = arith.constant 0 : index
    %44 = vector.load %arg12[%c1_45, %c1_46, %c0_47] : memref<10x18x16xf32, #tpu.memory_space<vmem>>, vector<8x16x16xf32>
    %45 = arith.truncf %44 : vector<8x16x16xf32> to vector<8x16x16xbf16>
    %c0_48 = arith.constant 0 : index
    %c0_49 = arith.constant 0 : index
    %c64 = arith.constant 64 : index
    %46 = vector.load %arg13[%c0_48, %c0_49, %c64] : memref<8x16x144xbf16, #tpu.memory_space<vmem>>, vector<8x16x16xbf16>
    tpu.vector_store %arg13[%c0_48, %c0_49, %c64], %45 {strides = array<i32>} : memref<8x16x144xbf16, #tpu.memory_space<vmem>>, vector<8x16x16xbf16>,
    %c1_50 = arith.constant 1 : index
    %c2_51 = arith.constant 2 : index
    %c0_52 = arith.constant 0 : index
    %47 = vector.load %arg12[%c1_50, %c2_51, %c0_52] : memref<10x18x16xf32, #tpu.memory_space<vmem>>, vector<8x16x16xf32>
    %48 = arith.truncf %47 : vector<8x16x16xf32> to vector<8x16x16xbf16>
    %c0_53 = arith.constant 0 : index
    %c0_54 = arith.constant 0 : index
    %c80 = arith.constant 80 : index
    %49 = vector.load %arg13[%c0_53, %c0_54, %c80] : memref<8x16x144xbf16, #tpu.memory_space<vmem>>, vector<8x16x16xbf16>
    tpu.vector_store %arg13[%c0_53, %c0_54, %c80], %48 {strides = array<i32>} : memref<8x16x144xbf16, #tpu.memory_space<vmem>>, vector<8x16x16xbf16>,
    %c2_55 = arith.constant 2 : index
    %c0_56 = arith.constant 0 : index
    %c0_57 = arith.constant 0 : index
    %50 = vector.load %arg12[%c2_55, %c0_56, %c0_57] : memref<10x18x16xf32, #tpu.memory_space<vmem>>, vector<8x16x16xf32>
    %51 = arith.truncf %50 : vector<8x16x16xf32> to vector<8x16x16xbf16>
    %c0_58 = arith.constant 0 : index
    %c0_59 = arith.constant 0 : index
    %c96 = arith.constant 96 : index
    %52 = vector.load %arg13[%c0_58, %c0_59, %c96] : memref<8x16x144xbf16, #tpu.memory_space<vmem>>, vector<8x16x16xbf16>
    tpu.vector_store %arg13[%c0_58, %c0_59, %c96], %51 {strides = array<i32>} : memref<8x16x144xbf16, #tpu.memory_space<vmem>>, vector<8x16x16xbf16>,
    %c2_60 = arith.constant 2 : index
    %c1_61 = arith.constant 1 : index
    %c0_62 = arith.constant 0 : index
    %53 = vector.load %arg12[%c2_60, %c1_61, %c0_62] : memref<10x18x16xf32, #tpu.memory_space<vmem>>, vector<8x16x16xf32>
    %54 = arith.truncf %53 : vector<8x16x16xf32> to vector<8x16x16xbf16>
    %c0_63 = arith.constant 0 : index
    %c0_64 = arith.constant 0 : index
    %c112 = arith.constant 112 : index
    %55 = vector.load %arg13[%c0_63, %c0_64, %c112] : memref<8x16x144xbf16, #tpu.memory_space<vmem>>, vector<8x16x16xbf16>
    tpu.vector_store %arg13[%c0_63, %c0_64, %c112], %54 {strides = array<i32>} : memref<8x16x144xbf16, #tpu.memory_space<vmem>>, vector<8x16x16xbf16>,
    %c2_65 = arith.constant 2 : index
    %c2_66 = arith.constant 2 : index
    %c0_67 = arith.constant 0 : index
    %56 = vector.load %arg12[%c2_65, %c2_66, %c0_67] : memref<10x18x16xf32, #tpu.memory_space<vmem>>, vector<8x16x16xf32>
    %57 = arith.truncf %56 : vector<8x16x16xf32> to vector<8x16x16xbf16>
    %c0_68 = arith.constant 0 : index
    %c0_69 = arith.constant 0 : index
    %c128 = arith.constant 128 : index
    %58 = vector.load %arg13[%c0_68, %c0_69, %c128] : memref<8x16x144xbf16, #tpu.memory_space<vmem>>, vector<8x16x16xbf16>
    tpu.vector_store %arg13[%c0_68, %c0_69, %c128], %57 {strides = array<i32>} : memref<8x16x144xbf16, #tpu.memory_space<vmem>>, vector<8x16x16xbf16>,
    %c0_70 = arith.constant 0 : index
    %c0_71 = arith.constant 0 : index
    %c0_72 = arith.constant 0 : index
    %59 = vector.load %arg13[%c0_70, %c0_71, %c0_72] : memref<8x16x144xbf16, #tpu.memory_space<vmem>>, vector<8x16x144xbf16>
    %60 = vector.shape_cast %59 : vector<8x16x144xbf16> to vector<128x144xbf16>
    %c0_73 = arith.constant 0 : index
    %c0_74 = arith.constant 0 : index
    %61 = vector.load %arg8[%c0_73, %c0_74] : memref<144x16xbf16, #tpu.memory_space<vmem>>, vector<144x16xbf16>
    %cst_75 = arith.constant dense<0.000000e+00> : vector<128x16xf32>
    %62 = tpu.matmul %60, %61, %cst_75 {dimension_numbers = #tpu.dot_dimension_numbers<[1], [0], [0], [1], [0, 0, 1, 1], [], []>} : vector<128x144xbf16>, vector<144x16xbf16>, vector<128x16xf32> -> vector<128x16xf32>
    %c0_76 = arith.constant 0 : index
    %c0_77 = arith.constant 0 : index
    %c0_78 = arith.constant 0 : index
    %c0_79 = arith.constant 0 : index
    %63 = vector.load %arg5[%c0_76, %c0_77, %c0_78, %c0_79] : memref<1x8x16x8xbf16, #tpu.memory_space<vmem>>, vector<1x8x16x8xbf16>
    %64 = vector.shape_cast %63 : vector<1x8x16x8xbf16> to vector<8x16x8xbf16>
    %65 = vector.shape_cast %64 : vector<8x16x8xbf16> to vector<128x8xbf16>
    %c0_80 = arith.constant 0 : index
    %c0_81 = arith.constant 0 : index
    %66 = vector.load %arg9[%c0_80, %c0_81] : memref<8x16xbf16, #tpu.memory_space<vmem>>, vector<8x16xbf16>
    %cst_82 = arith.constant dense<0.000000e+00> : vector<128x16xf32>
    %67 = tpu.matmul %65, %66, %cst_82 {dimension_numbers = #tpu.dot_dimension_numbers<[1], [0], [0], [1], [0, 0, 1, 1], [], []>} : vector<128x8xbf16>, vector<8x16xbf16>, vector<128x16xf32> -> vector<128x16xf32>
    %68 = arith.addf %62, %67 : vector<128x16xf32>
    %c0_83 = arith.constant 0 : index
    %c0_84 = arith.constant 0 : index
    %69 = vector.load %arg10[%c0_83, %c0_84] : memref<1x16xf32, #tpu.memory_space<vmem>>, vector<1x16xf32>
    %70 = vector.broadcast %69 : vector<1x16xf32> to vector<128x16xf32>
    %71 = arith.addf %68, %70 : vector<128x16xf32>
    %72 = vector.shape_cast %71 : vector<128x16xf32> to vector<8x16x16xf32>
    %c0_85 = arith.constant 0 : index
    %c0_86 = arith.constant 0 : index
    %c0_87 = arith.constant 0 : index
    %c0_88 = arith.constant 0 : index
    %73 = vector.load %arg11[%c0_85, %c0_86, %c0_87, %c0_88] : memref<1x8x16x16xf32, #tpu.memory_space<vmem>>, vector<1x8x16x16xf32>
    %74 = vector.shape_cast %73 : vector<1x8x16x16xf32> to vector<8x16x16xf32>
    %75 = vector.shape_cast %72 : vector<8x16x16xf32> to vector<1x8x16x16xf32>
    tpu.vector_store %arg11[%c0_85, %c0_86, %c0_87, %c0_88], %75 {strides = array<i32>} : memref<1x8x16x16xf32, #tpu.memory_space<vmem>>, vector<1x8x16x16xf32>,
    return
  }
  func.func @transform_0(%arg0: i32, %arg1: i32) -> (i32, i32, i32, i32) {
    %c2_i32 = arith.constant 2 : i32
    %0 = arith.muli %arg0, %c2_i32 : i32
    %1 = arith.addi %0, %arg1 : i32
    %c0_i32 = arith.constant 0 : i32
    %c0_i32_0 = arith.constant 0 : i32
    %c0_i32_1 = arith.constant 0 : i32
    %c0_i32_2 = arith.constant 0 : i32
    return %1, %c0_i32, %c0_i32_0, %c0_i32_1 : i32, i32, i32, i32
  }
  func.func @transform_1(%arg0: i32, %arg1: i32) -> (i32, i32, i32) {
    %c2_i32 = arith.constant 2 : i32
    %0 = arith.muli %arg0, %c2_i32 : i32
    %1 = arith.addi %0, %arg1 : i32
    %c0_i32 = arith.constant 0 : i32
    %c0_i32_0 = arith.constant 0 : i32
    %c0_i32_1 = arith.constant 0 : i32
    return %1, %c0_i32, %c0_i32_0 : i32, i32, i32
  }
  func.func @transform_2(%arg0: i32, %arg1: i32) -> (i32, i32, i32) {
    %c2_i32 = arith.constant 2 : i32
    %0 = arith.muli %arg0, %c2_i32 : i32
    %1 = arith.addi %0, %arg1 : i32
    %c0_i32 = arith.constant 0 : i32
    %c0_i32_0 = arith.constant 0 : i32
    %c0_i32_1 = arith.constant 0 : i32
    return %1, %c0_i32, %c0_i32_0 : i32, i32, i32
  }
  func.func @transform_3(%arg0: i32, %arg1: i32) -> (i32, i32, i32, i32) {
    %c2_i32 = arith.constant 2 : i32
    %0 = arith.muli %arg0, %c2_i32 : i32
    %1 = arith.addi %0, %arg1 : i32
    %c0_i32 = arith.constant 0 : i32
    %c0_i32_0 = arith.constant 0 : i32
    %c0_i32_1 = arith.constant 0 : i32
    %c0_i32_2 = arith.constant 0 : i32
    return %1, %c0_i32, %c0_i32_0, %c0_i32_1 : i32, i32, i32, i32
  }
  func.func @transform_4(%arg0: i32, %arg1: i32) -> (i32, i32, i32) {
    %c0_i32 = arith.constant 0 : i32
    %c0_i32_0 = arith.constant 0 : i32
    %c0_i32_1 = arith.constant 0 : i32
    return %arg0, %c0_i32, %c0_i32_0 : i32, i32, i32
  }
  func.func @transform_5(%arg0: i32, %arg1: i32) -> (i32, i32, i32) {
    %c0_i32 = arith.constant 0 : i32
    %c0_i32_0 = arith.constant 0 : i32
    %c0_i32_1 = arith.constant 0 : i32
    return %arg0, %c0_i32, %c0_i32_0 : i32, i32, i32
  }
  func.func @transform_6(%arg0: i32, %arg1: i32) -> (i32, i32) {
    %c0_i32 = arith.constant 0 : i32
    %c0_i32_0 = arith.constant 0 : i32
    %c0_i32_1 = arith.constant 0 : i32
    return %c0_i32, %c0_i32_0 : i32, i32
  }
  func.func @transform_7(%arg0: i32, %arg1: i32) -> (i32, i32) {
    %c0_i32 = arith.constant 0 : i32
    %c0_i32_0 = arith.constant 0 : i32
    %c0_i32_1 = arith.constant 0 : i32
    return %c0_i32, %c0_i32_0 : i32, i32
  }
  func.func @transform_8(%arg0: i32, %arg1: i32) -> (i32, i32) {
    %c0_i32 = arith.constant 0 : i32
    %c0_i32_0 = arith.constant 0 : i32
    %c0_i32_1 = arith.constant 0 : i32
    return %c0_i32, %c0_i32_0 : i32, i32
  }
  func.func @transform_9(%arg0: i32, %arg1: i32) -> (i32, i32, i32, i32) {
    %c2_i32 = arith.constant 2 : i32
    %0 = arith.muli %arg0, %c2_i32 : i32
    %1 = arith.addi %0, %arg1 : i32
    %c0_i32 = arith.constant 0 : i32
    %c0_i32_0 = arith.constant 0 : i32
    %c0_i32_1 = arith.constant 0 : i32
    %c0_i32_2 = arith.constant 0 : i32
    return %1, %c0_i32, %c0_i32_0, %c0_i32_1 : i32, i32, i32, i32
  }
}

module attributes {stable_mosaic.version = 11 : i64} {
  func.func @_stage1_kernel(%arg0: i32, %arg1: i32, %arg2: memref<1x8x16x8xf32, #tpu.memory_space<vmem>>, %arg3: memref<1x16x8xf32, #tpu.memory_space<vmem>>, %arg4: memref<1x16x8xf32, #tpu.memory_space<vmem>>, %arg5: memref<1x1x8xf32, #tpu.memory_space<vmem>>, %arg6: memref<1x1x8xf32, #tpu.memory_space<vmem>>, %arg7: memref<72x16xbf16, #tpu.memory_space<vmem>>, %arg8: memref<1x1x16xf32, #tpu.memory_space<vmem>>, %arg9: memref<1x8x16x16xbf16, #tpu.memory_space<vmem>>, %arg10: memref<1x2x16xf32, #tpu.memory_space<vmem>>, %arg11: memref<10x18x8xf32, #tpu.memory_space<vmem>>, %arg12: memref<8x16x72xbf16, #tpu.memory_space<vmem>>) attributes {dimension_semantics = [#tpu.dimension_semantics<parallel>, #tpu.dimension_semantics<parallel>], iteration_bounds = array<i64: 2, 2>, scalar_prefetch = 0 : i64, scratch_operands = 2 : i64, tpu.core_type = #tpu.core_type<tc>, window_params = [{transform_indices = @transform_0, window_bounds = array<i64: 1, 8, 16, 8>}, {transform_indices = @transform_1, window_bounds = array<i64: 1, 16, 8>}, {transform_indices = @transform_2, window_bounds = array<i64: 1, 16, 8>}, {transform_indices = @transform_3, window_bounds = array<i64: 1, 1, 8>}, {transform_indices = @transform_4, window_bounds = array<i64: 1, 1, 8>}, {pipeline_mode = #tpu.pipeline_mode<synchronous>, transform_indices = @transform_5, window_bounds = array<i64: 72, 16>}, {transform_indices = @transform_6, window_bounds = array<i64: 1, 1, 16>}, {transform_indices = @transform_7, window_bounds = array<i64: 1, 8, 16, 16>}, {transform_indices = @transform_8, window_bounds = array<i64: 1, 2, 16>}]} {
    %c0 = arith.constant 0 : index
    %c0_0 = arith.constant 0 : index
    %c0_1 = arith.constant 0 : index
    %0 = vector.load %arg3[%c0, %c0_0, %c0_1] : memref<1x16x8xf32, #tpu.memory_space<vmem>>, vector<1x16x8xf32>
    %c0_2 = arith.constant 0 : index
    %c0_3 = arith.constant 0 : index
    %c0_4 = arith.constant 0 : index
    %c0_5 = arith.constant 0 : index
    %1 = vector.load %arg2[%c0_2, %c0_3, %c0_4, %c0_5] : memref<1x8x16x8xf32, #tpu.memory_space<vmem>>, vector<1x8x16x8xf32>
    %2 = vector.shape_cast %1 : vector<1x8x16x8xf32> to vector<8x16x8xf32>
    %c0_6 = arith.constant 0 : index
    %c0_7 = arith.constant 0 : index
    %c0_8 = arith.constant 0 : index
    %3 = vector.load %arg4[%c0_6, %c0_7, %c0_8] : memref<1x16x8xf32, #tpu.memory_space<vmem>>, vector<1x16x8xf32>
    %4 = tpu.concatenate %0, %2, %3 in 0 : vector<1x16x8xf32>, vector<8x16x8xf32>, vector<1x16x8xf32> -> vector<10x16x8xf32>
    %c0_9 = arith.constant 0 : index
    %c0_10 = arith.constant 0 : index
    %c0_11 = arith.constant 0 : index
    %5 = vector.load %arg5[%c0_9, %c0_10, %c0_11] : memref<1x1x8xf32, #tpu.memory_space<vmem>>, vector<1x1x8xf32>
    %6 = vector.shape_cast %5 : vector<1x1x8xf32> to vector<1x8xf32>
    %7 = vector.shape_cast %6 : vector<1x8xf32> to vector<1x1x8xf32>
    %8 = vector.broadcast %7 : vector<1x1x8xf32> to vector<10x16x8xf32>
    %9 = arith.mulf %4, %8 : vector<10x16x8xf32>
    %c0_12 = arith.constant 0 : index
    %c0_13 = arith.constant 0 : index
    %c0_14 = arith.constant 0 : index
    %10 = vector.load %arg6[%c0_12, %c0_13, %c0_14] : memref<1x1x8xf32, #tpu.memory_space<vmem>>, vector<1x1x8xf32>
    %11 = vector.shape_cast %10 : vector<1x1x8xf32> to vector<1x8xf32>
    %12 = vector.shape_cast %11 : vector<1x8xf32> to vector<1x1x8xf32>
    %13 = vector.broadcast %12 : vector<1x1x8xf32> to vector<10x16x8xf32>
    %14 = arith.addf %9, %13 : vector<10x16x8xf32>
    %15 = arith.negf %14 : vector<10x16x8xf32>
    %16 = math.exp %15 : vector<10x16x8xf32>
    %cst = arith.constant 1.000000e+00 : f32
    %17 = vector.broadcast %cst : f32 to vector<10x16x8xf32>
    %18 = arith.addf %17, %16 : vector<10x16x8xf32>
    %19 = arith.divf %17, %18 : vector<10x16x8xf32>
    %20 = arith.mulf %14, %19 : vector<10x16x8xf32>
    %c0_15 = arith.constant 0 : index
    %c1 = arith.constant 1 : index
    %c0_16 = arith.constant 0 : index
    %21 = vector.load %arg11[%c0_15, %c1, %c0_16] : memref<10x18x8xf32, #tpu.memory_space<vmem>>, vector<10x16x8xf32>
    tpu.vector_store %arg11[%c0_15, %c1, %c0_16], %20 {strides = array<i32>} : memref<10x18x8xf32, #tpu.memory_space<vmem>>, vector<10x16x8xf32>,
    %cst_17 = arith.constant 0.000000e+00 : f32
    %22 = vector.broadcast %cst_17 : f32 to vector<10x1x8xf32>
    %c0_18 = arith.constant 0 : index
    %c0_19 = arith.constant 0 : index
    %c0_20 = arith.constant 0 : index
    %23 = vector.load %arg11[%c0_18, %c0_19, %c0_20] : memref<10x18x8xf32, #tpu.memory_space<vmem>>, vector<10x1x8xf32>
    tpu.vector_store %arg11[%c0_18, %c0_19, %c0_20], %22 {strides = array<i32>} : memref<10x18x8xf32, #tpu.memory_space<vmem>>, vector<10x1x8xf32>,
    %c0_21 = arith.constant 0 : index
    %c17 = arith.constant 17 : index
    %c0_22 = arith.constant 0 : index
    %24 = vector.load %arg11[%c0_21, %c17, %c0_22] : memref<10x18x8xf32, #tpu.memory_space<vmem>>, vector<10x1x8xf32>
    tpu.vector_store %arg11[%c0_21, %c17, %c0_22], %22 {strides = array<i32>} : memref<10x18x8xf32, #tpu.memory_space<vmem>>, vector<10x1x8xf32>,
    %c0_i32 = arith.constant 0 : i32
    %25 = arith.cmpi eq, %arg1, %c0_i32 : i32
    %26 = arith.extui %25 : i1 to i32
    %c0_i32_23 = arith.constant 0 : i32
    %27 = arith.cmpi ne, %26, %c0_i32_23 : i32
    scf.if %27 {
      %cst_88 = arith.constant 0.000000e+00 : f32
      %80 = vector.broadcast %cst_88 : f32 to vector<1x18x8xf32>
      %c0_89 = arith.constant 0 : index
      %c0_90 = arith.constant 0 : index
      %c0_91 = arith.constant 0 : index
      %81 = vector.load %arg11[%c0_89, %c0_90, %c0_91] : memref<10x18x8xf32, #tpu.memory_space<vmem>>, vector<1x18x8xf32>
      tpu.vector_store %arg11[%c0_89, %c0_90, %c0_91], %80 {strides = array<i32>} : memref<10x18x8xf32, #tpu.memory_space<vmem>>, vector<1x18x8xf32>,
    } else {
    }
    %c1_i32 = arith.constant 1 : i32
    %28 = arith.cmpi eq, %arg1, %c1_i32 : i32
    %29 = arith.extui %28 : i1 to i32
    %c0_i32_24 = arith.constant 0 : i32
    %30 = arith.cmpi ne, %29, %c0_i32_24 : i32
    scf.if %30 {
      %cst_88 = arith.constant 0.000000e+00 : f32
      %80 = vector.broadcast %cst_88 : f32 to vector<1x18x8xf32>
      %c9 = arith.constant 9 : index
      %c0_89 = arith.constant 0 : index
      %c0_90 = arith.constant 0 : index
      %81 = vector.load %arg11[%c9, %c0_89, %c0_90] : memref<10x18x8xf32, #tpu.memory_space<vmem>>, vector<1x18x8xf32>
      tpu.vector_store %arg11[%c9, %c0_89, %c0_90], %80 {strides = array<i32>} : memref<10x18x8xf32, #tpu.memory_space<vmem>>, vector<1x18x8xf32>,
    } else {
    }
    %c0_25 = arith.constant 0 : index
    %c0_26 = arith.constant 0 : index
    %c0_27 = arith.constant 0 : index
    %31 = vector.load %arg11[%c0_25, %c0_26, %c0_27] : memref<10x18x8xf32, #tpu.memory_space<vmem>>, vector<8x16x8xf32>
    %32 = arith.truncf %31 : vector<8x16x8xf32> to vector<8x16x8xbf16>
    %c0_28 = arith.constant 0 : index
    %c0_29 = arith.constant 0 : index
    %c0_30 = arith.constant 0 : index
    %33 = vector.load %arg12[%c0_28, %c0_29, %c0_30] : memref<8x16x72xbf16, #tpu.memory_space<vmem>>, vector<8x16x8xbf16>
    tpu.vector_store %arg12[%c0_28, %c0_29, %c0_30], %32 {strides = array<i32>} : memref<8x16x72xbf16, #tpu.memory_space<vmem>>, vector<8x16x8xbf16>,
    %c0_31 = arith.constant 0 : index
    %c1_32 = arith.constant 1 : index
    %c0_33 = arith.constant 0 : index
    %34 = vector.load %arg11[%c0_31, %c1_32, %c0_33] : memref<10x18x8xf32, #tpu.memory_space<vmem>>, vector<8x16x8xf32>
    %35 = arith.truncf %34 : vector<8x16x8xf32> to vector<8x16x8xbf16>
    %c0_34 = arith.constant 0 : index
    %c0_35 = arith.constant 0 : index
    %c8 = arith.constant 8 : index
    %36 = vector.load %arg12[%c0_34, %c0_35, %c8] : memref<8x16x72xbf16, #tpu.memory_space<vmem>>, vector<8x16x8xbf16>
    tpu.vector_store %arg12[%c0_34, %c0_35, %c8], %35 {strides = array<i32>} : memref<8x16x72xbf16, #tpu.memory_space<vmem>>, vector<8x16x8xbf16>,
    %c0_36 = arith.constant 0 : index
    %c2 = arith.constant 2 : index
    %c0_37 = arith.constant 0 : index
    %37 = vector.load %arg11[%c0_36, %c2, %c0_37] : memref<10x18x8xf32, #tpu.memory_space<vmem>>, vector<8x16x8xf32>
    %38 = arith.truncf %37 : vector<8x16x8xf32> to vector<8x16x8xbf16>
    %c0_38 = arith.constant 0 : index
    %c0_39 = arith.constant 0 : index
    %c16 = arith.constant 16 : index
    %39 = vector.load %arg12[%c0_38, %c0_39, %c16] : memref<8x16x72xbf16, #tpu.memory_space<vmem>>, vector<8x16x8xbf16>
    tpu.vector_store %arg12[%c0_38, %c0_39, %c16], %38 {strides = array<i32>} : memref<8x16x72xbf16, #tpu.memory_space<vmem>>, vector<8x16x8xbf16>,
    %c1_40 = arith.constant 1 : index
    %c0_41 = arith.constant 0 : index
    %c0_42 = arith.constant 0 : index
    %40 = vector.load %arg11[%c1_40, %c0_41, %c0_42] : memref<10x18x8xf32, #tpu.memory_space<vmem>>, vector<8x16x8xf32>
    %41 = arith.truncf %40 : vector<8x16x8xf32> to vector<8x16x8xbf16>
    %c0_43 = arith.constant 0 : index
    %c0_44 = arith.constant 0 : index
    %c24 = arith.constant 24 : index
    %42 = vector.load %arg12[%c0_43, %c0_44, %c24] : memref<8x16x72xbf16, #tpu.memory_space<vmem>>, vector<8x16x8xbf16>
    tpu.vector_store %arg12[%c0_43, %c0_44, %c24], %41 {strides = array<i32>} : memref<8x16x72xbf16, #tpu.memory_space<vmem>>, vector<8x16x8xbf16>,
    %c1_45 = arith.constant 1 : index
    %c1_46 = arith.constant 1 : index
    %c0_47 = arith.constant 0 : index
    %43 = vector.load %arg11[%c1_45, %c1_46, %c0_47] : memref<10x18x8xf32, #tpu.memory_space<vmem>>, vector<8x16x8xf32>
    %44 = arith.truncf %43 : vector<8x16x8xf32> to vector<8x16x8xbf16>
    %c0_48 = arith.constant 0 : index
    %c0_49 = arith.constant 0 : index
    %c32 = arith.constant 32 : index
    %45 = vector.load %arg12[%c0_48, %c0_49, %c32] : memref<8x16x72xbf16, #tpu.memory_space<vmem>>, vector<8x16x8xbf16>
    tpu.vector_store %arg12[%c0_48, %c0_49, %c32], %44 {strides = array<i32>} : memref<8x16x72xbf16, #tpu.memory_space<vmem>>, vector<8x16x8xbf16>,
    %c1_50 = arith.constant 1 : index
    %c2_51 = arith.constant 2 : index
    %c0_52 = arith.constant 0 : index
    %46 = vector.load %arg11[%c1_50, %c2_51, %c0_52] : memref<10x18x8xf32, #tpu.memory_space<vmem>>, vector<8x16x8xf32>
    %47 = arith.truncf %46 : vector<8x16x8xf32> to vector<8x16x8xbf16>
    %c0_53 = arith.constant 0 : index
    %c0_54 = arith.constant 0 : index
    %c40 = arith.constant 40 : index
    %48 = vector.load %arg12[%c0_53, %c0_54, %c40] : memref<8x16x72xbf16, #tpu.memory_space<vmem>>, vector<8x16x8xbf16>
    tpu.vector_store %arg12[%c0_53, %c0_54, %c40], %47 {strides = array<i32>} : memref<8x16x72xbf16, #tpu.memory_space<vmem>>, vector<8x16x8xbf16>,
    %c2_55 = arith.constant 2 : index
    %c0_56 = arith.constant 0 : index
    %c0_57 = arith.constant 0 : index
    %49 = vector.load %arg11[%c2_55, %c0_56, %c0_57] : memref<10x18x8xf32, #tpu.memory_space<vmem>>, vector<8x16x8xf32>
    %50 = arith.truncf %49 : vector<8x16x8xf32> to vector<8x16x8xbf16>
    %c0_58 = arith.constant 0 : index
    %c0_59 = arith.constant 0 : index
    %c48 = arith.constant 48 : index
    %51 = vector.load %arg12[%c0_58, %c0_59, %c48] : memref<8x16x72xbf16, #tpu.memory_space<vmem>>, vector<8x16x8xbf16>
    tpu.vector_store %arg12[%c0_58, %c0_59, %c48], %50 {strides = array<i32>} : memref<8x16x72xbf16, #tpu.memory_space<vmem>>, vector<8x16x8xbf16>,
    %c2_60 = arith.constant 2 : index
    %c1_61 = arith.constant 1 : index
    %c0_62 = arith.constant 0 : index
    %52 = vector.load %arg11[%c2_60, %c1_61, %c0_62] : memref<10x18x8xf32, #tpu.memory_space<vmem>>, vector<8x16x8xf32>
    %53 = arith.truncf %52 : vector<8x16x8xf32> to vector<8x16x8xbf16>
    %c0_63 = arith.constant 0 : index
    %c0_64 = arith.constant 0 : index
    %c56 = arith.constant 56 : index
    %54 = vector.load %arg12[%c0_63, %c0_64, %c56] : memref<8x16x72xbf16, #tpu.memory_space<vmem>>, vector<8x16x8xbf16>
    tpu.vector_store %arg12[%c0_63, %c0_64, %c56], %53 {strides = array<i32>} : memref<8x16x72xbf16, #tpu.memory_space<vmem>>, vector<8x16x8xbf16>,
    %c2_65 = arith.constant 2 : index
    %c2_66 = arith.constant 2 : index
    %c0_67 = arith.constant 0 : index
    %55 = vector.load %arg11[%c2_65, %c2_66, %c0_67] : memref<10x18x8xf32, #tpu.memory_space<vmem>>, vector<8x16x8xf32>
    %56 = arith.truncf %55 : vector<8x16x8xf32> to vector<8x16x8xbf16>
    %c0_68 = arith.constant 0 : index
    %c0_69 = arith.constant 0 : index
    %c64 = arith.constant 64 : index
    %57 = vector.load %arg12[%c0_68, %c0_69, %c64] : memref<8x16x72xbf16, #tpu.memory_space<vmem>>, vector<8x16x8xbf16>
    tpu.vector_store %arg12[%c0_68, %c0_69, %c64], %56 {strides = array<i32>} : memref<8x16x72xbf16, #tpu.memory_space<vmem>>, vector<8x16x8xbf16>,
    %c0_70 = arith.constant 0 : index
    %c0_71 = arith.constant 0 : index
    %c0_72 = arith.constant 0 : index
    %58 = vector.load %arg12[%c0_70, %c0_71, %c0_72] : memref<8x16x72xbf16, #tpu.memory_space<vmem>>, vector<8x16x72xbf16>
    %59 = vector.shape_cast %58 : vector<8x16x72xbf16> to vector<128x72xbf16>
    %c0_73 = arith.constant 0 : index
    %c0_74 = arith.constant 0 : index
    %60 = vector.load %arg7[%c0_73, %c0_74] : memref<72x16xbf16, #tpu.memory_space<vmem>>, vector<72x16xbf16>
    %cst_75 = arith.constant dense<0.000000e+00> : vector<128x16xf32>
    %61 = tpu.matmul %59, %60, %cst_75 {dimension_numbers = #tpu.dot_dimension_numbers<[1], [0], [0], [1], [0, 0, 1, 1], [], []>} : vector<128x72xbf16>, vector<72x16xbf16>, vector<128x16xf32> -> vector<128x16xf32>
    %c0_76 = arith.constant 0 : index
    %c0_77 = arith.constant 0 : index
    %c0_78 = arith.constant 0 : index
    %62 = vector.load %arg8[%c0_76, %c0_77, %c0_78] : memref<1x1x16xf32, #tpu.memory_space<vmem>>, vector<1x1x16xf32>
    %63 = vector.shape_cast %62 : vector<1x1x16xf32> to vector<1x16xf32>
    %64 = vector.broadcast %63 : vector<1x16xf32> to vector<128x16xf32>
    %65 = arith.addf %61, %64 : vector<128x16xf32>
    %cst_79 = arith.constant dense<0.000000e+00> : vector<16xf32>
    %66 = vector.multi_reduction <add>, %65, %cst_79 [0] : vector<128x16xf32> to vector<16xf32>
    %67 = vector.shape_cast %66 : vector<16xf32> to vector<1x16xf32>
    %68 = arith.mulf %65, %65 : vector<128x16xf32>
    %cst_80 = arith.constant dense<0.000000e+00> : vector<16xf32>
    %69 = vector.multi_reduction <add>, %68, %cst_80 [0] : vector<128x16xf32> to vector<16xf32>
    %70 = vector.shape_cast %69 : vector<16xf32> to vector<1x16xf32>
    %71 = tpu.concatenate %67, %70 in 0 : vector<1x16xf32>, vector<1x16xf32> -> vector<2x16xf32>
    %c0_81 = arith.constant 0 : index
    %c0_82 = arith.constant 0 : index
    %c0_83 = arith.constant 0 : index
    %72 = vector.load %arg10[%c0_81, %c0_82, %c0_83] : memref<1x2x16xf32, #tpu.memory_space<vmem>>, vector<1x2x16xf32>
    %73 = vector.shape_cast %72 : vector<1x2x16xf32> to vector<2x16xf32>
    %74 = vector.shape_cast %71 : vector<2x16xf32> to vector<1x2x16xf32>
    tpu.vector_store %arg10[%c0_81, %c0_82, %c0_83], %74 {strides = array<i32>} : memref<1x2x16xf32, #tpu.memory_space<vmem>>, vector<1x2x16xf32>,
    %75 = vector.shape_cast %65 : vector<128x16xf32> to vector<8x16x16xf32>
    %76 = arith.truncf %75 : vector<8x16x16xf32> to vector<8x16x16xbf16>
    %c0_84 = arith.constant 0 : index
    %c0_85 = arith.constant 0 : index
    %c0_86 = arith.constant 0 : index
    %c0_87 = arith.constant 0 : index
    %77 = vector.load %arg9[%c0_84, %c0_85, %c0_86, %c0_87] : memref<1x8x16x16xbf16, #tpu.memory_space<vmem>>, vector<1x8x16x16xbf16>
    %78 = vector.shape_cast %77 : vector<1x8x16x16xbf16> to vector<8x16x16xbf16>
    %79 = vector.shape_cast %76 : vector<8x16x16xbf16> to vector<1x8x16x16xbf16>
    tpu.vector_store %arg9[%c0_84, %c0_85, %c0_86, %c0_87], %79 {strides = array<i32>} : memref<1x8x16x16xbf16, #tpu.memory_space<vmem>>, vector<1x8x16x16xbf16>,
    return
  }
  func.func @transform_0(%arg0: i32, %arg1: i32) -> (i32, i32, i32, i32) {
    %c2_i32 = arith.constant 2 : i32
    %0 = arith.muli %arg0, %c2_i32 : i32
    %1 = arith.addi %0, %arg1 : i32
    %c0_i32 = arith.constant 0 : i32
    %c0_i32_0 = arith.constant 0 : i32
    %c0_i32_1 = arith.constant 0 : i32
    %c0_i32_2 = arith.constant 0 : i32
    return %1, %c0_i32, %c0_i32_0, %c0_i32_1 : i32, i32, i32, i32
  }
  func.func @transform_1(%arg0: i32, %arg1: i32) -> (i32, i32, i32) {
    %c2_i32 = arith.constant 2 : i32
    %0 = arith.muli %arg0, %c2_i32 : i32
    %1 = arith.addi %0, %arg1 : i32
    %c0_i32 = arith.constant 0 : i32
    %c0_i32_0 = arith.constant 0 : i32
    %c0_i32_1 = arith.constant 0 : i32
    return %1, %c0_i32, %c0_i32_0 : i32, i32, i32
  }
  func.func @transform_2(%arg0: i32, %arg1: i32) -> (i32, i32, i32) {
    %c2_i32 = arith.constant 2 : i32
    %0 = arith.muli %arg0, %c2_i32 : i32
    %1 = arith.addi %0, %arg1 : i32
    %c0_i32 = arith.constant 0 : i32
    %c0_i32_0 = arith.constant 0 : i32
    %c0_i32_1 = arith.constant 0 : i32
    return %1, %c0_i32, %c0_i32_0 : i32, i32, i32
  }
  func.func @transform_3(%arg0: i32, %arg1: i32) -> (i32, i32, i32) {
    %c0_i32 = arith.constant 0 : i32
    %c0_i32_0 = arith.constant 0 : i32
    %c0_i32_1 = arith.constant 0 : i32
    return %arg0, %c0_i32, %c0_i32_0 : i32, i32, i32
  }
  func.func @transform_4(%arg0: i32, %arg1: i32) -> (i32, i32, i32) {
    %c0_i32 = arith.constant 0 : i32
    %c0_i32_0 = arith.constant 0 : i32
    %c0_i32_1 = arith.constant 0 : i32
    return %arg0, %c0_i32, %c0_i32_0 : i32, i32, i32
  }
  func.func @transform_5(%arg0: i32, %arg1: i32) -> (i32, i32) {
    %c0_i32 = arith.constant 0 : i32
    %c0_i32_0 = arith.constant 0 : i32
    %c0_i32_1 = arith.constant 0 : i32
    return %c0_i32, %c0_i32_0 : i32, i32
  }
  func.func @transform_6(%arg0: i32, %arg1: i32) -> (i32, i32, i32) {
    %c0_i32 = arith.constant 0 : i32
    %c0_i32_0 = arith.constant 0 : i32
    %c0_i32_1 = arith.constant 0 : i32
    return %arg0, %c0_i32, %c0_i32_0 : i32, i32, i32
  }
  func.func @transform_7(%arg0: i32, %arg1: i32) -> (i32, i32, i32, i32) {
    %c2_i32 = arith.constant 2 : i32
    %0 = arith.muli %arg0, %c2_i32 : i32
    %1 = arith.addi %0, %arg1 : i32
    %c0_i32 = arith.constant 0 : i32
    %c0_i32_0 = arith.constant 0 : i32
    %c0_i32_1 = arith.constant 0 : i32
    %c0_i32_2 = arith.constant 0 : i32
    return %1, %c0_i32, %c0_i32_0, %c0_i32_1 : i32, i32, i32, i32
  }
  func.func @transform_8(%arg0: i32, %arg1: i32) -> (i32, i32, i32) {
    %c2_i32 = arith.constant 2 : i32
    %0 = arith.muli %arg0, %c2_i32 : i32
    %1 = arith.addi %0, %arg1 : i32
    %c0_i32 = arith.constant 0 : i32
    %c0_i32_0 = arith.constant 0 : i32
    %c0_i32_1 = arith.constant 0 : i32
    return %1, %c0_i32, %c0_i32_0 : i32, i32, i32
  }
}

</mosaic_0001>

<bundles_post_ra>
// kernel: unet_block_forward.3
= control target key start
LH: loop header
LB: loop body
LE: loop exit
PB: predicated region body
PF: predicated region fallthrough
CT: control target
= control target key end

     0   :  { %s3045_s30 = smov 0   ;;  %s3047_s10 = smov 0   ;;  %s4226_s0 = inlined_call_operand.vmem [shape: bf16[4,8,16,16], index: 0, kind: input, shape index: {}]   ;;  %s4227_s1 = inlined_call_operand.vmem [shape: bf16[4,16,16], index: 1, kind: input, shape index: {}]   ;;  %s4228_s2 = inlined_call_operand.vmem [shape: bf16[4,16,16], index: 2, kind: input, shape index: {}]   ;;  %s4229_s3 = inlined_call_operand.vmem [shape: bf16[4,8,16,8], index: 3, kind: input, shape index: {}]   ;;  %s4230_s4 = inlined_call_operand.vmem [shape: f32[2,1,16], index: 4, kind: input, shape index: {}]   ;;  %s4231_s5 = inlined_call_operand.vmem [shape: f32[2,1,16], index: 5, kind: input, shape index: {}]   ;;  %s4232_s6 = inlined_call_operand.vmem [shape: bf16[144,16], index: 6, kind: input, shape index: {}]   ;;  %s4233_s7 = inlined_call_operand.vmem [shape: bf16[8,16], index: 7, kind: input, shape index: {}]   ;;  %s4234_s8 = inlined_call_operand.vmem [shape: f32[1,16], index: 8, kind: input, shape index: {}]   ;;  %s4235_s9 = inlined_call_operand.vmem [shape: f32[4,8,16,16], index: 9, kind: output, shape index: {}]  }
   0x1   :  { %4236 = sst [smem:[#allocation4_spill]] %s4226_s0  ;;  %s3049_s11 = smov 0  }
   0x2   :  { %s3051_s12 = smov 0   ;;  %s3053_s13 = smov 0  }
   0x3 LB: > { %s28_s14 = sadd.s32 1, %s2975_s11  ;;  %s31_s15 = sadd.s32 1, %s2979_s12  ;;  %s2983_s13 = sphi %s3053_s13, %s19_s13   ;;  %s2979_s12 = sphi %s3051_s12, %s4349_s12   ;;  %s2975_s11 = sphi %s3049_s11, %s4348_s11   ;;  %s2971_s10 = sphi %s3047_s10, %s4347_s10   ;;  %s2967_s30 = sphi %s3045_s30, %s4346_s30  }
   0x4   : > { %p29_p0 = scmp.ge.s32.totalorder %s28_s14, 2  ;;  %p2531_p1 = scmp.ge.s32.totalorder %s2983_s13, 1 }
   0x5   : > { %p381_p2 = scmp.lt.s32.totalorder %s2983_s13, 5 }
   0x6   : > { %s4351_s14 = smov (%p29_p0, %s28_s14), 0  ;;  %s4353_s15 = smov (!%p29_p0, %s31_s15), %s2979_s12 }
   0x7   : > { %p382_p3 = pnand %p2531_p1, %p381_p2  ;;  %p33_p4 = scmp.ge.s32.totalorder %s4353_s15, 2 }
   0x8   : > { %s2532_s16 = sshll.u32 (!%p382_p3), %s2971_s10, 1  ;;  %p484_p5 = scmp.lt.s32.totalorder (!%p382_p3), %s2971_s10, 1 }
   0x9   : > { %s4355_s15 = smov (%p33_p4, %s4353_s15), 0  ;;  %385 = sbr.rel (%p382_p3) target bundleno = 718 (0x2ce), region = 56 }
   0xa   : > { %s449_s17 = sadd.s32 (!%p382_p3), %s2967_s30, %s2532_s16  ;;  %s4237_s0 = sld [smem:[#allocation4_spill]] (!%p382_p3) }
   0xb   : > { %p450_p6 = scmp.lt.s32.totalorder (!%p382_p3), %s449_s17, 3  ;;  %p2567_p7 = scmp.ne.s32.totalorder (!%p382_p3), %s2967_s30, 0 }
   0xe   : > { %s4357_s10 = smov (!%p484_p5, %s2971_s10), 1  ;;  %s4359_s17 = smov (!%p450_p6, %s449_s17), 3 }
   0xf   : > { %s486_s20 = scalar_lea.vmem %s4230_s4, %s4357_s10  ;;  %s489_s23 = scalar_lea.vmem %s4231_s5, %s4357_s10 }
  0x10   : > { %s2719_s24 = sshll.u32 %s4359_s17, 6  ;;  %s2720_s25 = sshll.u32 %s4359_s17, 3  ;;  %v3098_v0 = vld [vmem:[%s486_s20] ss:$0 sm:$0xff] }
  0x11   : > { %s3091_s28 = scalar_lea.vmem %s4237_s0, %s2719_s24  ;;  %s463_s18 = scalar_lea.vmem %s4227_s1, %s2720_s25  ;;  %v3113_v5 = vld [vmem:[%s489_s23] ss:$0 sm:$0xff] }
  0x12   : > { %s3103_s10 = scalar_lea.vmem %s4229_s3, %s2719_s24  ;;  %s2723_s22 = sshll.u32 %s4359_s17, 7  ;;  %v2758_v1 = vld [vmem:[%s463_s18] sm:$0xff]   ;;  %v2797_v3 = vld [vmem:[%s3091_s28 + $0x8] sm:$0xff]   ;;  %v2798_v9 = vld [vmem:[%s3091_s28 + $0x10] sm:$0xff]  }
  0x13   : > { %v2762_v2 = vld [vmem:[%s3091_s28] sm:$0xff]   ;;  %s3111_s0 = scalar_lea.vmem %s4235_s9, %s2723_s22  ;;  %v2759_v4 = vunpack.c.l.bf16 %v2758_v1  ;;  %v2760_v6 = vunpack.c.h.bf16 %v2758_v1  ;;  %v2767_v10 = vunpack.c.l.bf16 %v2797_v3  ;;  %v2768_v11 = vunpack.c.h.bf16 %v2797_v3  ;;  %v2799_v25 = vld [vmem:[%s3091_s28 + $0x18] sm:$0xff]   ;;  %v3160_v45 = vld [vmem:[%s3091_s28 + $0x28] sm:$0xff]   ;;  %s472_s24 = scalar_lea.vmem %s4228_s2, %s2720_s25 }
  0x14   : > { %v2763_v7 = vunpack.c.l.bf16 %v2762_v2  ;;  %v2764_v8 = vunpack.c.h.bf16 %v2762_v2  ;;  %v2771_v12 = vunpack.c.l.bf16 %v2798_v9  ;;  %v2772_v13 = vunpack.c.h.bf16 %v2798_v9  ;;  %v2800_v29 = vld [vmem:[%s3091_s28 + $0x20] sm:$0xff]  }
  0x15   : > { %v544_v14 = vmul.f32 %v3098_v0, %v2759_v4  ;;  %v545_v15 = vmul.f32 %v3098_v0, %v2760_v6  ;;  %v548_v18 = vmul.f32 %v3098_v0, %v2767_v10  ;;  %v549_v19 = vmul.f32 %v3098_v0, %v2768_v11 }
  0x16   : > { %v546_v16 = vmul.f32 %v3098_v0, %v2763_v7  ;;  %v547_v17 = vmul.f32 %v3098_v0, %v2764_v8  ;;  %v550_v20 = vmul.f32 %v3098_v0, %v2771_v12  ;;  %v551_v24 = vmul.f32 %v3098_v0, %v2772_v13 }
  0x17   : > { %v3124_v21 = vadd.f32 %v3113_v5, %v544_v14  ;;  %v3127_v22 = vadd.f32 %v3113_v5, %v545_v15  ;;  %v3138_v27 = vadd.f32 %v3113_v5, %v548_v18  ;;  %v3141_v28 = vadd.f32 %v3113_v5, %v549_v19 }
  0x18   : > { %v3130_v23 = vadd.f32 %v3113_v5, %v546_v16  ;;  %v3135_v26 = vadd.f32 %v3113_v5, %v547_v17  ;;  %v3149_v34 = vadd.f32 %v3113_v5, %v550_v20  ;;  %v3152_v35 = vadd.f32 %v3113_v5, %v551_v24 }
  0x19   : > { %v2547_v30 = vmul.f32 -1.442695, %v3124_v21  ;;  %v2548_v31 = vmul.f32 -1.442695, %v3127_v22  ;;  %v2775_v36 = vunpack.c.l.bf16 %v2799_v25  ;;  %v2551_v37 = vmul.f32 -1.442695, %v3138_v27 }
  0x1a   : > { %v2549_v32 = vmul.f32 -1.442695, %v3130_v23  ;;  %v2550_v33 = vmul.f32 -1.442695, %v3135_v26  ;;  %v2552_v38 = vmul.f32 -1.442695, %v3141_v28  ;;  %v2776_v39 = vunpack.c.h.bf16 %v2799_v25 }
  0x1b   : > { %2864 = vpow2.f32 %v2547_v30  ;;  %v552_v40 = vmul.f32 %v3098_v0, %v2775_v36  ;;  %v2779_v41 = vunpack.c.l.bf16 %v2800_v29  ;;  %v2780_v42 = vunpack.c.h.bf16 %v2800_v29 }
  0x1c   : > { %2866 = vpow2.f32 %v2548_v31  ;;  %v553_v43 = vmul.f32 %v3098_v0, %v2776_v39  ;;  %v2553_v44 = vmul.f32 -1.442695, %v3149_v34  ;;  %v2554_v46 = vmul.f32 -1.442695, %v3152_v35 }
  0x1d   : > { %2868 = vpow2.f32 %v2549_v32  ;;  %v3164_v47 = vadd.f32 %v3113_v5, %v552_v40  ;;  %v554_v48 = vmul.f32 %v3098_v0, %v2779_v41  ;;  %v555_v49 = vmul.f32 %v3098_v0, %v2780_v42 }
  0x1e   : > { %2870 = vpow2.f32 %v2550_v33  ;;  %v3169_v51 = vadd.f32 %v3113_v5, %v553_v43  ;;  %v2783_v52 = vunpack.c.l.bf16 %v3160_v45  ;;  %v2784_v10 = vunpack.c.h.bf16 %v3160_v45 }
  0x1f   : > { %2872 = vpow2.f32 %v2551_v37  ;;  %v2555_v57 = vmul.f32 -1.442695, %v3164_v47  ;;  %v3180_v60 = vadd.f32 %v3113_v5, %v554_v48  ;;  %v3183_v61 = vadd.f32 %v3113_v5, %v555_v49 }
  0x20   : > { %2874 = vpow2.f32 %v2552_v38  ;;  %v3188_v1 = vmul.f32 -1.442695, %v3169_v51  ;;  %v3191_v2 = vmul.f32 %v3098_v0, %v2783_v52 }
  0x21   : > { %v2865_v50 = vpop.eup %2864  ;;  %2876 = vpow2.f32 %v2553_v44 }
  0x22   : > { %v2867_v53 = vpop.eup %2866  ;;  %v3172_v54 = vadd.f32 1.0, %v2865_v50  ;;  %2878 = vpow2.f32 %v2554_v46  ;;  %v3348_v52 = vadd.f32 %v3113_v5, %v3191_v2 }
  0x23   : > { %v2869_v55 = vpop.eup %2868  ;;  %v3174_v56 = vadd.f32 1.0, %v2867_v53 }
  0x24   : > { %v2871_v58 = vpop.eup %2870  ;;  %2880 = vrcp.f32 %v3172_v54  ;;  %v679_v59 = vand.u32 2147483648, %v3172_v54  ;;  %v677_v63 = vand.u32 2147483647, %v3172_v54  ;;  %v3195_v7 = vadd.f32 1.0, %v2869_v55 }
  0x25   : > { %v2873_v62 = vpop.eup %2872  ;;  %2882 = vrcp.f32 %v3174_v56  ;;  %v692_v4 = vand.u32 2147483647, %v3174_v56  ;;  %v694_v6 = vand.u32 2147483648, %v3174_v56  ;;  %v3197_v8 = vadd.f32 1.0, %v2871_v58 }
  0x26   : > { %v2875_v3 = vpop.eup %2874  ;;  %vm673_vm0 = vweird.f32 %v3172_v54  ;;  %v3200_v9 = vadd.f32 1.0, %v2873_v62  ;;  %2884 = vpow2.f32 %v2555_v57  ;;  %v3203_v12 = vor.u32 1.1754944e-38, %v679_v59 }
  0x27   : > { %v2877_v11 = vpop.eup %2876  ;;  %vm688_vm1 = vweird.f32 %v3174_v56  ;;  %2886 = vrcp.f32 %v3195_v7  ;;  %v709_v13 = vand.u32 2147483648, %v3195_v7  ;;  %vm3210_vm2 = vcmp.eq.f32.partialorder %v677_v63, 8.507059e+37 }
  0x28   : > { %v3208_v14 = vpop.eup %2878  ;;  %v707_v16 = vand.u32 2147483647, %v3195_v7  ;;  %2888 = vrcp.f32 %v3197_v8  ;;  %v724_v17 = vand.u32 2147483648, %v3197_v8  ;;  %v3217_v18 = vadd.f32 1.0, %v2875_v3 }
  0x29   : > { %vm3219_vm3 = vcmp.eq.f32.partialorder %v692_v4, 8.507059e+37  ;;  %v695_v24 = vor.u32 1.1754944e-38, %v694_v6  ;;  %v722_v25 = vand.u32 2147483647, %v3197_v8  ;;  %2890 = vrcp.f32 %v3200_v9 }
  0x2a   : > { %v2881_v19 = vpop.eup %2880  ;;  %vm703_vm4 = vweird.f32 %v3195_v7  ;;  %v3227_v31 = vor.u32 1.1754944e-38, %v709_v13  ;;  %vm718_vm5 = vweird.f32 %v3197_v8  ;;  %vm733_vm7 = vweird.f32 %v3200_v9 }
  0x2b   : > { %v2883_v29 = vpop.eup %2882  ;;  %v669_v30 = vmul.f32 %v2881_v19, %v3172_v54  ;;  %v737_v33 = vand.u32 2147483647, %v3200_v9  ;;  %v739_v36 = vand.u32 2147483648, %v3200_v9  ;;  %vm674_vm8 = vweird.f32 %v2881_v19 }
  0x2c   : > { %v684_v32 = vmul.f32 %v2883_v29, %v3174_v56  ;;  %v2885_v37 = vpop.eup %2884  ;;  %vm3234_vm9 = vcmp.eq.f32.partialorder %v707_v16, 8.507059e+37  ;;  %v725_v40 = vor.u32 1.1754944e-38, %v724_v17  ;;  %2892 = vrcp.f32 %v3217_v18  ;;  %vm3254_vm14 = vmor %vm673_vm0, %vm674_vm8 }
  0x2d   : > { %v670_v38 = vsub.f32 1.0, %v669_v30  ;;  %v2887_v41 = vpop.eup %2886  ;;  %vm689_vm10 = vweird.f32 %v2883_v29  ;;  %vm3239_vm11 = vcmp.eq.f32.partialorder %v722_v25, 8.507059e+37  ;;  %v752_v44 = vand.u32 2147483647, %v3217_v18 }
  0x2e   : > { %v685_v42 = vsub.f32 1.0, %v684_v32  ;;  %v754_v46 = vand.u32 2147483648, %v3217_v18  ;;  %v2889_v48 = vpop.eup %2888  ;;  %v699_v50 = vmul.f32 %v2887_v41, %v3195_v7  ;;  %vm3246_vm12 = vcmp.eq.f32.partialorder %v737_v33, 8.507059e+37  ;;  %vm3262_vm6 = vmor %vm688_vm1, %vm689_vm10 }
  0x2f   : > { %v671_v49 = vmul.f32 %v2881_v19, %v670_v38  ;;  %v2891_v53 = vpop.eup %2890  ;;  %vm704_vm15 = vweird.f32 %v2887_v41  ;;  %v714_v58 = vmul.f32 %v2889_v48, %v3197_v8  ;;  %v740_v59 = vor.u32 1.1754944e-38, %v739_v36  ;;  %v3382_v38 = vld [vmem:[%s3091_s28 + $0x38] sm:$0xff]  }
  0x30   : > { %v686_v57 = vmul.f32 %v2883_v29, %v685_v42  ;;  %v700_v3 = vsub.f32 1.0, %v699_v50  ;;  %vm719_vm13 = vweird.f32 %v2889_v48  ;;  %v729_v54 = vmul.f32 %v2891_v53, %v3200_v9  ;;  %vm3283_vm1 = vmor %vm703_vm4, %vm704_vm15 }
  0x31   : > { %v672_v62 = vadd.f32 %v2881_v19, %v671_v49  ;;  %v715_v6 = vsub.f32 1.0, %v714_v58  ;;  %vm734_vm0 = vweird.f32 %v2891_v53  ;;  %vm3267_vm8 = vcmp.eq.f32.partialorder %v752_v44, 8.507059e+37 }
  0x32   : > { %v687_v4 = vadd.f32 %v2883_v29, %v686_v57  ;;  %v755_v16 = vor.u32 1.1754944e-38, %v754_v46  ;;  %v2893_v17 = vpop.eup %2892  ;;  %v701_v25 = vmul.f32 %v2887_v41, %v700_v3  ;;  %v730_v30 = vsub.f32 1.0, %v729_v54  ;;  %vm3302_vm4 = vmor %vm733_vm7, %vm734_vm0  ;;  %v2802_v54 = vld [vmem:[%s3091_s28 + $0x30] sm:$0xff]  }
  0x33   : > { %v676_v56 = vsel %vm3254_vm14, %v2881_v19, %v672_v62  ;;  %v3273_v32 = vadd.f32 1.0, %v2877_v11  ;;  %v716_v42 = vmul.f32 %v2889_v48, %v715_v6  ;;  %v744_v19 = vmul.f32 %v2893_v17, %v3217_v18 }
  0x34   : > { %v681_v33 = vsel %vm3210_vm2, %v3203_v12, %v676_v56  ;;  %v691_v36 = vsel %vm3262_vm6, %v2883_v29, %v687_v4  ;;  %v702_v15 = vadd.f32 %v2887_v41, %v701_v25  ;;  %vm3294_vm2 = vmor %vm718_vm5, %vm719_vm13  ;;  %v731_v7 = vmul.f32 %v2891_v53, %v730_v30 }
  0x35   : > { %v968_v11 = vmul.f32 %v681_v33, %v3124_v21  ;;  %v696_v44 = vsel %vm3219_vm3, %v695_v24, %v691_v36  ;;  %v717_v46 = vadd.f32 %v2889_v48, %v716_v42  ;;  %v745_v20 = vsub.f32 1.0, %v744_v19 }
  0x36   : > { %v969_v29 = vmul.f32 %v696_v44, %v3127_v22  ;;  %vm749_vm3 = vweird.f32 %v2893_v17  ;;  %vm4260_vm6 = vcmask 130048   ;;  %v706_v8 = vsel %vm3283_vm1, %v2887_v41, %v702_v15 }
  0x37   : > { %989 = vst.msk [vmem:[#allocation2 + $0x1] sm:$0xff] %vm4260_vm6, %v968_v11  ;;  %v732_v24 = vadd.f32 %v2891_v53, %v731_v7  ;;  %2894 = vrcp.f32 %v3273_v32  ;;  %v3311_v22 = vadd.f32 1.0, %v3208_v14  ;;  %vm4261_vm5 = vmmov %vm4260_vm6  ;;  %v711_v9 = vsel %vm3234_vm9, %v3227_v31, %v706_v8 }
  0x38   : > { %990 = vst.msk [vmem:[#allocation2 + $0x9] sm:$0xff] %vm4261_vm5, %v969_v29  ;;  %v721_v49 = vsel %vm3294_vm2, %v2889_v48, %v717_v46  ;;  %v746_v50 = vmul.f32 %v2893_v17, %v745_v20  ;;  %v3319_v55 = vadd.f32 1.0, %v2885_v37  ;;  %v970_v41 = vmul.f32 %v711_v9, %v3130_v23  ;;  %vm4265_vm9 = vmmov %vm4261_vm5 }
  0x39   : > { %v726_v57 = vsel %vm3239_vm11, %v725_v40, %v721_v49  ;;  %v736_v14 = vsel %vm3302_vm4, %v2891_v53, %v732_v24  ;;  %vm4262_vm7 = vweird.f32 %v3217_v18  ;;  %v767_v31 = vand.u32 2147483647, %v3273_v32  ;;  %vm4266_vm11 = vmmov %vm4261_vm5 }
  0x3a   : > { %vm3328_vm10 = vmor %vm4262_vm7, %vm749_vm3  ;;  %v971_v39 = vmul.f32 %v726_v57, %v3135_v26  ;;  %v741_v37 = vsel %vm3246_vm12, %v740_v59, %v736_v14  ;;  %v747_v23 = vadd.f32 %v2893_v17, %v746_v50  ;;  %v769_v43 = vand.u32 2147483648, %v3273_v32  ;;  %991 = vst.msk [vmem:[#allocation2 + $0x19] sm:$0xff] %vm4265_vm9, %v970_v41 }
  0x3b   : > { %v972_v40 = vmul.f32 %v741_v37, %v3138_v27  ;;  %2896 = vrcp.f32 %v3311_v22  ;;  %v2557_v18 = vmul.f32 -1.442695, %v3180_v60  ;;  %v2558_v48 = vmul.f32 -1.442695, %v3183_v61  ;;  %vm4267_vm12 = vmmov %vm4261_vm5 }
  0x3c   : > { %992 = vst.msk [vmem:[#allocation2 + $0x21] sm:$0xff] %vm4266_vm11, %v971_v39  ;;  %v751_v26 = vsel %vm3328_vm10, %v2893_v17, %v747_v23  ;;  %2898 = vrcp.f32 %v3319_v55  ;;  %v557_v27 = vmul.f32 %v3098_v0, %v2784_v10  ;;  %vm763_vm13 = vweird.f32 %v3273_v32  ;;  %vm4270_vm1 = vmmov %vm4261_vm5 }
  0x3d   : > { %v2895_v53 = vpop.eup %2894  ;;  %993 = vst.msk [vmem:[#allocation2 + $0x31] sm:$0xff] %vm4267_vm12, %v972_v40  ;;  %v756_v59 = vsel %vm3267_vm8, %v755_v16, %v751_v26  ;;  %vm3357_vm14 = vcmp.eq.f32.partialorder %v767_v31, 8.507059e+37  ;;  %v782_v63 = vand.u32 2147483647, %v3311_v22  ;;  %v770_v3 = vor.u32 1.1754944e-38, %v769_v43  ;;  %vm4279_vm9 = vmmov %vm4270_vm1 }
  0x3e   : > { %v973_v2 = vmul.f32 %v756_v59, %v3141_v28  ;;  %v759_v45 = vmul.f32 %v2895_v53, %v3273_v32  ;;  %v784_v10 = vand.u32 2147483648, %v3311_v22  ;;  %vm764_vm15 = vweird.f32 %v2895_v53  ;;  %vm4280_vm12 = vmmov %vm4270_vm1 }
  0x3f   : > { %vm778_vm0 = vweird.f32 %v3311_v22  ;;  %vm793_vm8 = vweird.f32 %v3319_v55  ;;  %2900 = vpow2.f32 %v3188_v1  ;;  %v2559_v28 = vmul.f32 -1.442695, %v3348_v52  ;;  %vm3387_vm4 = vmor %vm763_vm13, %vm764_vm15 }
  0x40   : > { %994 = vst.msk [vmem:[#allocation2 + $0x39] sm:$0xff] %vm4270_vm1, %v973_v2  ;;  %v760_v4 = vsub.f32 1.0, %v759_v45  ;;  %2902 = vpow2.f32 %v2557_v18  ;;  %v3372_v6 = vadd.f32 %v3113_v5, %v557_v27  ;;  %vm3374_vm2 = vcmp.eq.f32.partialorder %v782_v63, 8.507059e+37  ;;  %vm4283_vm15 = vmmov %vm4270_vm1 }
  0x41   : > { %v2897_v13 = vpop.eup %2896  ;;  %v797_v17 = vand.u32 2147483647, %v3319_v55  ;;  %v799_v56 = vand.u32 2147483648, %v3319_v55  ;;  %v2787_v1 = vunpack.c.l.bf16 %v2802_v54  ;;  %v785_v36 = vor.u32 1.1754944e-38, %v784_v10 }
  0x42   : > { %v2899_v25 = vpop.eup %2898  ;;  %v761_v30 = vmul.f32 %v2895_v53, %v760_v4  ;;  %v774_v33 = vmul.f32 %v2897_v13, %v3311_v22  ;;  %2904 = vpow2.f32 %v2558_v48  ;;  %v2560_v11 = vmul.f32 -1.442695, %v3372_v6 }
  0x43   : > { %v789_v19 = vmul.f32 %v2899_v25, %v3319_v55  ;;  %v558_v44 = vmul.f32 %v3098_v0, %v2787_v1  ;;  %v2788_v15 = vunpack.c.h.bf16 %v2802_v54  ;;  %vm779_vm3 = vweird.f32 %v2897_v13 }
  0x44   : > { %v762_v12 = vadd.f32 %v2895_v53, %v761_v30  ;;  %v775_v7 = vsub.f32 1.0, %v774_v33  ;;  %2906 = vpow2.f32 %v2559_v28  ;;  %vm794_vm6 = vweird.f32 %v2899_v25  ;;  %vm3406_vm5 = vmor %vm778_vm0, %vm779_vm3 }
  0x45   : > { %v2901_v29 = vpop.eup %2900  ;;  %v790_v46 = vsub.f32 1.0, %v789_v19  ;;  %2908 = vpow2.f32 %v2560_v11  ;;  %v2791_v32 = vunpack.c.l.bf16 %v3382_v38  ;;  %v3400_v9 = vadd.f32 %v3113_v5, %v558_v44  ;;  %vm3416_vm7 = vmor %vm793_vm8, %vm794_vm6 }
  0x46   : > { %v2903_v21 = vpop.eup %2902  ;;  %v766_v20 = vsel %vm3387_vm4, %v2895_v53, %v762_v12  ;;  %v776_v8 = vmul.f32 %v2897_v13, %v775_v7  ;;  %v3397_v24 = vadd.f32 1.0, %v2901_v29  ;;  %v800_v57 = vor.u32 1.1754944e-38, %v799_v56 }
  0x47   : > { %v771_v49 = vsel %vm3357_vm14, %v770_v3, %v766_v20  ;;  %v791_v41 = vmul.f32 %v2899_v25, %v790_v46  ;;  %v3410_v14 = vadd.f32 1.0, %v2903_v21  ;;  %v559_v22 = vmul.f32 %v3098_v0, %v2788_v15 }
  0x48   : > { %v2905_v58 = vpop.eup %2904  ;;  %v974_v31 = vmul.f32 %v771_v49, %v3149_v34  ;;  %v777_v39 = vadd.f32 %v2897_v13, %v776_v8  ;;  %2910 = vrcp.f32 %v3397_v24  ;;  %vm798_vm10 = vcmp.eq.f32.partialorder %v797_v17, 8.507059e+37 }
  0x49   : > { %v792_v23 = vadd.f32 %v2899_v25, %v791_v41  ;;  %2912 = vrcp.f32 %v3410_v14  ;;  %v560_v43 = vmul.f32 %v3098_v0, %v2791_v32  ;;  %v812_v55 = vand.u32 2147483647, %v3397_v24 }
  0x4a   : > { %v2907_v40 = vpop.eup %2906  ;;  %995 = vst.msk [vmem:[#allocation2 + $0x49] sm:$0xff] %vm4279_vm9, %v974_v31  ;;  %v781_v34 = vsel %vm3406_vm5, %v2897_v13, %v777_v39  ;;  %v814_v18 = vand.u32 2147483648, %v3397_v24  ;;  %v2561_v48 = vmul.f32 -1.442695, %v3400_v9  ;;  %v827_v59 = vand.u32 2147483647, %v3410_v14 }
  0x4b   : > { %v2909_v26 = vpop.eup %2908  ;;  %v786_v27 = vsel %vm3374_vm2, %v785_v36, %v781_v34  ;;  %v796_v53 = vsel %vm3416_vm7, %v2899_v25, %v792_v23  ;;  %v2792_v62 = vunpack.c.h.bf16 %v3382_v38  ;;  %v829_v45 = vand.u32 2147483648, %v3410_v14 }
  0x4c   : > { %v975_v63 = vmul.f32 %v786_v27, %v3152_v35  ;;  %v801_v2 = vsel %vm798_vm10, %v800_v57, %v796_v53  ;;  %v3439_v3 = vadd.f32 %v3113_v5, %v559_v22  ;;  %vm808_vm11 = vweird.f32 %v3397_v24 }
  0x4d   : > { %v976_v10 = vmul.f32 %v801_v2, %v3164_v47  ;;  %v3443_v54 = vadd.f32 1.0, %v2905_v58  ;;  %v3445_v4 = vadd.f32 1.0, %v2907_v40  ;;  %vm3448_vm13 = vcmp.eq.f32.partialorder %v812_v55, 8.507059e+37 }
  0x4e   : > { %v2911_v28 = vpop.eup %2910  ;;  %996 = vst.msk [vmem:[#allocation2 + $0x51] sm:$0xff] %vm4280_vm12, %v975_v63  ;;  %v815_v35 = vor.u32 1.1754944e-38, %v814_v18  ;;  %vm823_vm14 = vweird.f32 %v3410_v14  ;;  %2914 = vpow2.f32 %v2561_v48  ;;  %vm3455_vm0 = vcmp.eq.f32.partialorder %v827_v59, 8.507059e+37 }
  0x4f   : > { %v2913_v16 = vpop.eup %2912  ;;  %997 = vst.msk [vmem:[#allocation2 + $0x61] sm:$0xff] %vm4283_vm15, %v976_v10  ;;  %v804_v47 = vmul.f32 %v2911_v28, %v3397_v24  ;;  %2916 = vrcp.f32 %v3443_v54  ;;  %v3460_v56 = vadd.f32 1.0, %v2909_v26  ;;  %v830_v25 = vor.u32 1.1754944e-38, %v829_v45 }
  0x50   : > { %v819_v1 = vmul.f32 %v2913_v16, %v3410_v14  ;;  %v842_v30 = vand.u32 2147483647, %v3443_v54  ;;  %v844_v33 = vand.u32 2147483648, %v3443_v54  ;;  %vm809_vm8 = vweird.f32 %v2911_v28 }
  0x51   : > { %v805_v36 = vsub.f32 1.0, %v804_v47  ;;  %2918 = vrcp.f32 %v3445_v4  ;;  %v2562_v38 = vmul.f32 -1.442695, %v3439_v3  ;;  %vm824_vm1 = vweird.f32 %v2913_v16  ;;  %vm3476_vm4 = vmor %vm808_vm11, %vm809_vm8 }
  0x52   : > { %v820_v42 = vsub.f32 1.0, %v819_v1  ;;  %v857_v19 = vand.u32 2147483647, %v3445_v4  ;;  %v3469_v11 = vadd.f32 %v3113_v5, %v560_v43  ;;  %vm838_vm2 = vweird.f32 %v3443_v54  ;;  %vm3488_vm5 = vmor %vm823_vm14, %vm824_vm1 }
  0x53   : > { %v806_v44 = vmul.f32 %v2911_v28, %v805_v36  ;;  %2920 = vrcp.f32 %v3460_v56  ;;  %v561_v15 = vmul.f32 %v3098_v0, %v2792_v62  ;;  %vm3480_vm3 = vcmp.eq.f32.partialorder %v842_v30, 8.507059e+37 }
  0x54   : > { %v2915_v12 = vpop.eup %2914  ;;  %v821_v29 = vmul.f32 %v2913_v16, %v820_v42  ;;  %v845_v32 = vor.u32 1.1754944e-38, %v844_v33  ;;  %vm853_vm6 = vweird.f32 %v3445_v4  ;;  %v859_v24 = vand.u32 2147483648, %v3445_v4 }
  0x55   : > { %v2917_v21 = vpop.eup %2916  ;;  %v807_v20 = vadd.f32 %v2911_v28, %v806_v44  ;;  %v3493_v49 = vadd.f32 1.0, %v2915_v12  ;;  %2922 = vpow2.f32 %v2562_v38  ;;  %vm3496_vm7 = vcmp.eq.f32.partialorder %v857_v19, 8.507059e+37 }
  0x56   : > { %v822_v50 = vadd.f32 %v2913_v16, %v821_v29  ;;  %v834_v41 = vmul.f32 %v2917_v21, %v3443_v54  ;;  %vm868_vm10 = vweird.f32 %v3460_v56  ;;  %v872_v14 = vand.u32 2147483647, %v3460_v56 }
  0x57   : > { %v2919_v58 = vpop.eup %2918  ;;  %v811_v31 = vsel %vm3476_vm4, %v2911_v28, %v807_v20  ;;  %vm839_vm9 = vweird.f32 %v2917_v21  ;;  %2924 = vrcp.f32 %v3493_v49  ;;  %v2563_v39 = vmul.f32 -1.442695, %v3469_v11 }
  0x58   : > { %v816_v37 = vsel %vm3448_vm13, %v815_v35, %v811_v31  ;;  %v826_v22 = vsel %vm3488_vm5, %v2913_v16, %v822_v50  ;;  %v835_v23 = vsub.f32 1.0, %v834_v41  ;;  %v849_v43 = vmul.f32 %v2919_v58, %v3445_v4  ;;  %vm3521_vm13 = vmor %vm838_vm2, %vm839_vm9  ;;  %v2794_v4 = vld [vmem:[%s472_s24] sm:$0xff]  }
  0x59   : > { %v2921_v40 = vpop.eup %2920  ;;  %v977_v34 = vmul.f32 %v816_v37, %v3169_v51  ;;  %v831_v55 = vsel %vm3455_vm0, %v830_v25, %v826_v22  ;;  %vm854_vm11 = vweird.f32 %v2919_v58  ;;  %v874_v18 = vand.u32 2147483648, %v3460_v56  ;;  %vm4298_vm0 = vmmov %vm4280_vm12 }
  0x5a   : > { %v978_v48 = vmul.f32 %v831_v55, %v3180_v60  ;;  %v836_v26 = vmul.f32 %v2917_v21, %v835_v23  ;;  %v850_v27 = vsub.f32 1.0, %v849_v43  ;;  %v864_v53 = vmul.f32 %v2921_v40, %v3460_v56  ;;  %vm3540_vm8 = vmor %vm853_vm6, %vm854_vm11 }
  0x5b   : > { %v2923_v59 = vpop.eup %2922  ;;  %998 = vst.msk [vmem:[#allocation2 + $0x69] sm:$0xff] %vm4280_vm12, %v977_v34  ;;  %v860_v62 = vor.u32 1.1754944e-38, %v859_v24  ;;  %vm869_vm14 = vweird.f32 %v2921_v40  ;;  %vm3525_vm15 = vcmp.eq.f32.partialorder %v872_v14, 8.507059e+37  ;;  %2926 = vpow2.f32 %v2563_v39  ;;  %vm4306_vm5 = vmmov %vm4298_vm0 }
  0x5c   : > { %999 = vst.msk [vmem:[#allocation2 + $0x79] sm:$0xff] %vm4298_vm0, %v978_v48  ;;  %v837_v60 = vadd.f32 %v2917_v21, %v836_v26  ;;  %v851_v2 = vmul.f32 %v2919_v58, %v850_v27  ;;  %v865_v45 = vsub.f32 1.0, %v864_v53  ;;  %v3535_v10 = vadd.f32 1.0, %v2923_v59  ;;  %vm3557_vm2 = vmor %vm868_vm10, %vm869_vm14 }
  0x5d   : > { %v2925_v54 = vpop.eup %2924  ;;  %v875_v13 = vor.u32 1.1754944e-38, %v874_v18  ;;  %vm883_vm1 = vweird.f32 %v3493_v49  ;;  %v887_v35 = vand.u32 2147483647, %v3493_v49  ;;  %v3547_v16 = vadd.f32 %v3113_v5, %v561_v15  ;;  %vm4307_vm10 = vmmov %vm4298_vm0 }
  0x5e   : > { %v841_v47 = vsel %vm3521_vm13, %v2917_v21, %v837_v60  ;;  %v852_v17 = vadd.f32 %v2919_v58, %v851_v2  ;;  %v866_v1 = vmul.f32 %v2921_v40, %v865_v45  ;;  %v879_v25 = vmul.f32 %v2925_v54, %v3493_v49  ;;  %vm4308_vm13 = vmmov %vm4298_vm0 }
  0x5f   : > { %v846_v30 = vsel %vm3480_vm3, %v845_v32, %v841_v47  ;;  %vm884_vm4 = vweird.f32 %v2925_v54  ;;  %v889_v36 = vand.u32 2147483648, %v3493_v49  ;;  %2928 = vrcp.f32 %v3535_v10  ;;  %vm4303_vm3 = vmmov %vm4298_vm0 }
  0x60   : > { %v979_v38 = vmul.f32 %v846_v30, %v3183_v61  ;;  %v856_v42 = vsel %vm3540_vm8, %v2919_v58, %v852_v17  ;;  %v867_v19 = vadd.f32 %v2921_v40, %v866_v1  ;;  %v880_v44 = vsub.f32 1.0, %v879_v25  ;;  %vm3578_vm6 = vmor %vm883_vm1, %vm884_vm4 }
  0x61   : > { %v2927_v15 = vpop.eup %2926  ;;  %v861_v56 = vsel %vm3496_vm7, %v860_v62, %v856_v42  ;;  %v2564_v12 = vmul.f32 -1.442695, %v3547_v16  ;;  %v2795_v7 = vunpack.c.l.bf16 %v2794_v4  ;;  %v2796_v29 = vunpack.c.h.bf16 %v2794_v4  ;;  %vm4315_vm4 = vmmov %vm4303_vm3 }
  0x62   : > { %1000 = vst.msk [vmem:[#allocation2 + $0x81] sm:$0xff] %vm4303_vm3, %v979_v38  ;;  %v980_v46 = vmul.f32 %v861_v56, %v3348_v52  ;;  %v871_v61 = vsel %vm3557_vm2, %v2921_v40, %v867_v19  ;;  %v881_v32 = vmul.f32 %v2925_v54, %v880_v44  ;;  %v664_v21 = vadd.f32 1.0, %v2927_v15 }
  0x63   : > { %v876_v20 = vsel %vm3525_vm15, %v875_v13, %v871_v61  ;;  %v890_v24 = vor.u32 1.1754944e-38, %v889_v36  ;;  %2930 = vpow2.f32 %v2564_v12  ;;  %vm888_vm7 = vcmp.eq.f32.partialorder %v887_v35, 8.507059e+37 }
  0x64   : > { %1001 = vst.msk [vmem:[#allocation2 + $0x91] sm:$0xff] %vm4306_vm5, %v980_v46  ;;  %v981_v52 = vmul.f32 %v876_v20, %v3372_v6  ;;  %v882_v50 = vadd.f32 %v2925_v54, %v881_v32  ;;  %2932 = vrcp.f32 %v664_v21  ;;  %v562_v57 = vmul.f32 %v3098_v0, %v2795_v7  ;;  %vm4316_vm5 = vmmov %vm4315_vm4 }
  0x65   : > { %v2929_v41 = vpop.eup %2928  ;;  %v563_v14 = vmul.f32 %v3098_v0, %v2796_v29  ;;  %vm898_vm9 = vweird.f32 %v3535_v10  ;;  %v902_v6 = vand.u32 2147483647, %v3535_v10  ;;  %v904_v39 = vand.u32 2147483648, %v3535_v10 }
  0x66   : > { %1002 = vst.msk [vmem:[#allocation2 + $0x99] sm:$0xff] %vm4307_vm10, %v981_v52  ;;  %v886_v49 = vsel %vm3578_vm6, %v2925_v54, %v882_v50  ;;  %v894_v58 = vmul.f32 %v2929_v41, %v3535_v10  ;;  %v3594_v37 = vadd.f32 %v3113_v5, %v562_v57  ;;  %vm899_vm11 = vweird.f32 %v2929_v41 }
  0x67   : > { %v891_v31 = vsel %vm888_vm7, %v890_v24, %v886_v49  ;;  %v3598_v23 = vadd.f32 %v3113_v5, %v563_v14  ;;  %vm1009_vm12 = vcmask 122880   ;;  %vm3605_vm14 = vmor %vm898_vm9, %vm899_vm11  ;;  %vm3609_vm15 = vcmp.eq.f32.partialorder %v902_v6, 8.507059e+37 }
  0x68   : > { %v982_v22 = vmul.f32 %v891_v31, %v3400_v9  ;;  %v895_v0 = vsub.f32 1.0, %v894_v58  ;;  %v2565_v40 = vmul.f32 -1.442695, %v3594_v37  ;;  %v905_v26 = vor.u32 1.1754944e-38, %v904_v39 }
  0x69   : > { %v2931_v43 = vpop.eup %2930  ;;  %v2566_v48 = vmul.f32 -1.442695, %v3598_v23  ;;  %v2985_v53 = vmov 0.0   ;;  %vm913_vm0 = vweird.f32 %v664_v21  ;;  %v919_v51 = vand.u32 2147483648, %v664_v21 }
  0x6a   : > { %v2933_v34 = vpop.eup %2932  ;;  %1003 = vst.msk [vmem:[#allocation2 + $0xa9] sm:$0xff] %vm4308_vm13, %v982_v22  ;;  %v896_v55 = vmul.f32 %v2929_v41, %v895_v0  ;;  %v665_v18 = vadd.f32 1.0, %v2931_v43  ;;  %2934 = vpow2.f32 %v2565_v40  ;;  %v917_v63 = vand.u32 2147483647, %v664_v21  ;;  %vm4317_vm13 = vmmov %vm4315_vm4 }
  0x6b   : > { %v909_v27 = vmul.f32 %v2933_v34, %v664_v21  ;;  %1010 = vst.msk [vmem:[#allocation2] sm:$0x1] %vm1009_vm12, %v2985_v53  ;;  %vm914_vm8 = vweird.f32 %v2933_v34  ;;  %v920_v28 = vor.u32 1.1754944e-38, %v919_v51 }
  0x6c   : > { %v897_v59 = vadd.f32 %v2929_v41, %v896_v55  ;;  %2936 = vrcp.f32 %v665_v18  ;;  %1011 = vst.msk [vmem:[#allocation2 + $0x18] sm:$0x1] %vm1009_vm12, %v2985_v53  ;;  %vm3629_vm1 = vmor %vm913_vm0, %vm914_vm8  ;;  %vm918_vm2 = vcmp.eq.f32.partialorder %v917_v63, 8.507059e+37  ;;  %vm928_vm3 = vweird.f32 %v665_v18 }
  0x6d   : > { %v910_v62 = vsub.f32 1.0, %v909_v27  ;;  %2938 = vpow2.f32 %v2566_v48  ;;  %1012 = vst.msk [vmem:[#allocation2 + $0x30] sm:$0x1] %vm1009_vm12, %v2985_v53  ;;  %v932_v30 = vand.u32 2147483647, %v665_v18  ;;  %v934_v33 = vand.u32 2147483648, %v665_v18 }
  0x6e   : > { %v901_v60 = vsel %vm3605_vm14, %v2929_v41, %v897_v59  ;;  %1013 = vst.msk [vmem:[#allocation2 + $0x48] sm:$0x1] %vm1009_vm12, %v2985_v53 }
  0x6f   : > { %v906_v2 = vsel %vm3609_vm15, %v905_v26, %v901_v60  ;;  %v911_v45 = vmul.f32 %v2933_v34, %v910_v62  ;;  %1014 = vst.msk [vmem:[#allocation2 + $0x60] sm:$0x1] %vm1009_vm12, %v2985_v53  ;;  %v935_v44 = vor.u32 1.1754944e-38, %v934_v33  ;;  %vm933_vm10 = vcmp.eq.f32.partialorder %v932_v30, 8.507059e+37 }
  0x70   : > { %v983_v10 = vmul.f32 %v906_v2, %v3439_v3  ;;  %1015 = vst.msk [vmem:[#allocation2 + $0x78] sm:$0x1] %vm1009_vm12, %v2985_v53  ;;  %v2935_v13 = vpop.eup %2934 }
  0x71   : > { %v912_v35 = vadd.f32 %v2933_v34, %v911_v45  ;;  %1016 = vst.msk [vmem:[#allocation2 + $0x90] sm:$0x1] %vm1009_vm12, %v2985_v53  ;;  %v666_v17 = vadd.f32 1.0, %v2935_v13 }
  0x72   : > { %v2937_v47 = vpop.eup %2936  ;;  %1004 = vst.msk [vmem:[#allocation2 + $0xb1] sm:$0xff] %vm4315_vm4, %v983_v10 }
  0x73   : > { %v2939_v3 = vpop.eup %2938  ;;  %v916_v1 = vsel %vm3629_vm1, %v2933_v34, %v912_v35  ;;  %v924_v25 = vmul.f32 %v2937_v47, %v665_v18  ;;  %1017 = vst.msk [vmem:[#allocation2 + $0xa8] sm:$0x1] %vm1009_vm12, %v2985_v53  ;;  %2940 = vrcp.f32 %v666_v17  ;;  %vm929_vm6 = vweird.f32 %v2937_v47 }
  0x74   : > { %v921_v4 = vsel %vm918_vm2, %v920_v28, %v916_v1  ;;  %1018 = vst.msk [vmem:[#allocation2 + $0xc0] sm:$0x1] %vm1009_vm12, %v2985_v53  ;;  %v667_v42 = vadd.f32 1.0, %v2939_v3  ;;  %vm930_vm7 = vmor %vm928_vm3, %vm929_vm6  ;;  %v949_v7 = vand.u32 2147483648, %v666_v17  ;;  %vm943_vm9 = vweird.f32 %v666_v17 }
  0x75   : > { %v984_v36 = vmul.f32 %v921_v4, %v3469_v11  ;;  %v925_v38 = vsub.f32 1.0, %v924_v25  ;;  %1019 = vst.msk [vmem:[#allocation2 + $0xd8] sm:$0x1] %vm1009_vm12, %v2985_v53  ;;  %v947_v21 = vand.u32 2147483647, %v666_v17  ;;  %vm4318_vm3 = vmmov %vm4315_vm4 }
  0x76   : > { %1020 = vst.msk [vmem:[#allocation2 + $0x11] sm:$0x1] %vm1009_vm12, %v2985_v53  ;;  %2942 = vrcp.f32 %v667_v42  ;;  %v950_v24 = vor.u32 1.1754944e-38, %v949_v7  ;;  %v964_v52 = vand.u32 2147483648, %v667_v42  ;;  %vm958_vm15 = vweird.f32 %v667_v42 }
  0x77   : > { %1005 = vst.msk [vmem:[#allocation2 + $0xc1] sm:$0xff] %vm4316_vm5, %v984_v36  ;;  %v926_v19 = vmul.f32 %v2937_v47, %v925_v38  ;;  %vm948_vm8 = vcmp.eq.f32.partialorder %v947_v21, 8.507059e+37 }
  0x78   : > { %1021 = vst.msk [vmem:[#allocation2 + $0x29] sm:$0x1] %vm1009_vm12, %v2985_v53  ;;  %v965_v49 = vor.u32 1.1754944e-38, %v964_v52 }
  0x79   : > { %v927_v11 = vadd.f32 %v2937_v47, %v926_v19  ;;  %1022 = vst.msk [vmem:[#allocation2 + $0x41] sm:$0x1] %vm1009_vm12, %v2985_v53  ;;  %v2941_v15 = vpop.eup %2940 }
  0x7a   : > { %1023 = vst.msk [vmem:[#allocation2 + $0x59] sm:$0x1] %vm1009_vm12, %v2985_v53  ;;  %v939_v12 = vmul.f32 %v2941_v15, %v666_v17  ;;  %vm944_vm11 = vweird.f32 %v2941_v15 }
  0x7b   : > { %v931_v56 = vsel %vm930_vm7, %v2937_v47, %v927_v11  ;;  %1024 = vst.msk [vmem:[#allocation2 + $0x71] sm:$0x1] %vm1009_vm12, %v2985_v53  ;;  %vm945_vm14 = vmor %vm943_vm9, %vm944_vm11 }
  0x7c   : > { %v936_v29 = vsel %vm933_vm10, %v935_v44, %v931_v56  ;;  %1025 = vst.msk [vmem:[#allocation2 + $0x89] sm:$0x1] %vm1009_vm12, %v2985_v53  ;;  %v2943_v46 = vpop.eup %2942  ;;  %v940_v32 = vsub.f32 1.0, %v939_v12 }
  0x7d   : > { %v985_v61 = vmul.f32 %v936_v29, %v3547_v16  ;;  %1026 = vst.msk [vmem:[#allocation2 + $0xa1] sm:$0x1] %vm1009_vm12, %v2985_v53  ;;  %v954_v20 = vmul.f32 %v2943_v46, %v667_v42  ;;  %vm959_vm0 = vweird.f32 %v2943_v46  ;;  %v962_v16 = vand.u32 2147483647, %v667_v42 }
  0x7e   : > { %1027 = vst.msk [vmem:[#allocation2 + $0xb9] sm:$0x1] %vm1009_vm12, %v2985_v53  ;;  %v941_v8 = vmul.f32 %v2941_v15, %v940_v32  ;;  %vm960_vm1 = vmor %vm958_vm15, %vm959_vm0 }
  0x7f   : > { %1006 = vst.msk [vmem:[#allocation2 + $0xc9] sm:$0xff] %vm4317_vm13, %v985_v61  ;;  %v955_v50 = vsub.f32 1.0, %v954_v20  ;;  %vm963_vm2 = vcmp.eq.f32.partialorder %v962_v16, 8.507059e+37 }
  0x80   : > { %1028 = vst.msk [vmem:[#allocation2 + $0xd1] sm:$0x1] %vm1009_vm12, %v2985_v53  ;;  %v942_v41 = vadd.f32 %v2941_v15, %v941_v8 }
  0x81   : > { %1029 = vst.msk [vmem:[#allocation2 + $0xe9] sm:$0x1] %vm1009_vm12, %v2985_v53  ;;  %v956_v57 = vmul.f32 %v2943_v46, %v955_v50 }
  0x82   : > { %v946_v14 = vsel %vm945_vm14, %v2941_v15, %v942_v41 }
  0x83   : > { %v951_v58 = vsel %vm948_vm8, %v950_v24, %v946_v14  ;;  %v957_v31 = vadd.f32 %v2943_v46, %v956_v57 }
  0x84   : > { %v986_v6 = vmul.f32 %v951_v58, %v3594_v37 }
  0x85   : > { %v961_v39 = vsel %vm960_vm1, %v2943_v46, %v957_v31  ;;  %1033 = sbr.rel (%p2567_p7) target bundleno = 142 (0x8e), region = 60 }
  0x86   : > { %1007 = vst.msk [vmem:[#allocation2 + $0xd9] sm:$0xff] %vm4315_vm4, %v986_v6  ;;  %v966_v22 = vsel %vm963_vm2, %v965_v49, %v961_v39 }
  0x87   : > { %v987_v0 = vmul.f32 %v966_v22, %v3598_v23 }
  0x89   : > { %1008 = vst.msk [vmem:[#allocation2 + $0xe1] sm:$0xff] %vm4318_vm3, %v987_v0 }
  0x8a   : > { %vm1036_vm12 = vcmask 123904   ;;  %v2986_v43 = vmov 0.0   ;;  %vm4319_vm6 = vcmask 130048  }
  0x8b   : > { %1034 = vst.msk [vmem:[#allocation2] sm:$0xff] %vm4319_vm6, %v2986_v43  ;;  %vm4320_vm5 = vmmov %vm4319_vm6 }
  0x8c   : > { %1035 = vst.msk [vmem:[#allocation2 + $0x8] sm:$0xff] %vm4320_vm5, %v2986_v43 }
  0x8d   : > { %1037 = vst.msk [vmem:[#allocation2 + $0x10] sm:$0x3] %vm1036_vm12, %v2986_v43 }
  0x8e PF: > { %p2568_p8 = scmp.ne.s32.totalorder %s2967_s30, 1 }
  0x90   : > { %1041 = sbr.rel (%p2568_p8) target bundleno = 153 (0x99), region = 64 }
  0x95   : > { %vm1045_vm7 = vcmask 123904   ;;  %v2987_v37 = vmov 0.0   ;;  %vm4321_vm10 = vcmask 130048  }
  0x96   : > { %1043 = vst.msk [vmem:[#allocation2 + $0xd8] sm:$0xff] %vm4321_vm10, %v2987_v37  ;;  %vm4322_vm9 = vmmov %vm4321_vm10 }
  0x97   : > { %1044 = vst.msk [vmem:[#allocation2 + $0xe0] sm:$0xff] %vm4322_vm9, %v2987_v37 }
  0x98   : > { %1046 = vst.msk [vmem:[#allocation2 + $0xe8] sm:$0x3] %vm1045_vm7, %v2987_v37 }
  0x99 PF: > { %v1098_v23 = vld [vmem:[#allocation2 + $0x19] sm:$0xff]  ;;  %v1096_v40 = vld [vmem:[#allocation2 + $0x1] sm:$0xff]  ;;  %v1100_v18 = vld [vmem:[#allocation2 + $0x31] sm:$0xff]  ;;  %s2988_s17 = smov 16   ;;  %s2989_s30 = smov 32   ;;  %vm1079_vm11 = vcmask 125952  }
  0x9a   : > { %v3681_v34 = vpack.c.bf16 %v1098_v23, %v1098_v23  ;;  %v1112_v55 = vpack.c.bf16 %v1096_v40, %v1096_v40  ;;  %v3686_v48 = vpack.c.bf16 %v1100_v18, %v1100_v18  ;;  %v1099_v9 = vld [vmem:[#allocation2 + $0x21] sm:$0xff]  ;;  %v1097_v5 = vld [vmem:[#allocation2 + $0x9] sm:$0xff]  ;;  %v1101_v26 = vld [vmem:[#allocation2 + $0x39] sm:$0xff]  ;;  %s2990_s25 = smov 48   ;;  %s2991_s28 = smov 64   ;;  %vm1192_vm13 = vcmask 257152  }
  0x9b   : > { %v1115_v27 = vpack.c.bf16 %v1099_v9, %v1099_v9  ;;  %v1113_v53 = vpack.c.bf16 %v1097_v5, %v1097_v5  ;;  %v3690_v59 = vpack.c.bf16 %v1101_v26, %v1101_v26  ;;  %v1103_v51 = vld [vmem:[#allocation2 + $0x51] sm:$0xff]  ;;  %v1102_v62 = vld [vmem:[#allocation2 + $0x49] sm:$0xff]  ;;  %v1104_v63 = vld [vmem:[#allocation2 + $0x61] sm:$0xff]  ;;  %s2992_s29 = smov 80   ;;  %s2993_s16 = smov 96   ;;  %vm1305_vm14 = vcmask 388352  }
  0x9c   : > { %1148 = vrot.lane.b32.xlu1 %v3681_v34, %s2988_s17  ;;  %1144 = vrot.lane.b32.xlu0 %v1112_v55, %s2988_s17  ;;  %v3696_v60 = vpack.c.bf16 %v1103_v51, %v1103_v51  ;;  %v3698_v2 = vpack.c.bf16 %v1102_v62, %v1102_v62  ;;  %v3700_v45 = vpack.c.bf16 %v1104_v63, %v1104_v63  ;;  %v1106_v10 = vld [vmem:[#allocation2 + $0x79] sm:$0xff]  ;;  %v1105_v54 = vld [vmem:[#allocation2 + $0x69] sm:$0xff]  ;;  %v1107_v28 = vld [vmem:[#allocation2 + $0x81] sm:$0xff]  ;;  %s2994_s18 = smov 112   ;;  %vm2053_vm15 = vcmask 1043456  }
  0x9d   : > { %1152 = vrot.lane.b32.xlu2 %v3686_v48, %s2988_s17  ;;  %v3708_v13 = vpack.c.bf16 %v1106_v10, %v1106_v10  ;;  %v3710_v35 = vpack.c.bf16 %v1105_v54, %v1105_v54  ;;  %v3712_v47 = vpack.c.bf16 %v1107_v28, %v1107_v28  ;;  %v1109_v17 = vld [vmem:[#allocation2 + $0x99] sm:$0xff]  ;;  %v1108_v3 = vld [vmem:[#allocation2 + $0x91] sm:$0xff]  ;;  %v1110_v1 = vld [vmem:[#allocation2 + $0xa9] sm:$0xff]  ;;  %vm1419_vm0 = vcmask 519552  }
  0x9e   : > { %v3720_v25 = vpack.c.bf16 %v1109_v17, %v1109_v17  ;;  %v3722_v4 = vpack.c.bf16 %v1108_v3, %v1108_v3  ;;  %v3724_v30 = vpack.c.bf16 %v1110_v1, %v1110_v1  ;;  %v1209_v33 = vld [vmem:[#allocation2 + $0x2] sm:$0xff]  ;;  %v1111_v36 = vld [vmem:[#allocation2 + $0xb1] sm:$0xff]  ;;  %v1211_v15 = vld [vmem:[#allocation2 + $0x1a] sm:$0xff]  ;;  %vm1532_vm8 = vcmask 650752  }
  0x9f   : > { %v1210_v38 = vld [vmem:[#allocation2 + $0xa] sm:$0xff]  ;;  %v1225_v42 = vpack.c.bf16 %v1209_v33, %v1209_v33  ;;  %v3732_v19 = vpack.c.bf16 %v1111_v36, %v1111_v36  ;;  %v1212_v11 = vld [vmem:[#allocation2 + $0x22] sm:$0xff]  ;;  %v1213_v56 = vld [vmem:[#allocation2 + $0x32] sm:$0xff]  ;;  %v1227_v7 = vpack.c.bf16 %v1211_v15, %v1211_v15  ;;  %vm4323_vm1 = vcmask 130048  }
  0xa0   : > { %v1226_v44 = vpack.c.bf16 %v1210_v38, %v1210_v38  ;;  %v1228_v12 = vpack.c.bf16 %v1212_v11, %v1212_v11  ;;  %v1229_v29 = vpack.c.bf16 %v1213_v56, %v1213_v56  ;;  %v1324_v46 = vld [vmem:[#allocation2 + $0x20] sm:$0xff]  ;;  %v1323_v61 = vld [vmem:[#allocation2 + $0x18] sm:$0xff]  ;;  %v1663_v8 = vld [vmem:[#allocation2 + $0x30] sm:$0xff]  ;;  %vm2028_vm2 = vcmask 64512  }
  0xa1   : > { %v1340_v32 = vpack.c.bf16 %v1324_v46, %v1324_v46  ;;  %v1339_v21 = vpack.c.bf16 %v1323_v61, %v1323_v61  ;;  %v1664_v20 = vld [vmem:[#allocation2 + $0x38] sm:$0xff]  ;;  %v1679_v52 = vpack.c.bf16 %v1663_v8, %v1663_v8  ;;  %v1047_v50 = vld [vmem:[#allocation2] sm:$0xff]  ;;  %v1665_v41 = vld [vmem:[#allocation2 + $0x48] sm:$0xff]  ;;  %vm1645_vm4 = vcmask 781952  }
  0xa2   : > { %v1680_v24 = vpack.c.bf16 %v1664_v20, %v1664_v20  ;;  %v1063_v16 = vpack.c.bf16 %v1047_v50, %v1047_v50  ;;  %v1328_v57 = vld [vmem:[#allocation2 + $0x50] sm:$0xff]  ;;  %v1552_v14 = vld [vmem:[#allocation2 + $0x3a] sm:$0xff]  ;;  %v1681_v58 = vpack.c.bf16 %v1665_v41, %v1665_v41  ;;  %v1048_v6 = vld [vmem:[#allocation2 + $0x8] sm:$0xff]  ;;  %1921 = vst.msk [vmem:[#allocation3 + $0x4] sm:$0xf] %vm1079_vm11, %v1229_v29  ;;  %vm1759_vm3 = vcmask 913152  }
  0xa3   : > { %1082 = vst.msk [vmem:[#allocation3 + $0x10] sm:$0xf] %vm1079_vm11, %v1339_v21  ;;  %v1344_v49 = vpack.c.bf16 %v1328_v57, %v1328_v57  ;;  %v1568_v31 = vpack.c.bf16 %v1552_v14, %v1552_v14  ;;  %v1064_v39 = vpack.c.bf16 %v1048_v6, %v1048_v6  ;;  %v1553_v0 = vld [vmem:[#allocation2 + $0x4a] sm:$0xff]  ;;  %v1667_v43 = vld [vmem:[#allocation2 + $0x60] sm:$0xff]  ;;  %v1057_v18 = vld [vmem:[#allocation2 + $0x78] sm:$0xff]  ;;  %vm1872_vm12 = vcmask 1044352  }
  0xa4   : > { %1150 = vrot.lane.b32.xlu1 %v1115_v27, %s2988_s17  ;;  %1146 = vrot.lane.b32.xlu0 %v1113_v53, %s2988_s17  ;;  %1080 = vst.msk [vmem:[#allocation3] sm:$0xf] %vm1079_vm11, %v1063_v16  ;;  %v3772_v37 = vpack.c.bf16 %v1667_v43, %v1667_v43  ;;  %v3774_v23 = vpack.c.bf16 %v1553_v0, %v1553_v0  ;;  %v1058_v5 = vld [vmem:[#allocation2 + $0x80] sm:$0xff]  ;;  %v1060_v51 = vld [vmem:[#allocation2 + $0x98] sm:$0xff]  ;;  %v1062_v17 = vld [vmem:[#allocation2 + $0xb0] sm:$0xff] }
  0xa5   : > { %1154 = vrot.lane.b32.xlu2 %v3690_v59, %s2988_s17  ;;  %1084 = vst.msk [vmem:[#allocation3 + $0x20] sm:$0xf] %vm1079_vm11, %v1679_v52  ;;  %v3800_v26 = vpack.c.bf16 %v1058_v5, %v1058_v5  ;;  %v3805_v62 = vpack.c.bf16 %v1060_v51, %v1060_v51  ;;  %v1554_v54 = vld [vmem:[#allocation2 + $0x52] sm:$0xff]  ;;  %v3826_v36 = vpack.c.bf16 %v1062_v17, %v1062_v17  ;;  %v1555_v38 = vld [vmem:[#allocation2 + $0x62] sm:$0xff]  ;;  %v1561_v14 = vld [vmem:[#allocation2 + $0xaa] sm:$0xff] }
  0xa6   : > { %1083 = vst.msk [vmem:[#allocation3 + $0x18] sm:$0xf] %vm1079_vm11, %v1340_v32  ;;  %v1570_v28 = vpack.c.bf16 %v1554_v54, %v1554_v54  ;;  %v1221_v46 = vld [vmem:[#allocation2 + $0x92] sm:$0xff]  ;;  %v2748_v0 = vld [vmem:[%s4232_s6 + $0x40] sm:$0xff]  ;;  %v1676_v17 = vld [vmem:[#allocation2 + $0xc8] sm:$0xff] }
  0xa7   : > { %1085 = vst.msk [vmem:[#allocation3 + $0x28] sm:$0xf] %vm1079_vm11, %v1680_v24  ;;  %v3858_v61 = vpack.c.bf16 %v1221_v46, %v1221_v46  ;;  %v1222_v43 = vld [vmem:[#allocation2 + $0x9a] sm:$0xff]  ;;  %2312 = vmatpush.bf16.msra.mxu2 %v2748_v0  ;;  %v1789_v46 = vld [vmem:[#allocation2 + $0xc9] sm:$0xff]  ;;  %vm4324_vm6 = vmmov %vm4323_vm1 }
  0xa8   : > { %1087 = vst.msk [vmem:[#allocation3 + $0x38] sm:$0xf] %vm1079_vm11, %v1344_v49  ;;  %vm4325_vm5 = vmmov %vm4323_vm1 }
  0xa9   : > { %1086 = vst.msk [vmem:[#allocation3 + $0x30] sm:$0xf] %vm1079_vm11, %v1681_v58  ;;  %vm4326_vm7 = vmmov %vm4323_vm1 }
  0xaa   : > { %1922 = vst.msk [vmem:[#allocation3 + $0xc] sm:$0xf] %vm1079_vm11, %v1568_v31  ;;  %vm4327_vm10 = vmmov %vm4323_vm1 }
  0xab   : > { %1081 = vst.msk [vmem:[#allocation3 + $0x8] sm:$0xf] %vm1079_vm11, %v1064_v39  ;;  %vm4328_vm9 = vmmov %vm4323_vm1 }
  0xac   : > { %1158 = vrot.lane.b32.xlu1 %v3696_v60, %s2988_s17  ;;  %1156 = vrot.lane.b32.xlu0 %v3698_v2, %s2988_s17  ;;  %1088 = vst.msk [vmem:[#allocation3 + $0x40] sm:$0xf] %vm1079_vm11, %v3772_v37 }
  0xad   : > { %1160 = vrot.lane.b32.xlu2 %v3700_v45, %s2988_s17  ;;  %1923 = vst.msk [vmem:[#allocation3 + $0x14] sm:$0xf] %vm1079_vm11, %v3774_v23 }
  0xae   : > { %1091 = vst.msk [vmem:[#allocation3 + $0x58] sm:$0xf] %vm1079_vm11, %v3800_v26 }
  0xaf   : > { %1093 = vst.msk [vmem:[#allocation3 + $0x68] sm:$0xf] %vm1079_vm11, %v3805_v62 }
  0xb0   : > { %1924 = vst.msk [vmem:[#allocation3 + $0x1c] sm:$0xf] %vm1079_vm11, %v1570_v28 }
  0xb1   : > { %1095 = vst.msk [vmem:[#allocation3 + $0x78] sm:$0xf] %vm1079_vm11, %v3826_v36 }
  0xb2   : > { %1929 = vst.msk [vmem:[#allocation3 + $0x44] sm:$0xf] %vm1079_vm11, %v3858_v61 }
  0xb4   : > { %1164 = vrot.lane.b32.xlu1 %v3708_v13, %s2988_s17  ;;  %1162 = vrot.lane.b32.xlu0 %v3710_v35, %s2988_s17 }
  0xb5   : > { %1166 = vrot.lane.b32.xlu2 %v3712_v47, %s2988_s17 }
  0xbc   : > { %1170 = vrot.lane.b32.xlu1 %v3720_v25, %s2988_s17  ;;  %1168 = vrot.lane.b32.xlu0 %v3722_v4, %s2988_s17 }
  0xbd   : > { %1172 = vrot.lane.b32.xlu2 %v3724_v30, %s2988_s17 }
  0xc4   : > { %1257 = vrot.lane.b32.xlu1 %v1225_v42, %s2989_s30  ;;  %1174 = vrot.lane.b32.xlu0 %v3732_v19, %s2988_s17  ;;  %v3832_v42 = vpack.c.bf16 %v1555_v38, %v1555_v38  ;;  %v3966_v38 = vpack.c.bf16 %v1676_v17, %v1676_v17 }
  0xc5   : > { %1259 = vrot.lane.b32.xlu2 %v1226_v44, %s2989_s30 }
  0xc6   : > { %1925 = vst.msk [vmem:[#allocation3 + $0x24] sm:$0xf] %vm1079_vm11, %v3832_v42 }
  0xcc   : > { %1263 = vrot.lane.b32.xlu1 %v1228_v12, %s2989_s30  ;;  %1261 = vrot.lane.b32.xlu0 %v1227_v7, %s2989_s30 }
  0xcd   : > { %1265 = vrot.lane.b32.xlu2 %v1229_v29, %s2989_s30 }
  0xd4   : > { %1373 = vrot.lane.b32.xlu1 %v1340_v32, %s2990_s25  ;;  %1371 = vrot.lane.b32.xlu0 %v1339_v21, %s2990_s25  ;;  %v2746_v32 = vld [vmem:[%s4232_s6 + $0x30] sm:$0xff] }
  0xd5   : > { %1484 = vrot.lane.b32.xlu2 %v3681_v34, %s2991_s28  ;;  %v1668_v34 = vld [vmem:[#allocation2 + $0x68] sm:$0xff] }
  0xd6   : > { %v3784_v55 = vpack.c.bf16 %v1668_v34, %v1668_v34 }
  0xd8   : > { %1089 = vst.msk [vmem:[#allocation3 + $0x48] sm:$0xf] %vm1079_vm11, %v3784_v55 }
  0xdc   : > { %1597 = vrot.lane.b32.xlu1 %v1227_v7, %s2992_s29  ;;  %1486 = vrot.lane.b32.xlu0 %v1115_v27, %s2991_s28  ;;  %v1059_v27 = vld [vmem:[#allocation2 + $0x90] sm:$0xff] }
  0xdd   : > { %1599 = vrot.lane.b32.xlu2 %v1228_v12, %s2992_s29  ;;  %v3808_v10 = vpack.c.bf16 %v1059_v27, %v1059_v27 }
  0xdf   : > { %1092 = vst.msk [vmem:[#allocation3 + $0x60] sm:$0xf] %vm1079_vm11, %v3808_v10 }
  0xe4   : > { %1713 = vrot.lane.b32.xlu1 %v1680_v24, %s2993_s16  ;;  %1711 = vrot.lane.b32.xlu0 %v1679_v52, %s2993_s16 }
  0xe5   : > { %1824 = vrot.lane.b32.xlu2 %v3686_v48, %s2994_s18 }
  0xec   : > { %1375 = vrot.lane.b32.xlu1 %v1679_v52, %s2990_s25  ;;  %1826 = vrot.lane.b32.xlu0 %v3690_v59, %s2994_s18  ;;  %v1556_v52 = vld [vmem:[#allocation2 + $0x6a] sm:$0xff] }
  0xed   : > { %1377 = vrot.lane.b32.xlu2 %v1680_v24, %s2990_s25  ;;  %v2745_v24 = vld [vmem:[%s4232_s6 + $0x28] sm:$0xff]  ;;  %v3878_v50 = vpack.c.bf16 %v1556_v52, %v1556_v52 }
  0xef   : > { %1926 = vst.msk [vmem:[#allocation3 + $0x2c] sm:$0xf] %vm1079_vm11, %v3878_v50 }
  0xf4   : > { %1490 = vrot.lane.b32.xlu1 %v3690_v59, %s2991_s28  ;;  %1488 = vrot.lane.b32.xlu0 %v3686_v48, %s2991_s28  ;;  %v3793_v48 = vpack.c.bf16 %v1057_v18, %v1057_v18  ;;  %v2740_v18 = vld [vmem:[%s4232_s6] sm:$0xff] }
  0xf5   : > { %1601 = vrot.lane.b32.xlu2 %v1229_v29, %s2992_s29  ;;  %v2747_v29 = vld [vmem:[%s4232_s6 + $0x38] sm:$0xff] }
  0xf6   : > { %1090 = vst.msk [vmem:[#allocation3 + $0x50] sm:$0xf] %vm1079_vm11, %v3793_v48  ;;  %2256 = vmatpush.bf16.msra.mxu1 %v2747_v29  ;;  %2804 = vmatpush.bf16.msra.mxu3 %v2747_v29 }
  0xf7   : > { %v1153_v22 = vpop.permute.xlu2 %1152 }
  0xf8   : > { %1197 = vst.msk [vmem:[#allocation3 + $0x20] sm:$0xf] %vm1192_vm13, %v1153_v22  ;;  %v2741_v22 = vld [vmem:[%s4232_s6 + $0x8] sm:$0xff] }
  0xfa   : > { %2257 = vmatpush.bf16.msra.mxu1 %v2746_v32  ;;  %2805 = vmatpush.bf16.msra.mxu3 %v2746_v32 }
  0xfc   : > { %1715 = vrot.lane.b32.xlu1 %v1681_v58, %s2993_s16  ;;  %1603 = vrot.lane.b32.xlu0 %v1568_v31, %s2992_s29 }
  0xfd   : > { %1717 = vrot.lane.b32.xlu2 %v1344_v49, %s2993_s16 }
  0xfe   : > { %2258 = vmatpush.bf16.msra.mxu1 %v2745_v24  ;;  %2806 = vmatpush.bf16.msra.mxu3 %v2745_v24 }
  0xff   : > { %v1155_v40 = vpop.permute.xlu2 %1154 }
 0x100   : > { %1198 = vst.msk [vmem:[#allocation3 + $0x28] sm:$0xf] %vm1192_vm13, %v1155_v40  ;;  %v2613_v40 = vld [vmem:[#allocation3 + $0x8] sm:$0xf0] }
 0x104   : > { %1830 = vrot.lane.b32.xlu1 %v3696_v60, %s2994_s18  ;;  %1828 = vrot.lane.b32.xlu0 %v3698_v2, %s2994_s18 }
 0x105   : > { %1267 = vrot.lane.b32.xlu2 %v1568_v31, %s2989_s30 }
 0x107   : > { %v1161_v9 = vpop.permute.xlu2 %1160 }
 0x108   : > { %1201 = vst.msk [vmem:[#allocation3 + $0x40] sm:$0xf] %vm1192_vm13, %v1161_v9 }
 0x10c   : > { %1379 = vrot.lane.b32.xlu0 %v1681_v58, %s2990_s25  ;;  %1381 = vrot.lane.b32.xlu1 %v1344_v49, %s2990_s25  ;;  %v3896_v49 = vpack.c.bf16 %v1561_v14, %v1561_v14  ;;  %v2742_v58 = vld [vmem:[%s4232_s6 + $0x10] sm:$0xff] }
 0x10d   : > { %1492 = vrot.lane.b32.xlu2 %v3698_v2, %s2991_s28  ;;  %v1061_v2 = vld [vmem:[#allocation2 + $0xa8] sm:$0xff] }
 0x10e   : > { %v1149_v53 = vpop.permute.xlu1 %1148  ;;  %v1145_v59 = vpop.permute.xlu0 %1144  ;;  %v3821_v3 = vpack.c.bf16 %v1061_v2, %v1061_v2  ;;  %1931 = vst.msk [vmem:[#allocation3 + $0x54] sm:$0xf] %vm1079_vm11, %v3896_v49 }
 0x10f   : > { %1195 = vst.msk [vmem:[#allocation3 + $0x10] sm:$0xf] %vm1192_vm13, %v1149_v53  ;;  %v1167_v63 = vpop.permute.xlu2 %1166 }
 0x110   : > { %1193 = vst.msk [vmem:[#allocation3] sm:$0xf] %vm1192_vm13, %v1145_v59  ;;  %v2749_v59 = vld [vmem:[%s3103_s10] sm:$0xff] }
 0x111   : > { %1204 = vst.msk [vmem:[#allocation3 + $0x58] sm:$0xf] %vm1192_vm13, %v1167_v63 }
 0x112   : > { %1094 = vst.msk [vmem:[#allocation3 + $0x70] sm:$0xf] %vm1079_vm11, %v3821_v3 }
 0x114   : > { %1494 = vrot.lane.b32.xlu0 %v3696_v60, %s2991_s28  ;;  %1605 = vrot.lane.b32.xlu1 %v3774_v23, %s2992_s29 }
 0x115   : > { %1607 = vrot.lane.b32.xlu2 %v1570_v28, %s2992_s29 }
 0x116   : > { %v1151_v1 = vpop.permute.xlu1 %1150  ;;  %v1147_v33 = vpop.permute.xlu0 %1146 }
 0x117   : > { %1196 = vst.msk [vmem:[#allocation3 + $0x18] sm:$0xf] %vm1192_vm13, %v1151_v1  ;;  %v1173_v60 = vpop.permute.xlu2 %1172 }
 0x118   : > { %1194 = vst.msk [vmem:[#allocation3 + $0x8] sm:$0xf] %vm1192_vm13, %v1147_v33 }
 0x119   : > { %1207 = vst.msk [vmem:[#allocation3 + $0x70] sm:$0xf] %vm1192_vm13, %v1173_v60 }
 0x11c   : > { %1719 = vrot.lane.b32.xlu0 %v3772_v37, %s2993_s16  ;;  %1721 = vrot.lane.b32.xlu1 %v3784_v55, %s2993_s16 }
 0x11d   : > { %1832 = vrot.lane.b32.xlu2 %v3700_v45, %s2994_s18 }
 0x11e   : > { %v1159_v44 = vpop.permute.xlu1 %1158  ;;  %v1157_v11 = vpop.permute.xlu0 %1156 }
 0x11f   : > { %1200 = vst.msk [vmem:[#allocation3 + $0x38] sm:$0xf] %vm1192_vm13, %v1159_v44  ;;  %v1260_v15 = vpop.permute.xlu2 %1259  ;;  %v1557_v44 = vld [vmem:[#allocation2 + $0x7a] sm:$0xff] }
 0x120   : > { %1199 = vst.msk [vmem:[#allocation3 + $0x30] sm:$0xf] %vm1192_vm13, %v1157_v11  ;;  %v1788_v11 = vld [vmem:[#allocation2 + $0xc1] sm:$0xff] }
 0x121   : > { %1307 = vst.msk [vmem:[#allocation3 + $0x8] sm:$0xf] %vm1305_vm14, %v1260_v15  ;;  %v3970_v15 = vpack.c.bf16 %v1557_v44, %v1557_v44 }
 0x123   : > { %1927 = vst.msk [vmem:[#allocation3 + $0x34] sm:$0xf] %vm1079_vm11, %v3970_v15 }
 0x124   : > { %1834 = vrot.lane.b32.xlu0 %v3710_v35, %s2994_s18  ;;  %1269 = vrot.lane.b32.xlu1 %v3774_v23, %s2989_s30  ;;  %v2724_v23 = vld [vmem:[#allocation3 + $0x4] sm:$0xf] }
 0x125   : > { %1271 = vrot.lane.b32.xlu2 %v1570_v28, %s2989_s30  ;;  %v2616_v34 = vor.u32 %v2724_v23, %v2613_v40  ;;  %v1562_v28 = vld [vmem:[#allocation2 + $0xb2] sm:$0xff] }
 0x126   : > { %v1165_v56 = vpop.permute.xlu1 %1164  ;;  %v1163_v12 = vpop.permute.xlu0 %1162  ;;  %v3952_v2 = vpack.c.bf16 %v1562_v28, %v1562_v28 }
 0x127   : > { %1203 = vst.msk [vmem:[#allocation3 + $0x50] sm:$0xf] %vm1192_vm13, %v1165_v56  ;;  %v1266_v7 = vpop.permute.xlu2 %1265  ;;  %2709 = vmatmul.msk.bf16.vlgmr.msra.gmra.mxu2 %vm4323_vm1, %v2616_v34  ;;  %v3972_v56 = vpack.c.bf16 %v1788_v11, %v1788_v11 }
 0x128   : > { %1202 = vst.msk [vmem:[#allocation3 + $0x48] sm:$0xf] %vm1192_vm13, %v1163_v12  ;;  %v2726_v12 = vld [vmem:[#allocation3 + $0x14] sm:$0xf] }
 0x129   : > { %1310 = vst.msk [vmem:[#allocation3 + $0x20] sm:$0xf] %vm1305_vm14, %v1266_v7  ;;  %v2621_v7 = vld [vmem:[#allocation3 + $0x18] sm:$0xf0] }
 0x12a   : > { %1932 = vst.msk [vmem:[#allocation3 + $0x5c] sm:$0xf] %vm1079_vm11, %v3952_v2  ;;  %v2624_v29 = vor.u32 %v2726_v12, %v2621_v7  ;;  %v1791_v12 = vld [vmem:[#allocation2 + $0xe1] sm:$0xff] }
 0x12c   : > { %1383 = vrot.lane.b32.xlu0 %v3772_v37, %s2990_s25  ;;  %1385 = vrot.lane.b32.xlu1 %v3784_v55, %s2990_s25  ;;  %v3919_v37 = vpack.c.bf16 %v1222_v43, %v1222_v43  ;;  %v1987_v55 = vld [vmem:[%s4233_s7] sm:$0xf] }
 0x12d   : > { %1496 = vrot.lane.b32.xlu2 %v3700_v45, %s2991_s28  ;;  %v2744_v45 = vld [vmem:[%s4232_s6 + $0x20] sm:$0xff]  ;;  %v2055_v9 = vsel %vm2053_vm15, %v1987_v55, 0  ;;  %v2751_v55 = vld [vmem:[%s3103_s10 + $0x10] sm:$0xff]  ;;  %vm4330_vm15 = vmmov %vm4323_vm1 }
 0x12e   : > { %v1171_v21 = vpop.permute.xlu1 %1170  ;;  %v1169_v20 = vpop.permute.xlu0 %1168  ;;  %2259 = vmatpush.bf16.msra.mxu1 %v2744_v45  ;;  %2807 = vmatpush.bf16.msra.mxu3 %v2744_v45  ;;  %1930 = vst.msk [vmem:[#allocation3 + $0x4c] sm:$0xf] %vm1079_vm11, %v3919_v37 }
 0x12f   : > { %1206 = vst.msk [vmem:[#allocation3 + $0x68] sm:$0xf] %vm1192_vm13, %v1171_v21  ;;  %v3873_v8 = vpop.permute.xlu2 %1484  ;;  %2064 = vmatpush.bf16.msra.mxu0 %v2055_v9 }
 0x130   : > { %1205 = vst.msk [vmem:[#allocation3 + $0x60] sm:$0xf] %vm1192_vm13, %v1169_v20  ;;  %v2750_v20 = vld [vmem:[%s3103_s10 + $0x8] sm:$0xff] }
 0x132   : > { %2601 = vmatmul.msk.bf16.vlgmr.msra.gmra.mxu0 %vm2028_vm2, %v2749_v59 }
 0x134   : > { %1498 = vrot.lane.b32.xlu0 %v3710_v35, %s2991_s28  ;;  %1609 = vrot.lane.b32.xlu1 %v3832_v42, %s2992_s29  ;;  %v2743_v35 = vld [vmem:[%s4232_s6 + $0x18] sm:$0xff] }
 0x135   : > { %1611 = vrot.lane.b32.xlu2 %v3878_v50, %s2992_s29  ;;  %2260 = vmatpush.bf16.msra.mxu1 %v2743_v35 }
 0x136   : > { %v1258_v16 = vpop.permute.xlu1 %1257  ;;  %v1175_v41 = vpop.permute.xlu0 %1174  ;;  %2808 = vmatpush.bf16.msra.mxu3 %v2743_v35 }
 0x137   : > { %1306 = vst.msk [vmem:[#allocation3] sm:$0xf] %vm1305_vm14, %v1258_v16  ;;  %v1600_v57 = vpop.permute.xlu2 %1599  ;;  %2710 = vmatmul.msk.bf16.gmra.mxu2 %vm4324_vm6, %v2624_v29  ;;  %vm4332_vm6 = vmmov %vm4323_vm1 }
 0x138   : > { %1208 = vst.msk [vmem:[#allocation3 + $0x78] sm:$0xf] %vm1192_vm13, %v1175_v41  ;;  %vm4329_vm13 = vmmov %vm4323_vm1 }
 0x139   : > { %2261 = vmatpush.bf16.msra.mxu1 %v2742_v58 }
 0x13a   : > { %2809 = vmatpush.bf16.msra.mxu3 %v2742_v58 }
 0x13c   : > { %1723 = vrot.lane.b32.xlu0 %v3793_v48, %s2993_s16  ;;  %1725 = vrot.lane.b32.xlu1 %v3800_v26, %s2993_s16 }
 0x13d   : > { %1836 = vrot.lane.b32.xlu2 %v3708_v13, %s2994_s18  ;;  %2262 = vmatpush.bf16.msra.mxu1 %v2741_v22 }
 0x13e   : > { %v1264_v31 = vpop.permute.xlu1 %1263  ;;  %v1262_v6 = vpop.permute.xlu0 %1261  ;;  %2810 = vmatpush.bf16.msra.mxu3 %v2741_v22  ;;  %v2728_v22 = vld [vmem:[#allocation3 + $0x24] sm:$0xf] }
 0x13f   : > { %1309 = vst.msk [vmem:[#allocation3 + $0x18] sm:$0xf] %vm1305_vm14, %v1264_v31  ;;  %v3911_v39 = vpop.permute.xlu2 %1824 }
 0x140   : > { %1308 = vst.msk [vmem:[#allocation3 + $0x10] sm:$0xf] %vm1305_vm14, %v1262_v6 }
 0x141   : > { %2263 = vmatpush.bf16.msra.mxu1 %v2740_v18 }
 0x142   : > { %2811 = vmatpush.bf16.msra.mxu3 %v2740_v18  ;;  %2602 = vmatmul.msk.bf16.gmra.mxu0 %vm2028_vm2, %v2750_v20 }
 0x144   : > { %1838 = vrot.lane.b32.xlu0 %v3712_v47, %s2994_s18  ;;  %1281 = vrot.lane.b32.xlu1 %v3858_v61, %s2989_s30 }
 0x145   : > { %1283 = vrot.lane.b32.xlu2 %v3919_v37, %s2989_s30 }
 0x146   : > { %v1374_v5 = vpop.permute.xlu1 %1373  ;;  %v1372_v27 = vpop.permute.xlu0 %1371 }
 0x147   : > { %1421 = vst.msk [vmem:[#allocation3 + $0x8] sm:$0xf] %vm1419_vm0, %v1374_v5  ;;  %v1378_v53 = vpop.permute.xlu2 %1377 }
 0x148   : > { %1420 = vst.msk [vmem:[#allocation3] sm:$0xf] %vm1419_vm0, %v1372_v27 }
 0x149   : > { %1533 = vst.msk [vmem:[#allocation3] sm:$0xf] %vm1532_vm8, %v3873_v8  ;;  %v3986_v8 = vpack.c.bf16 %v1789_v46, %v1789_v46 }
 0x14a   : > { %1423 = vst.msk [vmem:[#allocation3 + $0x18] sm:$0xf] %vm1419_vm0, %v1378_v53  ;;  %v2730_v53 = vld [vmem:[#allocation3 + $0x34] sm:$0xf] }
 0x14c   : > { %1395 = vrot.lane.b32.xlu0 %v3821_v3, %s2990_s25  ;;  %1397 = vrot.lane.b32.xlu1 %v3826_v36, %s2990_s25 }
 0x14d   : > { %1508 = vrot.lane.b32.xlu2 %v3724_v30, %s2991_s28  ;;  %v1675_v30 = vld [vmem:[#allocation2 + $0xc0] sm:$0xff] }
 0x14e   : > { %v1598_v51 = vpop.permute.xlu1 %1597  ;;  %v1487_v63 = vpop.permute.xlu0 %1486  ;;  %v3964_v60 = vpack.c.bf16 %v1675_v30, %v1675_v30  ;;  %v1678_v30 = vld [vmem:[#allocation2 + $0xe0] sm:$0xff] }
 0x14f   : > { %1646 = vst.msk [vmem:[#allocation3] sm:$0xf] %vm1645_vm4, %v1598_v51  ;;  %v1602_v54 = vpop.permute.xlu2 %1601 }
 0x150   : > { %1534 = vst.msk [vmem:[#allocation3 + $0x8] sm:$0xf] %vm1532_vm8, %v1487_v63 }
 0x151   : > { %1647 = vst.msk [vmem:[#allocation3 + $0x8] sm:$0xf] %vm1645_vm4, %v1600_v57 }
 0x152   : > { %2603 = vmatmul.msk.bf16.gmra.mxu0 %vm2028_vm2, %v2751_v55 }
 0x154   : > { %1510 = vrot.lane.b32.xlu0 %v3732_v19, %s2991_s28  ;;  %1621 = vrot.lane.b32.xlu1 %v3896_v49, %s2992_s29 }
 0x155   : > { %1623 = vrot.lane.b32.xlu2 %v3952_v2, %s2992_s29 }
 0x156   : > { %v1714_v1 = vpop.permute.xlu1 %1713  ;;  %v1712_v33 = vpop.permute.xlu0 %1711 }
 0x157   : > { %1761 = vst.msk [vmem:[#allocation3 + $0x8] sm:$0xf] %vm1759_vm3, %v1714_v1  ;;  %v1718_v19 = vpop.permute.xlu2 %1717 }
 0x158   : > { %1760 = vst.msk [vmem:[#allocation3] sm:$0xf] %vm1759_vm3, %v1712_v33  ;;  %v2752_v33 = vld [vmem:[%s3103_s10 + $0x18] sm:$0xff] }
 0x159   : > { %1873 = vst.msk [vmem:[#allocation3] sm:$0xf] %vm1872_vm12, %v3911_v39 }
 0x15c   : > { %1735 = vrot.lane.b32.xlu0 %v3964_v60, %s2993_s16  ;;  %1737 = vrot.lane.b32.xlu1 %v3966_v38, %s2993_s16 }
 0x15d   : > { %1848 = vrot.lane.b32.xlu2 %v3972_v56, %s2994_s18 }
 0x15e   : > { %v1376_v32 = vpop.permute.xlu1 %1375  ;;  %v1827_v21 = vpop.permute.xlu0 %1826 }
 0x15f   : > { %1422 = vst.msk [vmem:[#allocation3 + $0x10] sm:$0xf] %vm1419_vm0, %v1376_v32  ;;  %v1268_v24 = vpop.permute.xlu2 %1267 }
 0x160   : > { %1874 = vst.msk [vmem:[#allocation3 + $0x8] sm:$0xf] %vm1872_vm12, %v1827_v21  ;;  %v2611_v52 = vld [vmem:[#allocation3] sm:$0xf]  ;;  %v1807_v21 = vpack.c.bf16 %v1791_v12, %v1791_v12 }
 0x161   : > { %1311 = vst.msk [vmem:[#allocation3 + $0x28] sm:$0xf] %vm1305_vm14, %v1268_v24  ;;  %v2645_v24 = vld [vmem:[#allocation3 + $0x48] sm:$0xf0] }
 0x162   : > { %2604 = vmatmul.msk.bf16.gmra.mxu0 %vm2028_vm2, %v2752_v33 }
 0x164   : > { %1850 = vrot.lane.b32.xlu0 %v3986_v8, %s2994_s18  ;;  %1273 = vrot.lane.b32.xlu1 %v3832_v42, %s2989_s30 }
 0x165   : > { %1275 = vrot.lane.b32.xlu2 %v3878_v50, %s2989_s30  ;;  %v1558_v50 = vld [vmem:[#allocation2 + $0x82] sm:$0xff] }
 0x166   : > { %v1491_v45 = vpop.permute.xlu1 %1490  ;;  %v1489_v16 = vpop.permute.xlu0 %1488  ;;  %v4007_v31 = vpack.c.bf16 %v1558_v50, %v1558_v50 }
 0x167   : > { %1536 = vst.msk [vmem:[#allocation3 + $0x18] sm:$0xf] %vm1532_vm8, %v1491_v45  ;;  %v2725_v41 = vld [vmem:[#allocation3 + $0x4] sm:$0xf0]  ;;  %v1493_v35 = vpop.permute.xlu2 %1492 }
 0x168   : > { %1535 = vst.msk [vmem:[#allocation3 + $0x10] sm:$0xf] %vm1532_vm8, %v1489_v16  ;;  %v2612_v57 = vor.u32 %v2725_v41, %v2611_v52  ;;  %v2753_v41 = vld [vmem:[%s3103_s10 + $0x20] sm:$0xff] }
 0x169   : > { %1648 = vst.msk [vmem:[#allocation3 + $0x10] sm:$0xf] %vm1645_vm4, %v1602_v54  ;;  %v1564_v54 = vld [vmem:[#allocation2 + $0xca] sm:$0xff] }
 0x16a   : > { %2264 = vmatmul.bf16.vlgmr.msra.gmra.mxu1 %v2612_v57  ;;  %1928 = vst.msk [vmem:[#allocation3 + $0x3c] sm:$0xf] %vm1079_vm11, %v4007_v31  ;;  %v1580_v28 = vpack.c.bf16 %v1564_v54, %v1564_v54  ;;  %v1446_v57 = vld [vmem:[#allocation2 + $0x91] sm:$0xff] }
 0x16c   : > { %1387 = vrot.lane.b32.xlu0 %v3793_v48, %s2990_s25  ;;  %1389 = vrot.lane.b32.xlu1 %v3800_v26, %s2990_s25  ;;  %v1563_v26 = vld [vmem:[#allocation2 + $0xc2] sm:$0xff]  ;;  %1934 = vst.msk [vmem:[#allocation3 + $0x6c] sm:$0xf] %vm1079_vm11, %v1580_v28 }
 0x16d   : > { %1500 = vrot.lane.b32.xlu2 %v3708_v13, %s2991_s28  ;;  %v1579_v39 = vpack.c.bf16 %v1563_v26, %v1563_v26 }
 0x16e   : > { %v1716_v42 = vpop.permute.xlu1 %1715  ;;  %v1604_v14 = vpop.permute.xlu0 %1603 }
 0x16f   : > { %1762 = vst.msk [vmem:[#allocation3 + $0x10] sm:$0xf] %vm1759_vm3, %v1716_v42  ;;  %v1608_v58 = vpop.permute.xlu2 %1607  ;;  %v1462_v42 = vpack.c.bf16 %v1446_v57, %v1446_v57 }
 0x170   : > { %1649 = vst.msk [vmem:[#allocation3 + $0x18] sm:$0xf] %vm1645_vm4, %v1604_v14 }
 0x171   : > { %1763 = vst.msk [vmem:[#allocation3 + $0x18] sm:$0xf] %vm1759_vm3, %v1718_v19  ;;  %v2637_v59 = vld [vmem:[#allocation3 + $0x38] sm:$0xf0]  ;;  %v1694_v19 = vpack.c.bf16 %v1678_v30, %v1678_v30 }
 0x172   : > { %1933 = vst.msk [vmem:[#allocation3 + $0x64] sm:$0xf] %vm1079_vm11, %v1579_v39  ;;  %v2640_v63 = vor.u32 %v2730_v53, %v2637_v59  ;;  %2605 = vmatmul.msk.bf16.gmra.mxu0 %vm2028_vm2, %v2753_v41 }
 0x174   : > { %1502 = vrot.lane.b32.xlu0 %v3712_v47, %s2991_s28  ;;  %1613 = vrot.lane.b32.xlu1 %v3970_v15, %s2992_s29  ;;  %v2629_v47 = vld [vmem:[#allocation3 + $0x28] sm:$0xf0] }
 0x175   : > { %1615 = vrot.lane.b32.xlu2 %v4007_v31, %s2992_s29  ;;  %v2632_v0 = vor.u32 %v2728_v22, %v2629_v47 }
 0x176   : > { %v1831_v13 = vpop.permute.xlu1 %1830  ;;  %v1829_v48 = vpop.permute.xlu0 %1828 }
 0x177   : > { %1876 = vst.msk [vmem:[#allocation3 + $0x18] sm:$0xf] %vm1872_vm12, %v1831_v13  ;;  %v1833_v6 = vpop.permute.xlu2 %1832  ;;  %2711 = vmatmul.msk.bf16.gmra.mxu2 %vm4325_vm5, %v2632_v0  ;;  %v1787_v0 = vld [vmem:[#allocation2 + $0xb1] sm:$0xff]  ;;  %vm4333_vm5 = vmmov %vm4323_vm1 }
 0x178   : > { %1875 = vst.msk [vmem:[#allocation3 + $0x10] sm:$0xf] %vm1872_vm12, %v1829_v48 }
 0x17c   : > { %1727 = vrot.lane.b32.xlu0 %v3808_v10, %s2993_s16  ;;  %1729 = vrot.lane.b32.xlu1 %v3805_v62, %s2993_s16 }
 0x17d   : > { %1840 = vrot.lane.b32.xlu2 %v3722_v4, %s2994_s18 }
 0x17e   : > { %v1380_v43 = vpop.permute.xlu0 %1379  ;;  %v2727_v23 = vld [vmem:[#allocation3 + $0x14] sm:$0xf0]  ;;  %v1382_v40 = vpop.permute.xlu1 %1381 }
 0x17f   : > { %1424 = vst.msk [vmem:[#allocation3 + $0x20] sm:$0xf] %vm1419_vm0, %v1380_v43  ;;  %v2619_v34 = vld [vmem:[#allocation3 + $0x10] sm:$0xf]  ;;  %v1272_v9 = vpop.permute.xlu2 %1271 }
 0x180   : > { %v2620_v18 = vor.u32 %v2727_v23, %v2619_v34  ;;  %1425 = vst.msk [vmem:[#allocation3 + $0x28] sm:$0xf] %vm1419_vm0, %v1382_v40  ;;  %v1803_v34 = vpack.c.bf16 %v1787_v0, %v1787_v0 }
 0x181   : > { %1537 = vst.msk [vmem:[#allocation3 + $0x20] sm:$0xf] %vm1532_vm8, %v1493_v35 }
 0x182   : > { %2269 = vmatmul.bf16.gmra.mxu1 %v2620_v18  ;;  %1313 = vst.msk [vmem:[#allocation3 + $0x38] sm:$0xf] %vm1305_vm14, %v1272_v9  ;;  %v2661_v18 = vld [vmem:[#allocation3 + $0x68] sm:$0xf0] }
 0x184   : > { %1842 = vrot.lane.b32.xlu0 %v3720_v25, %s2994_s18  ;;  %1285 = vrot.lane.b32.xlu1 %v3896_v49, %s2989_s30 }
 0x185   : > { %1287 = vrot.lane.b32.xlu2 %v3952_v2, %s2989_s30  ;;  %v1677_v2 = vld [vmem:[#allocation2 + $0xd8] sm:$0xff] }
 0x186   : > { %v1495_v4 = vpop.permute.xlu0 %1494  ;;  %v1606_v5 = vpop.permute.xlu1 %1605 }
 0x187   : > { %1538 = vst.msk [vmem:[#allocation3 + $0x28] sm:$0xf] %vm1532_vm8, %v1495_v4  ;;  %v1497_v27 = vpop.permute.xlu2 %1496  ;;  %2712 = vmatmul.msk.bf16.gmra.mxu2 %vm4326_vm7, %v2640_v63 }
 0x188   : > { %1650 = vst.msk [vmem:[#allocation3 + $0x20] sm:$0xf] %vm1645_vm4, %v1606_v5  ;;  %v2755_v5 = vld [vmem:[%s3103_s10 + $0x30] sm:$0xff] }
 0x189   : > { %1651 = vst.msk [vmem:[#allocation3 + $0x28] sm:$0xf] %vm1645_vm4, %v1608_v58  ;;  %v2734_v58 = vld [vmem:[#allocation3 + $0x54] sm:$0xf] }
 0x18c   : > { %1399 = vrot.lane.b32.xlu0 %v3964_v60, %s2990_s25  ;;  %1401 = vrot.lane.b32.xlu1 %v3966_v38, %s2990_s25  ;;  %v1790_v60 = vld [vmem:[#allocation2 + $0xd9] sm:$0xff]  ;;  %v1693_v38 = vpack.c.bf16 %v1677_v2, %v1677_v2 }
 0x18d   : > { %1512 = vrot.lane.b32.xlu2 %v3972_v56, %s2991_s28  ;;  %v1806_v11 = vpack.c.bf16 %v1790_v60, %v1790_v60 }
 0x18e   : > { %v1720_v25 = vpop.permute.xlu0 %1719  ;;  %v1722_v49 = vpop.permute.xlu1 %1721 }
 0x18f   : > { %1764 = vst.msk [vmem:[#allocation3 + $0x20] sm:$0xf] %vm1759_vm3, %v1720_v25  ;;  %v1612_v51 = vpop.permute.xlu2 %1611 }
 0x190   : > { %1765 = vst.msk [vmem:[#allocation3 + $0x28] sm:$0xf] %vm1759_vm3, %v1722_v49 }
 0x191   : > { %1877 = vst.msk [vmem:[#allocation3 + $0x20] sm:$0xf] %vm1872_vm12, %v1833_v6  ;;  %v2754_v6 = vld [vmem:[%s3103_s10 + $0x28] sm:$0xff] }
 0x192   : > { %2606 = vmatmul.msk.bf16.gmra.mxu0 %vm2028_vm2, %v2754_v6 }
 0x194   : > { %1514 = vrot.lane.b32.xlu0 %v3986_v8, %s2991_s28  ;;  %1625 = vrot.lane.b32.xlu1 %v1579_v39, %s2992_s29  ;;  %v2732_v8 = vld [vmem:[#allocation3 + $0x44] sm:$0xf]  ;;  %v1786_v39 = vld [vmem:[#allocation2 + $0xa9] sm:$0xff] }
 0x195   : > { %1627 = vrot.lane.b32.xlu2 %v1580_v28, %s2992_s29  ;;  %v2648_v52 = vor.u32 %v2732_v8, %v2645_v24  ;;  %v1802_v47 = vpack.c.bf16 %v1786_v39, %v1786_v39 }
 0x196   : > { %v1835_v17 = vpop.permute.xlu0 %1834  ;;  %v1270_v1 = vpop.permute.xlu1 %1269 }
 0x197   : > { %1878 = vst.msk [vmem:[#allocation3 + $0x28] sm:$0xf] %vm1872_vm12, %v1835_v17  ;;  %v1837_v44 = vpop.permute.xlu2 %1836  ;;  %2713 = vmatmul.msk.bf16.gmra.mxu2 %vm4327_vm10, %v2648_v52 }
 0x198   : > { %1312 = vst.msk [vmem:[#allocation3 + $0x30] sm:$0xf] %vm1305_vm14, %v1270_v1  ;;  %v2627_v56 = vld [vmem:[#allocation3 + $0x20] sm:$0xf] }
 0x19c   : > { %1739 = vrot.lane.b32.xlu0 %v1693_v38, %s2993_s16  ;;  %1741 = vrot.lane.b32.xlu1 %v1694_v19, %s2993_s16 }
 0x19d   : > { %1852 = vrot.lane.b32.xlu2 %v1806_v11, %s2994_s18 }
 0x19e   : > { %v1384_v7 = vpop.permute.xlu0 %1383  ;;  %v2729_v29 = vld [vmem:[#allocation3 + $0x24] sm:$0xf0]  ;;  %v1386_v46 = vpop.permute.xlu1 %1385 }
 0x19f   : > { %1426 = vst.msk [vmem:[#allocation3 + $0x30] sm:$0xf] %vm1419_vm0, %v1384_v7  ;;  %v2628_v32 = vor.u32 %v2729_v29, %v2627_v56  ;;  %v1284_v20 = vpop.permute.xlu2 %1283  ;;  %v4127_v56 = vld [vmem:[%s4234_s8] ss:$0 sm:$0xff] }
 0x1a0   : > { %1427 = vst.msk [vmem:[#allocation3 + $0x38] sm:$0xf] %vm1419_vm0, %v1386_v46 }
 0x1a1   : > { %2274 = vmatmul.bf16.gmra.mxu1 %v2628_v32  ;;  %1539 = vst.msk [vmem:[#allocation3 + $0x30] sm:$0xf] %vm1532_vm8, %v1497_v27 }
 0x1a2   : > { %1319 = vst.msk [vmem:[#allocation3 + $0x68] sm:$0xf] %vm1305_vm14, %v1284_v20  ;;  %2607 = vmatmul.msk.bf16.gmra.mxu0 %vm2028_vm2, %v2755_v5 }
 0x1a4   : > { %1854 = vrot.lane.b32.xlu0 %v1807_v21, %s2994_s18  ;;  %1277 = vrot.lane.b32.xlu1 %v3970_v15, %s2989_s30  ;;  %v1447_v15 = vld [vmem:[#allocation2 + $0x99] sm:$0xff] }
 0x1a5   : > { %1279 = vrot.lane.b32.xlu2 %v4007_v31, %s2989_s30  ;;  %v2653_v31 = vld [vmem:[#allocation3 + $0x58] sm:$0xf0]  ;;  %v1463_v13 = vpack.c.bf16 %v1447_v15, %v1447_v15 }
 0x1a6   : > { %v1499_v45 = vpop.permute.xlu0 %1498  ;;  %v1610_v16 = vpop.permute.xlu1 %1609 }
 0x1a7   : > { %1540 = vst.msk [vmem:[#allocation3 + $0x38] sm:$0xf] %vm1532_vm8, %v1499_v45  ;;  %v1509_v35 = vpop.permute.xlu2 %1508 }
 0x1a8   : > { %1652 = vst.msk [vmem:[#allocation3 + $0x30] sm:$0xf] %vm1645_vm4, %v1610_v16 }
 0x1a9   : > { %1653 = vst.msk [vmem:[#allocation3 + $0x38] sm:$0xf] %vm1645_vm4, %v1612_v51 }
 0x1aa   : > { %v2314_v60 = vpop.f32.mrf.mxu2 }
 0x1ac   : > { %1391 = vrot.lane.b32.xlu0 %v3808_v10, %s2990_s25  ;;  %1393 = vrot.lane.b32.xlu1 %v3805_v62, %s2990_s25  ;;  %v2656_v10 = vor.u32 %v2734_v58, %v2653_v31 }
 0x1ad   : > { %1504 = vrot.lane.b32.xlu2 %v1462_v42, %s2991_s28  ;;  %v1904_v42 = vld [vmem:[#allocation2 + $0xe2] sm:$0xff] }
 0x1ae   : > { %v1724_v14 = vpop.permute.xlu0 %1723  ;;  %v1726_v50 = vpop.permute.xlu1 %1725  ;;  %2714 = vmatmul.msk.bf16.gmra.mxu2 %vm4328_vm9, %v2656_v10 }
 0x1af   : > { %1766 = vst.msk [vmem:[#allocation3 + $0x30] sm:$0xf] %vm1759_vm3, %v1724_v14  ;;  %v1624_v48 = vpop.permute.xlu2 %1623  ;;  %v2066_v33 = vpop.f32.mrf.mxu0 }
 0x1b0   : > { %1767 = vst.msk [vmem:[#allocation3 + $0x38] sm:$0xf] %vm1759_vm3, %v1726_v50  ;;  %v1920_v50 = vpack.c.bf16 %v1904_v42, %v1904_v42 }
 0x1b1   : > { %1879 = vst.msk [vmem:[#allocation3 + $0x30] sm:$0xf] %vm1872_vm12, %v1837_v44 }
 0x1b2   : > { %v2316_v8 = vpop.f32.mrf.mxu2  ;;  %1936 = vst.msk [vmem:[#allocation3 + $0x7c] sm:$0xf] %vm1079_vm11, %v1920_v50 }
 0x1b4   : > { %1506 = vrot.lane.b32.xlu0 %v1463_v13, %s2991_s28  ;;  %1617 = vrot.lane.b32.xlu1 %v3858_v61, %s2992_s29 }
 0x1b5   : > { %1619 = vrot.lane.b32.xlu2 %v3919_v37, %s2992_s29 }
 0x1b6   : > { %v1839_v62 = vpop.permute.xlu0 %1838  ;;  %v1282_v26 = vpop.permute.xlu1 %1281 }
 0x1b7   : > { %1880 = vst.msk [vmem:[#allocation3 + $0x38] sm:$0xf] %vm1872_vm12, %v1839_v62  ;;  %v1849_v22 = vpop.permute.xlu2 %1848  ;;  %v2068_v46 = vpop.f32.mrf.mxu0 }
 0x1b8   : > { %1318 = vst.msk [vmem:[#allocation3 + $0x60] sm:$0xf] %vm1305_vm14, %v1282_v26  ;;  %v2635_v61 = vld [vmem:[#allocation3 + $0x30] sm:$0xf] }
 0x1b9   : > { %v2669_v0 = vld [vmem:[#allocation3 + $0x78] sm:$0xf0] }
 0x1ba   : > { %v2319_v13 = vpop.f32.mrf.mxu2 }
 0x1bc   : > { %1731 = vrot.lane.b32.xlu0 %v3821_v3, %s2993_s16  ;;  %1733 = vrot.lane.b32.xlu1 %v3826_v36, %s2993_s16  ;;  %v2736_v3 = vld [vmem:[#allocation3 + $0x64] sm:$0xf] }
 0x1bd   : > { %1844 = vrot.lane.b32.xlu2 %v1802_v47, %s2994_s18  ;;  %v2664_v36 = vor.u32 %v2736_v3, %v2661_v18 }
 0x1be   : > { %v1396_v43 = vpop.permute.xlu0 %1395  ;;  %v2731_v37 = vld [vmem:[#allocation3 + $0x34] sm:$0xf0]  ;;  %v1398_v23 = vpop.permute.xlu1 %1397 }
 0x1bf   : > { %1432 = vst.msk [vmem:[#allocation3 + $0x60] sm:$0xf] %vm1419_vm0, %v1396_v43  ;;  %v2636_v40 = vor.u32 %v2731_v37, %v2635_v61  ;;  %v1276_v55 = vpop.permute.xlu2 %1275  ;;  %2715 = vmatmul.msk.bf16.gmra.mxu2 %vm4329_vm13, %v2664_v36  ;;  %v2071_v58 = vpop.f32.mrf.mxu0 }
 0x1c0   : > { %1433 = vst.msk [vmem:[#allocation3 + $0x68] sm:$0xf] %vm1419_vm0, %v1398_v23 }
 0x1c1   : > { %2279 = vmatmul.bf16.gmra.mxu1 %v2636_v40  ;;  %1545 = vst.msk [vmem:[#allocation3 + $0x60] sm:$0xf] %vm1532_vm8, %v1509_v35  ;;  %v1903_v35 = vld [vmem:[#allocation2 + $0xda] sm:$0xff] }
 0x1c2   : > { %1315 = vst.msk [vmem:[#allocation3 + $0x48] sm:$0xf] %vm1305_vm14, %v1276_v55  ;;  %v1919_v14 = vpack.c.bf16 %v1903_v35, %v1903_v35  ;;  %v2756_v55 = vld [vmem:[%s3103_s10 + $0x38] sm:$0xff]  ;;  %v2321_v18 = vpop.f32.mrf.mxu2 }
 0x1c3   : > { %2608 = vmatmul.msk.bf16.gmra.mxu0 %vm2028_vm2, %v2756_v55 }
 0x1c4   : > { %1846 = vrot.lane.b32.xlu0 %v1803_v34, %s2994_s18  ;;  %1935 = vst.msk [vmem:[#allocation3 + $0x74] sm:$0xf] %vm1079_vm11, %v1919_v14  ;;  %vm4331_vm11 = vmmov %vm4323_vm1 }
 0x1c6   : > { %v1511_v9 = vpop.permute.xlu0 %1510  ;;  %v1622_v4 = vpop.permute.xlu1 %1621 }
 0x1c7   : > { %1546 = vst.msk [vmem:[#allocation3 + $0x68] sm:$0xf] %vm1532_vm8, %v1511_v9  ;;  %v1501_v27 = vpop.permute.xlu2 %1500  ;;  %v2073_v23 = vpop.f32.mrf.mxu0 }
 0x1c8   : > { %1658 = vst.msk [vmem:[#allocation3 + $0x60] sm:$0xf] %vm1645_vm4, %v1622_v4 }
 0x1c9   : > { %1659 = vst.msk [vmem:[#allocation3 + $0x68] sm:$0xf] %vm1645_vm4, %v1624_v48 }
 0x1cb   : > { %v2738_v47 = vld [vmem:[#allocation3 + $0x74] sm:$0xf] }
 0x1cc   : > { %v2672_v43 = vor.u32 %v2738_v47, %v2669_v0 }
 0x1ce   : > { %v1736_v25 = vpop.permute.xlu0 %1735  ;;  %v1738_v49 = vpop.permute.xlu1 %1737 }
 0x1cf   : > { %1772 = vst.msk [vmem:[#allocation3 + $0x60] sm:$0xf] %vm1759_vm3, %v1736_v25  ;;  %v1616_v53 = vpop.permute.xlu2 %1615  ;;  %2716 = vmatmul.msk.bf16.gmra.mxu2 %vm4331_vm11, %v2672_v43  ;;  %v2076_v25 = vpop.f32.mrf.mxu0 }
 0x1d0   : > { %1773 = vst.msk [vmem:[#allocation3 + $0x68] sm:$0xf] %vm1759_vm3, %v1738_v49 }
 0x1d1   : > { %1885 = vst.msk [vmem:[#allocation3 + $0x60] sm:$0xf] %vm1872_vm12, %v1849_v22 }
 0x1d6   : > { %v1851_v59 = vpop.permute.xlu0 %1850  ;;  %v1274_v51 = vpop.permute.xlu1 %1273 }
 0x1d7   : > { %1886 = vst.msk [vmem:[#allocation3 + $0x68] sm:$0xf] %vm1872_vm12, %v1851_v59  ;;  %v1841_v63 = vpop.permute.xlu2 %1840 }
 0x1d8   : > { %1314 = vst.msk [vmem:[#allocation3 + $0x40] sm:$0xf] %vm1305_vm14, %v1274_v51  ;;  %v2659_v54 = vld [vmem:[#allocation3 + $0x60] sm:$0xf] }
 0x1de   : > { %v1388_v28 = vpop.permute.xlu0 %1387  ;;  %v2737_v2 = vld [vmem:[#allocation3 + $0x64] sm:$0xf0]  ;;  %v1390_v30 = vpop.permute.xlu1 %1389 }
 0x1df   : > { %1428 = vst.msk [vmem:[#allocation3 + $0x40] sm:$0xf] %vm1419_vm0, %v1388_v28  ;;  %v2660_v17 = vor.u32 %v2737_v2, %v2659_v54  ;;  %v1288_v1 = vpop.permute.xlu2 %1287  ;;  %v2078_v54 = vpop.f32.mrf.mxu0 }
 0x1e0   : > { %1429 = vst.msk [vmem:[#allocation3 + $0x48] sm:$0xf] %vm1419_vm0, %v1390_v30 }
 0x1e1   : > { %2294 = vmatmul.bf16.vlgmr.msra.gmra.mxu3 %v2660_v17  ;;  %1541 = vst.msk [vmem:[#allocation3 + $0x40] sm:$0xf] %vm1532_vm8, %v1501_v27 }
 0x1e2   : > { %1321 = vst.msk [vmem:[#allocation3 + $0x78] sm:$0xf] %vm1305_vm14, %v1288_v1 }
 0x1e6   : > { %v1503_v38 = vpop.permute.xlu0 %1502  ;;  %v1614_v19 = vpop.permute.xlu1 %1613 }
 0x1e7   : > { %1542 = vst.msk [vmem:[#allocation3 + $0x48] sm:$0xf] %vm1532_vm8, %v1503_v38  ;;  %v2265_v44 = vpop.f32.mrf.mxu1  ;;  %v1513_v12 = vpop.permute.xlu2 %1512 }
 0x1e8   : > { %v2266_v11 = vadd.f32 %v2265_v44, %v2066_v33  ;;  %1654 = vst.msk [vmem:[#allocation3 + $0x40] sm:$0xf] %vm1645_vm4, %v1614_v19 }
 0x1e9   : > { %1655 = vst.msk [vmem:[#allocation3 + $0x48] sm:$0xf] %vm1645_vm4, %v1616_v53 }
 0x1ea   : > { %v2315_v7 = vadd.f32 %v2314_v60, %v2266_v11  ;;  %v2081_v11 = vpop.f32.mrf.mxu0 }
 0x1ec   : > { %v2358_v29 = vadd.f32 %v4127_v56, %v2315_v7 }
 0x1ee   : > { %2374 = vst.msk [vmem:[%s3111_s0] sm:$0xff] %vm4330_vm15, %v2358_v29  ;;  %v1728_v32 = vpop.permute.xlu0 %1727  ;;  %v1730_v21 = vpop.permute.xlu1 %1729 }
 0x1ef   : > { %1768 = vst.msk [vmem:[#allocation3 + $0x40] sm:$0xf] %vm1759_vm3, %v1728_v32  ;;  %v2267_v20 = vpop.f32.mrf.mxu1  ;;  %v1628_v52 = vpop.permute.xlu2 %1627 }
 0x1f0   : > { %v2268_v24 = vadd.f32 %v2267_v20, %v2068_v46  ;;  %1769 = vst.msk [vmem:[#allocation3 + $0x48] sm:$0xf] %vm1759_vm3, %v1730_v21 }
 0x1f1   : > { %1881 = vst.msk [vmem:[#allocation3 + $0x40] sm:$0xf] %vm1872_vm12, %v1841_v63 }
 0x1f2   : > { %v2317_v45 = vadd.f32 %v2316_v8, %v2268_v24 }
 0x1f4   : > { %v2359_v16 = vadd.f32 %v4127_v56, %v2317_v45 }
 0x1f6   : > { %2375 = vst.msk [vmem:[%s3111_s0 + $0x8] sm:$0xff] %vm4323_vm1, %v2359_v16  ;;  %v1843_v41 = vpop.permute.xlu0 %1842  ;;  %v1286_v57 = vpop.permute.xlu1 %1285 }
 0x1f7   : > { %1882 = vst.msk [vmem:[#allocation3 + $0x48] sm:$0xf] %vm1872_vm12, %v1843_v41  ;;  %v1853_v15 = vpop.permute.xlu2 %1852 }
 0x1f8   : > { %1320 = vst.msk [vmem:[#allocation3 + $0x70] sm:$0xf] %vm1305_vm14, %v1286_v57  ;;  %v2643_v31 = vld [vmem:[#allocation3 + $0x40] sm:$0xf] }
 0x1fa   : > { %v2324_v49 = vpop.f32.mrf.mxu2 }
 0x1fe   : > { %v1400_v48 = vpop.permute.xlu0 %1399  ;;  %v2733_v10 = vld [vmem:[#allocation3 + $0x44] sm:$0xf0]  ;;  %v1402_v62 = vpop.permute.xlu1 %1401 }
 0x1ff   : > { %1434 = vst.msk [vmem:[#allocation3 + $0x70] sm:$0xf] %vm1419_vm0, %v1400_v48  ;;  %v2270_v26 = vpop.f32.mrf.mxu1  ;;  %v2644_v6 = vor.u32 %v2733_v10, %v2643_v31  ;;  %v1280_v22 = vpop.permute.xlu2 %1279 }
 0x200   : > { %v2271_v39 = vadd.f32 %v2270_v26, %v2071_v58  ;;  %1435 = vst.msk [vmem:[#allocation3 + $0x78] sm:$0xf] %vm1419_vm0, %v1402_v62 }
 0x201   : > { %2284 = vmatmul.bf16.gmra.mxu1 %v2644_v6  ;;  %1547 = vst.msk [vmem:[#allocation3 + $0x70] sm:$0xf] %vm1532_vm8, %v1513_v12 }
 0x202   : > { %v2320_v61 = vadd.f32 %v2319_v13, %v2271_v39  ;;  %1317 = vst.msk [vmem:[#allocation3 + $0x58] sm:$0xf] %vm1305_vm14, %v1280_v22  ;;  %v2326_v28 = vpop.f32.mrf.mxu2 }
 0x204   : > { %v2360_v37 = vadd.f32 %v4127_v56, %v2320_v61 }
 0x206   : > { %2376 = vst.msk [vmem:[%s3111_s0 + $0x10] sm:$0xff] %vm4332_vm6, %v2360_v37  ;;  %v1515_v40 = vpop.permute.xlu0 %1514  ;;  %v1626_v34 = vpop.permute.xlu1 %1625 }
 0x207   : > { %1548 = vst.msk [vmem:[#allocation3 + $0x78] sm:$0xf] %vm1532_vm8, %v1515_v40  ;;  %v2272_v3 = vpop.f32.mrf.mxu1  ;;  %v1505_v51 = vpop.permute.xlu2 %1504 }
 0x208   : > { %v2273_v36 = vadd.f32 %v2272_v3, %v2073_v23  ;;  %1660 = vst.msk [vmem:[#allocation3 + $0x70] sm:$0xf] %vm1645_vm4, %v1626_v34 }
 0x209   : > { %1661 = vst.msk [vmem:[#allocation3 + $0x78] sm:$0xf] %vm1645_vm4, %v1628_v52  ;;  %v2083_v52 = vpop.f32.mrf.mxu0 }
 0x20a   : > { %v2322_v9 = vadd.f32 %v2321_v18, %v2273_v36  ;;  %v2329_v12 = vpop.f32.mrf.mxu2 }
 0x20c   : > { %v2361_v4 = vadd.f32 %v4127_v56, %v2322_v9 }
 0x20e   : > { %2377 = vst.msk [vmem:[%s3111_s0 + $0x18] sm:$0xff] %vm4333_vm5, %v2361_v4  ;;  %v1740_v5 = vpop.permute.xlu0 %1739  ;;  %v1742_v27 = vpop.permute.xlu1 %1741 }
 0x20f   : > { %1774 = vst.msk [vmem:[#allocation3 + $0x70] sm:$0xf] %vm1759_vm3, %v1740_v5  ;;  %v1620_v44 = vpop.permute.xlu2 %1619 }
 0x210   : > { %1775 = vst.msk [vmem:[#allocation3 + $0x78] sm:$0xf] %vm1759_vm3, %v1742_v27 }
 0x211   : > { %1887 = vst.msk [vmem:[#allocation3 + $0x70] sm:$0xf] %vm1872_vm12, %v1853_v15  ;;  %v2086_v57 = vpop.f32.mrf.mxu0 }
 0x212   : > { %v2331_v16 = vpop.f32.mrf.mxu2 }
 0x216   : > { %v1855_v53 = vpop.permute.xlu0 %1854  ;;  %v1278_v59 = vpop.permute.xlu1 %1277 }
 0x217   : > { %1888 = vst.msk [vmem:[#allocation3 + $0x78] sm:$0xf] %vm1872_vm12, %v1855_v53  ;;  %v1845_v8 = vpop.permute.xlu2 %1844 }
 0x218   : > { %1316 = vst.msk [vmem:[#allocation3 + $0x50] sm:$0xf] %vm1305_vm14, %v1278_v59  ;;  %v2667_v63 = vld [vmem:[#allocation3 + $0x70] sm:$0xf]  ;;  %vm4334_vm14 = vmmov %vm4323_vm1 }
 0x219   : > { %v2088_v13 = vpop.f32.mrf.mxu0 }
 0x21a   : > { %v2334_v35 = vpop.f32.mrf.mxu2 }
 0x21e   : > { %v1392_v2 = vpop.permute.xlu0 %1391  ;;  %v2275_v30 = vpop.f32.mrf.mxu1  ;;  %v2739_v17 = vld [vmem:[#allocation3 + $0x74] sm:$0xf0] }
 0x21f   : > { %1430 = vst.msk [vmem:[#allocation3 + $0x50] sm:$0xf] %vm1419_vm0, %v1392_v2  ;;  %v2276_v1 = vadd.f32 %v2275_v30, %v2076_v25  ;;  %v2668_v33 = vor.u32 %v2739_v17, %v2667_v63  ;;  %v1394_v60 = vpop.permute.xlu1 %1393 }
 0x220   : > { %1431 = vst.msk [vmem:[#allocation3 + $0x58] sm:$0xf] %vm1419_vm0, %v1394_v60  ;;  %vm4335_vm0 = vmmov %vm4323_vm1 }
 0x221   : > { %v2325_v38 = vadd.f32 %v2324_v49, %v2276_v1  ;;  %2299 = vmatmul.bf16.gmra.mxu3 %v2668_v33  ;;  %1543 = vst.msk [vmem:[#allocation3 + $0x50] sm:$0xf] %vm1532_vm8, %v1505_v51  ;;  %v2091_v22 = vpop.f32.mrf.mxu0  ;;  %vm4337_vm2 = vmmov %vm4335_vm0 }
 0x222   : > { %v2336_v10 = vpop.f32.mrf.mxu2  ;;  %vm4341_vm7 = vmmov %vm4335_vm0 }
 0x223   : > { %v2362_v19 = vadd.f32 %v4127_v56, %v2325_v38  ;;  %vm4342_vm10 = vmmov %vm4335_vm0 }
 0x224   : > { %vm4343_vm9 = vmmov %vm4335_vm0 }
 0x225   : > { %2378 = vst.msk [vmem:[%s3111_s0 + $0x20] sm:$0xff] %vm4334_vm14, %v2362_v19  ;;  %vm4344_vm13 = vmmov %vm4335_vm0 }
 0x226   : > { %v1507_v7 = vpop.permute.xlu0 %1506  ;;  %v2277_v29 = vpop.f32.mrf.mxu1  ;;  %vm4345_vm15 = vmmov %vm4335_vm0 }
 0x227   : > { %1544 = vst.msk [vmem:[#allocation3 + $0x58] sm:$0xf] %vm1532_vm8, %v1507_v7  ;;  %v2278_v46 = vadd.f32 %v2277_v29, %v2078_v54  ;;  %v1618_v32 = vpop.permute.xlu1 %1617  ;;  %vm4336_vm8 = vmmov %vm4335_vm0 }
 0x228   : > { %1656 = vst.msk [vmem:[#allocation3 + $0x50] sm:$0xf] %vm1645_vm4, %v1618_v32 }
 0x229   : > { %v2327_v21 = vadd.f32 %v2326_v28, %v2278_v46  ;;  %1657 = vst.msk [vmem:[#allocation3 + $0x58] sm:$0xf] %vm1645_vm4, %v1620_v44  ;;  %v2093_v61 = vpop.f32.mrf.mxu0  ;;  %vm4338_vm4 = vmmov %vm4335_vm0 }
 0x22b   : > { %v2363_v20 = vadd.f32 %v4127_v56, %v2327_v21 }
 0x22d   : > { %2379 = vst.msk [vmem:[%s3111_s0 + $0x28] sm:$0xff] %vm4335_vm0, %v2363_v20 }
 0x22e   : > { %v1732_v24 = vpop.permute.xlu0 %1731 }
 0x22f   : > { %1770 = vst.msk [vmem:[#allocation3 + $0x50] sm:$0xf] %vm1759_vm3, %v1732_v24  ;;  %v1734_v45 = vpop.permute.xlu1 %1733 }
 0x230   : > { %1771 = vst.msk [vmem:[#allocation3 + $0x58] sm:$0xf] %vm1759_vm3, %v1734_v45  ;;  %vm4339_vm3 = vmmov %vm4335_vm0 }
 0x231   : > { %1883 = vst.msk [vmem:[#allocation3 + $0x50] sm:$0xf] %vm1872_vm12, %v1845_v8  ;;  %v2339_v47 = vpop.f32.mrf.mxu2  ;;  %v2096_v43 = vpop.f32.mrf.mxu0 }
 0x236   : > { %v1847_v41 = vpop.permute.xlu0 %1846 }
 0x237   : > { %1884 = vst.msk [vmem:[#allocation3 + $0x58] sm:$0xf] %vm1872_vm12, %v1847_v41  ;;  %vm4340_vm12 = vmmov %vm4335_vm0 }
 0x238   : > { %v2651_v42 = vld [vmem:[#allocation3 + $0x50] sm:$0xf] }
 0x239   : > { %v2341_v0 = vpop.f32.mrf.mxu2  ;;  %v2098_v3 = vpop.f32.mrf.mxu0 }
 0x23e   : > { %v2280_v15 = vpop.f32.mrf.mxu1  ;;  %v2735_v14 = vld [vmem:[#allocation3 + $0x54] sm:$0xf0] }
 0x23f   : > { %v2281_v50 = vadd.f32 %v2280_v15, %v2081_v11  ;;  %v2652_v58 = vor.u32 %v2735_v14, %v2651_v42 }
 0x241   : > { %v2330_v31 = vadd.f32 %v2329_v12, %v2281_v50  ;;  %2289 = vmatmul.bf16.gmra.mxu1 %v2652_v58  ;;  %v2101_v28 = vpop.f32.mrf.mxu0 }
 0x242   : > { %v2344_v37 = vpop.f32.mrf.mxu2 }
 0x243   : > { %v2364_v48 = vadd.f32 %v4127_v56, %v2330_v31 }
 0x245   : > { %2380 = vst.msk [vmem:[%s3111_s0 + $0x30] sm:$0xff] %vm4336_vm8, %v2364_v48 }
 0x246   : > { %v2282_v62 = vpop.f32.mrf.mxu1 }
 0x247   : > { %v2283_v26 = vadd.f32 %v2282_v62, %v2083_v52 }
 0x249   : > { %v2332_v6 = vadd.f32 %v2331_v16, %v2283_v26  ;;  %v2103_v60 = vpop.f32.mrf.mxu0 }
 0x24a   : > { %v2346_v36 = vpop.f32.mrf.mxu2 }
 0x24b   : > { %v2365_v39 = vadd.f32 %v4127_v56, %v2332_v6 }
 0x24d   : > { %2381 = vst.msk [vmem:[%s3111_s0 + $0x38] sm:$0xff] %vm4337_vm2, %v2365_v39 }
 0x252   : > { %v2349_v2 = vpop.f32.mrf.mxu2 }
 0x25a   : > { %v2351_v19 = vpop.f32.mrf.mxu2 }
 0x264   : > { %v2295_v23 = vpop.f32.mrf.mxu3 }
 0x265   : > { %v2296_v40 = vadd.f32 %v2295_v23, %v2096_v43 }
 0x267   : > { %v2345_v34 = vadd.f32 %v2344_v37, %v2296_v40 }
 0x269   : > { %v2370_v55 = vadd.f32 %v4127_v56, %v2345_v34 }
 0x26b   : > { %2386 = vst.msk [vmem:[%s3111_s0 + $0x60] sm:$0xff] %vm4338_vm4, %v2370_v55 }
 0x26c   : > { %v2297_v18 = vpop.f32.mrf.mxu3 }
 0x26d   : > { %v2298_v9 = vadd.f32 %v2297_v18, %v2098_v3 }
 0x26f   : > { %v2347_v4 = vadd.f32 %v2346_v36, %v2298_v9 }
 0x271   : > { %v2371_v5 = vadd.f32 %v4127_v56, %v2347_v4 }
 0x273   : > { %2387 = vst.msk [vmem:[%s3111_s0 + $0x68] sm:$0xff] %vm4339_vm3, %v2371_v5 }
 0x27e   : > { %v2285_v27 = vpop.f32.mrf.mxu1 }
 0x27f   : > { %v2286_v25 = vadd.f32 %v2285_v27, %v2086_v57 }
 0x281   : > { %v2335_v49 = vadd.f32 %v2334_v35, %v2286_v25 }
 0x283   : > { %v2366_v53 = vadd.f32 %v4127_v56, %v2335_v49 }
 0x285   : > { %2382 = vst.msk [vmem:[%s3111_s0 + $0x40] sm:$0xff] %vm4340_vm12, %v2366_v53 }
 0x286   : > { %v2287_v59 = vpop.f32.mrf.mxu1 }
 0x287   : > { %v2288_v51 = vadd.f32 %v2287_v59, %v2088_v13 }
 0x289   : > { %v2337_v63 = vadd.f32 %v2336_v10, %v2288_v51 }
 0x28b   : > { %v2367_v54 = vadd.f32 %v4127_v56, %v2337_v63 }
 0x28d   : > { %2383 = vst.msk [vmem:[%s3111_s0 + $0x48] sm:$0xff] %vm4341_vm7, %v2367_v54 }
 0x2a4   : > { %v2300_v30 = vpop.f32.mrf.mxu3 }
 0x2a5   : > { %v2301_v17 = vadd.f32 %v2300_v30, %v2101_v28 }
 0x2a7   : > { %v2350_v1 = vadd.f32 %v2349_v2, %v2301_v17 }
 0x2a9   : > { %v2372_v33 = vadd.f32 %v4127_v56, %v2350_v1 }
 0x2ab   : > { %2388 = vst.msk [vmem:[%s3111_s0 + $0x70] sm:$0xff] %vm4342_vm10, %v2372_v33 }
 0x2ac   : > { %v2302_v38 = vpop.f32.mrf.mxu3 }
 0x2ad   : > { %v2303_v44 = vadd.f32 %v2302_v38, %v2103_v60 }
 0x2af   : > { %v2352_v11 = vadd.f32 %v2351_v19, %v2303_v44 }
 0x2b1   : > { %v2373_v12 = vadd.f32 %v4127_v56, %v2352_v11 }
 0x2b3   : > { %2389 = vst.msk [vmem:[%s3111_s0 + $0x78] sm:$0xff] %vm4343_vm9, %v2373_v12 }
 0x2be   : > { %v2290_v7 = vpop.f32.mrf.mxu1 }
 0x2bf   : > { %v2291_v29 = vadd.f32 %v2290_v7, %v2091_v22 }
 0x2c1   : > { %v2340_v46 = vadd.f32 %v2339_v47, %v2291_v29 }
 0x2c3   : > { %v2368_v32 = vadd.f32 %v4127_v56, %v2340_v46 }
 0x2c5   : > { %2384 = vst.msk [vmem:[%s3111_s0 + $0x50] sm:$0xff] %vm4344_vm13, %v2368_v32 }
 0x2c6   : > { %v2292_v21 = vpop.f32.mrf.mxu1 }
 0x2c7   : > { %v2293_v20 = vadd.f32 %v2292_v21, %v2093_v61 }
 0x2c9   : > { %v2342_v8 = vadd.f32 %v2341_v0, %v2293_v20 }
 0x2cb   : > { %v2369_v24 = vadd.f32 %v4127_v56, %v2342_v8 }
 0x2cd   : > { %2385 = vst.msk [vmem:[%s3111_s0 + $0x58] sm:$0xff] %vm4345_vm15, %v2369_v24 }
 0x2ce PF: > { %s19_s13 = sadd.s32 1, %s2983_s13   ;;  %s4346_s30 = smov %s2975_s11 }
 0x2cf   : > { %p16_p9 = scmp.ge.s32.totalorder %s19_s13, 6   ;;  %s4347_s10 = smov %s2979_s12 }
 0x2d0   : > { %s4348_s11 = smov %s4351_s14  ;;  %s4349_s12 = smov %s4355_s15 }
 0x2d1   :  { %18 = sbr.rel (!%p16_p9) target bundleno = 3 (0x3), region = 112 }

// kernel: unet_block_forward.2
= control target key start
LH: loop header
LB: loop body
LE: loop exit
PB: predicated region body
PF: predicated region fallthrough
CT: control target
= control target key end

     0   :  { %s2789_s27 = smov 0   ;;  %s2791_s28 = smov 0   ;;  %s4058_s0 = inlined_call_operand.vmem [shape: f32[4,8,16,8], index: 0, kind: input, shape index: {}]   ;;  %s4059_s1 = inlined_call_operand.vmem [shape: f32[4,16,8], index: 1, kind: input, shape index: {}]   ;;  %s4060_s2 = inlined_call_operand.vmem [shape: f32[4,16,8], index: 2, kind: input, shape index: {}]   ;;  %s4061_s3 = inlined_call_operand.vmem [shape: f32[2,1,8], index: 3, kind: input, shape index: {}]   ;;  %s4062_s4 = inlined_call_operand.vmem [shape: f32[2,1,8], index: 4, kind: input, shape index: {}]   ;;  %s4063_s5 = inlined_call_operand.vmem [shape: bf16[72,16], index: 5, kind: input, shape index: {}]   ;;  %s4064_s6 = inlined_call_operand.vmem [shape: f32[2,1,16], index: 6, kind: input, shape index: {}]   ;;  %s4065_s7 = inlined_call_operand.vmem [shape: bf16[4,8,16,16], index: 7, kind: output, shape index: {0}]   ;;  %s4066_s8 = inlined_call_operand.vmem [shape: f32[4,2,16], index: 8, kind: output, shape index: {1}]  }
   0x1   :  { %s2793_s29 = smov 0   ;;  %s2795_s30 = smov 0  }
   0x2   :  { %s2797_s9 = smov 0  }
   0x3 LB: > { %s28_s10 = sadd.s32 1, %s2723_s29  ;;  %s31_s11 = sadd.s32 1, %s2727_s30  ;;  %s2731_s9 = sphi %s2797_s9, %s19_s9   ;;  %s2727_s30 = sphi %s2795_s30, %s4154_s30   ;;  %s2723_s29 = sphi %s2793_s29, %s4153_s29   ;;  %s2719_s28 = sphi %s2791_s28, %s4152_s28   ;;  %s2715_s27 = sphi %s2789_s27, %s4151_s27  }
   0x4   : > { %p29_p0 = scmp.ge.s32.totalorder %s28_s10, 2  ;;  %p2433_p1 = scmp.ge.s32.totalorder %s2731_s9, 1 }
   0x5   : > { %p353_p2 = scmp.lt.s32.totalorder %s2731_s9, 5 }
   0x6   : > { %s4156_s10 = smov (%p29_p0, %s28_s10), 0  ;;  %s4158_s11 = smov (!%p29_p0, %s31_s11), %s2727_s30 }
   0x7   : > { %p354_p3 = pnand %p2433_p1, %p353_p2  ;;  %p33_p4 = scmp.ge.s32.totalorder %s4158_s11, 2 }
   0x8   : > { %s2434_s12 = sshll.u32 (!%p354_p3), %s2719_s28, 1  ;;  %p447_p5 = scmp.lt.s32.totalorder (!%p354_p3), %s2719_s28, 1 }
   0x9   : > { %s4160_s11 = smov (%p33_p4, %s4158_s11), 0  ;;  %357 = sbr.rel (%p354_p3) target bundleno = 772 (0x304), region = 48 }
   0xa   : > { %s421_s13 = sadd.s32 (!%p354_p3), %s2715_s27, %s2434_s12  ;;  %p2468_p7 = scmp.ne.s32.totalorder (!%p354_p3), %s2715_s27, 0 }
   0xb   : > { %p422_p6 = scmp.lt.s32.totalorder (!%p354_p3), %s421_s13, 3 }
   0xe   : > { %s4162_s28 = smov (!%p447_p5, %s2719_s28), 1  ;;  %s4164_s13 = smov (!%p422_p6, %s421_s13), 3 }
   0xf   : > { %s449_s16 = scalar_lea.vmem %s4061_s3, %s4162_s28  ;;  %s452_s19 = scalar_lea.vmem %s4062_s4, %s4162_s28 }
  0x10   : > { %s2528_s20 = sshll.u32 %s4164_s13, 7  ;;  %s2529_s21 = sshll.u32 %s4164_s13, 4  ;;  %v2836_v0 = vld [vmem:[%s449_s16] ss:$0 sm:$0xff] }
  0x11   : > { %s2841_s24 = scalar_lea.vmem %s4058_s0, %s2528_s20  ;;  %s435_s12 = scalar_lea.vmem %s4059_s1, %s2529_s21  ;;  %v2848_v1 = vld [vmem:[%s452_s19] ss:$0 sm:$0xff] }
  0x12   : > { %s455_s16 = scalar_lea.vmem %s4064_s6, %s4162_s28  ;;  %s2531_s17 = sshll.u32 %s4164_s13, 6  ;;  %v474_v2 = vld [vmem:[%s435_s12] sm:$0xff]  ;;  %v475_v3 = vld [vmem:[%s435_s12 + $0x8] sm:$0xff]  ;;  %v478_v9 = vld [vmem:[%s2841_s24 + $0x10] sm:$0xff] }
  0x13   : > { %v476_v4 = vld [vmem:[%s2841_s24] sm:$0xff]  ;;  %s2859_s22 = scalar_lea.vmem %s4065_s7, %s2531_s17  ;;  %s2447_s23 = sshll.u32 %s4164_s13, 1  ;;  %v498_v5 = vmul.f32 %v2836_v0, %v474_v2  ;;  %v499_v6 = vmul.f32 %v2836_v0, %v475_v3  ;;  %v477_v8 = vld [vmem:[%s2841_s24 + $0x8] sm:$0xff]  ;;  %v479_v10 = vld [vmem:[%s2841_s24 + $0x18] sm:$0xff]  ;;  %v502_v12 = vmul.f32 %v2836_v0, %v478_v9 }
  0x14   : > { %v500_v7 = vmul.f32 %v2836_v0, %v476_v4  ;;  %s2871_s26 = scalar_lea.vmem %s4066_s8, %s2447_s23  ;;  %v501_v11 = vmul.f32 %v2836_v0, %v477_v8  ;;  %v503_v13 = vmul.f32 %v2836_v0, %v479_v10  ;;  %v480_v14 = vld [vmem:[%s2841_s24 + $0x20] sm:$0xff]  ;;  %v481_v15 = vld [vmem:[%s2841_s24 + $0x28] sm:$0xff]  ;;  %v482_v24 = vld [vmem:[%s2841_s24 + $0x30] sm:$0xff]  ;;  %s444_s14 = scalar_lea.vmem %s4060_s2, %s2529_s21 }
  0x15   : > { %v2879_v16 = vadd.f32 %v2848_v1, %v498_v5  ;;  %v2882_v17 = vadd.f32 %v2848_v1, %v499_v6  ;;  %v504_v19 = vmul.f32 %v2836_v0, %v480_v14  ;;  %v2892_v21 = vadd.f32 %v2848_v1, %v502_v12  ;;  %v483_v30 = vld [vmem:[%s2841_s24 + $0x38] sm:$0xff]  ;;  %v484_v31 = vld [vmem:[%s2841_s24 + $0x40] sm:$0xff]  ;;  %v485_v38 = vld [vmem:[%s2841_s24 + $0x48] sm:$0xff] }
  0x16   : > { %v2885_v18 = vadd.f32 %v2848_v1, %v500_v7  ;;  %v2889_v20 = vadd.f32 %v2848_v1, %v501_v11  ;;  %v2895_v22 = vadd.f32 %v2848_v1, %v503_v13  ;;  %v505_v23 = vmul.f32 %v2836_v0, %v481_v15  ;;  %v486_v54 = vld [vmem:[%s2841_s24 + $0x50] sm:$0xff] }
  0x17   : > { %v2448_v25 = vmul.f32 -1.442695, %v2879_v16  ;;  %v2449_v26 = vmul.f32 -1.442695, %v2882_v17  ;;  %v2904_v29 = vadd.f32 %v2848_v1, %v504_v19  ;;  %v2452_v32 = vmul.f32 -1.442695, %v2892_v21 }
  0x18   : > { %v2450_v27 = vmul.f32 -1.442695, %v2885_v18  ;;  %v2451_v28 = vmul.f32 -1.442695, %v2889_v20  ;;  %v2910_v33 = vadd.f32 %v2848_v1, %v505_v23  ;;  %v506_v34 = vmul.f32 %v2836_v0, %v482_v24 }
  0x19   : > { %2612 = vpow2.f32 %v2448_v25  ;;  %v2453_v35 = vmul.f32 -1.442695, %v2895_v22  ;;  %v507_v36 = vmul.f32 %v2836_v0, %v483_v30  ;;  %v508_v37 = vmul.f32 %v2836_v0, %v484_v31  ;;  %v487_v31 = vld [vmem:[%s2841_s24 + $0x58] sm:$0xff] }
  0x1a   : > { %2614 = vpow2.f32 %v2449_v26  ;;  %v2454_v39 = vmul.f32 -1.442695, %v2904_v29  ;;  %v2455_v40 = vmul.f32 -1.442695, %v2910_v33  ;;  %v2920_v41 = vadd.f32 %v2848_v1, %v506_v34 }
  0x1b   : > { %2616 = vpow2.f32 %v2450_v27  ;;  %v509_v42 = vmul.f32 %v2836_v0, %v485_v38  ;;  %v2924_v44 = vadd.f32 %v2848_v1, %v507_v36  ;;  %v2927_v45 = vadd.f32 %v2848_v1, %v508_v37 }
  0x1c   : > { %2618 = vpow2.f32 %v2451_v28  ;;  %v2456_v50 = vmul.f32 -1.442695, %v2920_v41  ;;  %v2958_v3 = vmul.f32 %v2836_v0, %v486_v54 }
  0x1d   : > { %2620 = vpow2.f32 %v2452_v32  ;;  %v2937_v53 = vadd.f32 %v2848_v1, %v509_v42  ;;  %v2943_v57 = vmul.f32 -1.442695, %v2924_v44  ;;  %v2946_v58 = vmul.f32 -1.442695, %v2927_v45 }
  0x1e   : > { %2622 = vpow2.f32 %v2453_v35 }
  0x1f   : > { %v2613_v43 = vpop.eup %2612  ;;  %2624 = vpow2.f32 %v2454_v39 }
  0x20   : > { %v2615_v46 = vpop.eup %2614  ;;  %v2929_v47 = vadd.f32 1.0, %v2613_v43  ;;  %2626 = vpow2.f32 %v2455_v40 }
  0x21   : > { %v2617_v48 = vpop.eup %2616  ;;  %v2931_v49 = vadd.f32 1.0, %v2615_v46 }
  0x22   : > { %v2619_v51 = vpop.eup %2618  ;;  %2628 = vrcp.f32 %v2929_v47  ;;  %v633_v52 = vand.u32 2147483648, %v2929_v47  ;;  %v631_v56 = vand.u32 2147483647, %v2929_v47  ;;  %v2950_v62 = vadd.f32 1.0, %v2617_v48 }
  0x23   : > { %v2621_v55 = vpop.eup %2620  ;;  %2630 = vrcp.f32 %v2931_v49  ;;  %v646_v60 = vand.u32 2147483647, %v2931_v49  ;;  %v648_v61 = vand.u32 2147483648, %v2931_v49  ;;  %v2952_v63 = vadd.f32 1.0, %v2619_v51 }
  0x24   : > { %v2623_v59 = vpop.eup %2622  ;;  %vm627_vm0 = vweird.f32 %v2929_v47  ;;  %v2955_v2 = vadd.f32 1.0, %v2621_v55  ;;  %2632 = vpow2.f32 %v2456_v50  ;;  %v2960_v5 = vor.u32 1.1754944e-38, %v633_v52 }
  0x25   : > { %v2625_v4 = vpop.eup %2624  ;;  %vm642_vm1 = vweird.f32 %v2931_v49  ;;  %2634 = vrcp.f32 %v2950_v62  ;;  %v663_v6 = vand.u32 2147483648, %v2950_v62  ;;  %vm2967_vm2 = vcmp.eq.f32.partialorder %v631_v56, 8.507059e+37 }
  0x26   : > { %v2965_v7 = vpop.eup %2626  ;;  %v661_v9 = vand.u32 2147483647, %v2950_v62  ;;  %2636 = vrcp.f32 %v2952_v63  ;;  %v678_v10 = vand.u32 2147483648, %v2952_v63  ;;  %v2974_v11 = vadd.f32 1.0, %v2623_v59 }
  0x27   : > { %vm2976_vm3 = vcmp.eq.f32.partialorder %v646_v60, 8.507059e+37  ;;  %v649_v14 = vor.u32 1.1754944e-38, %v648_v61  ;;  %v676_v15 = vand.u32 2147483647, %v2952_v63  ;;  %2638 = vrcp.f32 %v2955_v2 }
  0x28   : > { %v2629_v12 = vpop.eup %2628  ;;  %vm657_vm4 = vweird.f32 %v2950_v62  ;;  %v2984_v24 = vor.u32 1.1754944e-38, %v663_v6  ;;  %vm672_vm5 = vweird.f32 %v2952_v63  ;;  %vm687_vm7 = vweird.f32 %v2955_v2 }
  0x29   : > { %v2631_v19 = vpop.eup %2630  ;;  %v623_v23 = vmul.f32 %v2629_v12, %v2929_v47  ;;  %v691_v26 = vand.u32 2147483647, %v2955_v2  ;;  %v693_v27 = vand.u32 2147483648, %v2955_v2  ;;  %vm628_vm8 = vweird.f32 %v2629_v12 }
  0x2a   : > { %v638_v25 = vmul.f32 %v2631_v19, %v2931_v49  ;;  %v2633_v28 = vpop.eup %2632  ;;  %vm2991_vm9 = vcmp.eq.f32.partialorder %v661_v9, 8.507059e+37  ;;  %v679_v32 = vor.u32 1.1754944e-38, %v678_v10  ;;  %2640 = vrcp.f32 %v2974_v11  ;;  %vm3011_vm14 = vmor %vm627_vm0, %vm628_vm8 }
  0x2b   : > { %v624_v30 = vsub.f32 1.0, %v623_v23  ;;  %v2635_v34 = vpop.eup %2634  ;;  %vm643_vm10 = vweird.f32 %v2631_v19  ;;  %vm2996_vm11 = vcmp.eq.f32.partialorder %v676_v15, 8.507059e+37  ;;  %v706_v37 = vand.u32 2147483647, %v2974_v11 }
  0x2c   : > { %v639_v35 = vsub.f32 1.0, %v638_v25  ;;  %v708_v38 = vand.u32 2147483648, %v2974_v11  ;;  %v2637_v39 = vpop.eup %2636  ;;  %v653_v42 = vmul.f32 %v2635_v34, %v2950_v62  ;;  %vm3003_vm12 = vcmp.eq.f32.partialorder %v691_v26, 8.507059e+37  ;;  %vm3019_vm6 = vmor %vm642_vm1, %vm643_vm10 }
  0x2d   : > { %v625_v40 = vmul.f32 %v2629_v12, %v624_v30  ;;  %v2639_v46 = vpop.eup %2638  ;;  %vm658_vm15 = vweird.f32 %v2635_v34  ;;  %v668_v51 = vmul.f32 %v2637_v39, %v2952_v63  ;;  %v694_v52 = vor.u32 1.1754944e-38, %v693_v27 }
  0x2e   : > { %v640_v50 = vmul.f32 %v2631_v19, %v639_v35  ;;  %v654_v56 = vsub.f32 1.0, %v653_v42  ;;  %vm673_vm13 = vweird.f32 %v2637_v39  ;;  %v683_v47 = vmul.f32 %v2639_v46, %v2955_v2  ;;  %vm3040_vm1 = vmor %vm657_vm4, %vm658_vm15 }
  0x2f   : > { %v626_v54 = vadd.f32 %v2629_v12, %v625_v40  ;;  %v669_v60 = vsub.f32 1.0, %v668_v51  ;;  %vm688_vm0 = vweird.f32 %v2639_v46  ;;  %vm3024_vm8 = vcmp.eq.f32.partialorder %v706_v37, 8.507059e+37 }
  0x30   : > { %v641_v59 = vadd.f32 %v2631_v19, %v640_v50  ;;  %v709_v6 = vor.u32 1.1754944e-38, %v708_v38  ;;  %v2641_v9 = vpop.eup %2640  ;;  %v655_v10 = vmul.f32 %v2635_v34, %v654_v56  ;;  %v684_v15 = vsub.f32 1.0, %v683_v47  ;;  %vm3059_vm4 = vmor %vm687_vm7, %vm688_vm0 }
  0x31   : > { %v630_v49 = vsel %vm3011_vm14, %v2629_v12, %v626_v54  ;;  %v3030_v23 = vadd.f32 1.0, %v2625_v4  ;;  %v670_v30 = vmul.f32 %v2637_v39, %v669_v60  ;;  %v698_v12 = vmul.f32 %v2641_v9, %v2974_v11  ;;  %v488_v60 = vld [vmem:[%s2841_s24 + $0x60] sm:$0xff] }
  0x32   : > { %v635_v25 = vsel %vm2967_vm2, %v2960_v5, %v630_v49  ;;  %v645_v26 = vsel %vm3019_vm6, %v2631_v19, %v641_v59  ;;  %v656_v8 = vadd.f32 %v2635_v34, %v655_v10  ;;  %vm3051_vm2 = vmor %vm672_vm5, %vm673_vm13  ;;  %v685_v62 = vmul.f32 %v2639_v46, %v684_v15 }
  0x33   : > { %v922_v4 = vmul.f32 %v635_v25, %v2879_v16  ;;  %v650_v35 = vsel %vm2976_vm3, %v649_v14, %v645_v26  ;;  %v671_v37 = vadd.f32 %v2637_v39, %v670_v30  ;;  %v699_v13 = vsub.f32 1.0, %v698_v12  ;;  %v490_v12 = vld [vmem:[%s2841_s24 + $0x70] sm:$0xff] }
  0x34   : > { %v923_v19 = vmul.f32 %v650_v35, %v2882_v17  ;;  %vm703_vm3 = vweird.f32 %v2641_v9  ;;  %vm4089_vm6 = vcmask 64512   ;;  %v660_v63 = vsel %vm3040_vm1, %v2635_v34, %v656_v8 }
  0x35   : > { %943 = vst.msk [vmem:[#allocation2 + $0x1] sm:$0xff] %vm4089_vm6, %v922_v4  ;;  %v686_v14 = vadd.f32 %v2639_v46, %v685_v62  ;;  %2642 = vrcp.f32 %v3030_v23  ;;  %v3068_v17 = vadd.f32 1.0, %v2965_v7  ;;  %vm4090_vm5 = vmmov %vm4089_vm6  ;;  %v665_v2 = vsel %vm2991_vm9, %v2984_v24, %v660_v63 }
  0x36   : > { %944 = vst.msk [vmem:[#allocation2 + $0x9] sm:$0xff] %vm4090_vm5, %v923_v19  ;;  %v675_v38 = vsel %vm3051_vm2, %v2637_v39, %v671_v37  ;;  %v700_v40 = vmul.f32 %v2641_v9, %v699_v13  ;;  %v3076_v42 = vadd.f32 1.0, %v2633_v28  ;;  %v924_v34 = vmul.f32 %v665_v2, %v2885_v18  ;;  %vm4094_vm9 = vmmov %vm4090_vm5 }
  0x37   : > { %v680_v48 = vsel %vm2996_vm11, %v679_v32, %v675_v38  ;;  %v690_v7 = vsel %vm3059_vm4, %v2639_v46, %v686_v14  ;;  %vm4091_vm7 = vweird.f32 %v2974_v11  ;;  %v721_v24 = vand.u32 2147483647, %v3030_v23  ;;  %vm4095_vm11 = vmmov %vm4090_vm5 }
  0x38   : > { %vm3085_vm10 = vmor %vm4091_vm7, %vm703_vm3  ;;  %v925_v28 = vmul.f32 %v680_v48, %v2889_v20  ;;  %v695_v18 = vsel %vm3003_vm12, %v694_v52, %v690_v7  ;;  %v701_v39 = vadd.f32 %v2641_v9, %v700_v40  ;;  %v723_v32 = vand.u32 2147483648, %v3030_v23  ;;  %945 = vst.msk [vmem:[#allocation2 + $0x19] sm:$0xff] %vm4094_vm9, %v924_v34 }
  0x39   : > { %v926_v36 = vmul.f32 %v695_v18, %v2892_v21  ;;  %2644 = vrcp.f32 %v3068_v17  ;;  %v2459_v11 = vmul.f32 -1.442695, %v2937_v53  ;;  %v3101_v46 = vadd.f32 %v2848_v1, %v2958_v3  ;;  %vm4096_vm13 = vmmov %vm4090_vm5 }
  0x3a   : > { %946 = vst.msk [vmem:[#allocation2 + $0x21] sm:$0xff] %vm4095_vm11, %v925_v28  ;;  %v705_v20 = vsel %vm3085_vm10, %v2641_v9, %v701_v39  ;;  %vm717_vm12 = vweird.f32 %v3030_v23  ;;  %2646 = vrcp.f32 %v3076_v42  ;;  %v511_v21 = vmul.f32 %v2836_v0, %v487_v31  ;;  %vm4099_vm1 = vmmov %vm4090_vm5  ;;  %v489_v9 = vld [vmem:[%s2841_s24 + $0x68] sm:$0xff] }
  0x3b   : > { %v2643_v43 = vpop.eup %2642  ;;  %947 = vst.msk [vmem:[#allocation2 + $0x31] sm:$0xff] %vm4096_vm13, %v926_v36  ;;  %v710_v51 = vsel %vm3024_vm8, %v709_v6, %v705_v20  ;;  %vm3112_vm14 = vcmp.eq.f32.partialorder %v721_v24, 8.507059e+37  ;;  %v736_v52 = vand.u32 2147483647, %v3068_v17  ;;  %v738_v54 = vand.u32 2147483648, %v3068_v17  ;;  %vm4108_vm9 = vmmov %vm4099_vm1 }
  0x3c   : > { %v927_v55 = vmul.f32 %v710_v51, %v2895_v22  ;;  %v713_v56 = vmul.f32 %v2643_v43, %v3030_v23  ;;  %v724_v47 = vor.u32 1.1754944e-38, %v723_v32  ;;  %v753_v59 = vand.u32 2147483648, %v3076_v42  ;;  %v491_v32 = vld [vmem:[%s2841_s24 + $0x78] sm:$0xff] }
  0x3d   : > { %vm718_vm15 = vweird.f32 %v2643_v43  ;;  %vm732_vm0 = vweird.f32 %v3068_v17  ;;  %vm747_vm8 = vweird.f32 %v3076_v42  ;;  %2648 = vpow2.f32 %v2943_v57 }
  0x3e   : > { %948 = vst.msk [vmem:[#allocation2 + $0x39] sm:$0xff] %vm4099_vm1, %v927_v55  ;;  %v714_v61 = vsub.f32 1.0, %v713_v56  ;;  %2650 = vpow2.f32 %v2946_v58  ;;  %v2460_v22 = vmul.f32 -1.442695, %v3101_v46  ;;  %v3129_v6 = vadd.f32 %v2848_v1, %v511_v21  ;;  %vm3143_vm4 = vmor %vm717_vm12, %vm718_vm15 }
  0x3f   : > { %v2645_v49 = vpop.eup %2644  ;;  %vm3132_vm2 = vcmp.eq.f32.partialorder %v736_v52, 8.507059e+37  ;;  %v739_v15 = vor.u32 1.1754944e-38, %v738_v54  ;;  %v751_v57 = vand.u32 2147483647, %v3076_v42  ;;  %v512_v25 = vmul.f32 %v2836_v0, %v488_v60  ;;  %vm4109_vm12 = vmmov %vm4099_vm1 }
  0x40   : > { %v2647_v26 = vpop.eup %2646  ;;  %v715_v27 = vmul.f32 %v2643_v43, %v714_v61  ;;  %v728_v58 = vmul.f32 %v2645_v49, %v3068_v17  ;;  %v754_v30 = vor.u32 1.1754944e-38, %v753_v59  ;;  %2652 = vpow2.f32 %v2459_v11 }
  0x41   : > { %v743_v35 = vmul.f32 %v2647_v26, %v3076_v42  ;;  %v2461_v8 = vmul.f32 -1.442695, %v3129_v6  ;;  %v3150_v5 = vadd.f32 %v2848_v1, %v512_v25  ;;  %v513_v62 = vmul.f32 %v2836_v0, %v489_v9 }
  0x42   : > { %v716_v19 = vadd.f32 %v2643_v43, %v715_v27  ;;  %v729_v37 = vsub.f32 1.0, %v728_v58  ;;  %vm733_vm3 = vweird.f32 %v2645_v49  ;;  %2654 = vpow2.f32 %v2460_v22 }
  0x43   : > { %v2649_v16 = vpop.eup %2648  ;;  %v744_v13 = vsub.f32 1.0, %v743_v35  ;;  %vm748_vm6 = vweird.f32 %v2647_v26  ;;  %v2462_v23 = vmul.f32 -1.442695, %v3150_v5  ;;  %v514_v63 = vmul.f32 %v2836_v0, %v490_v12  ;;  %vm3163_vm5 = vmor %vm732_vm0, %vm733_vm3 }
  0x44   : > { %v2651_v14 = vpop.eup %2650  ;;  %v720_v2 = vsel %vm3143_vm4, %v2643_v43, %v716_v19  ;;  %v730_v38 = vmul.f32 %v2645_v49, %v729_v37  ;;  %v3157_v40 = vadd.f32 1.0, %v2649_v16  ;;  %2656 = vpow2.f32 %v2461_v8  ;;  %vm3173_vm7 = vmor %vm747_vm8, %vm748_vm6 }
  0x45   : > { %v725_v34 = vsel %vm3112_vm14, %v724_v47, %v720_v2  ;;  %v745_v7 = vmul.f32 %v2647_v26, %v744_v13  ;;  %v3167_v50 = vadd.f32 1.0, %v2651_v14  ;;  %2658 = vpow2.f32 %v2462_v23  ;;  %vm4114_vm0 = vmmov %vm4099_vm1 }
  0x46   : > { %v2653_v24 = vpop.eup %2652  ;;  %v928_v31 = vmul.f32 %v725_v34, %v2904_v29  ;;  %v731_v28 = vadd.f32 %v2645_v49, %v730_v38  ;;  %2660 = vrcp.f32 %v3157_v40  ;;  %v3179_v17 = vadd.f32 %v2848_v1, %v513_v62 }
  0x47   : > { %v746_v39 = vadd.f32 %v2647_v26, %v745_v7  ;;  %vm752_vm10 = vcmp.eq.f32.partialorder %v751_v57, 8.507059e+37  ;;  %2662 = vrcp.f32 %v3167_v50  ;;  %v766_v42 = vand.u32 2147483647, %v3157_v40 }
  0x48   : > { %v2655_v36 = vpop.eup %2654  ;;  %949 = vst.msk [vmem:[#allocation2 + $0x49] sm:$0xff] %vm4108_vm9, %v928_v31  ;;  %v735_v29 = vsel %vm3163_vm5, %v2645_v49, %v731_v28  ;;  %v768_v11 = vand.u32 2147483648, %v3157_v40  ;;  %v781_v20 = vand.u32 2147483647, %v3167_v50  ;;  %v783_v51 = vand.u32 2147483648, %v3167_v50 }
  0x49   : > { %v740_v21 = vsel %vm3132_vm2, %v739_v15, %v735_v29  ;;  %v750_v43 = vsel %vm3173_vm7, %v2647_v26, %v746_v39  ;;  %v3195_v3 = vadd.f32 %v2848_v1, %v514_v63  ;;  %v2463_v56 = vmul.f32 -1.442695, %v3179_v17 }
  0x4a   : > { %v2657_v52 = vpop.eup %2656  ;;  %v929_v54 = vmul.f32 %v740_v21, %v2910_v33  ;;  %v755_v55 = vsel %vm752_vm10, %v754_v30, %v750_v43  ;;  %v515_v47 = vmul.f32 %v2836_v0, %v491_v32  ;;  %vm762_vm11 = vweird.f32 %v3157_v40 }
  0x4b   : > { %v2659_v59 = vpop.eup %2658  ;;  %v930_v60 = vmul.f32 %v755_v55, %v2920_v41  ;;  %v3202_v61 = vadd.f32 1.0, %v2653_v24  ;;  %v3204_v22 = vadd.f32 1.0, %v2655_v36  ;;  %vm3207_vm13 = vcmp.eq.f32.partialorder %v766_v42, 8.507059e+37 }
  0x4c   : > { %v2661_v9 = vpop.eup %2660  ;;  %950 = vst.msk [vmem:[#allocation2 + $0x51] sm:$0xff] %vm4109_vm12, %v929_v54  ;;  %v769_v33 = vor.u32 1.1754944e-38, %v768_v11  ;;  %vm777_vm14 = vweird.f32 %v3167_v50  ;;  %vm3212_vm15 = vcmp.eq.f32.partialorder %v781_v20, 8.507059e+37  ;;  %v784_v57 = vor.u32 1.1754944e-38, %v783_v51 }
  0x4d   : > { %v2663_v41 = vpop.eup %2662  ;;  %951 = vst.msk [vmem:[#allocation2 + $0x61] sm:$0xff] %vm4114_vm0, %v930_v60  ;;  %v758_v15 = vmul.f32 %v2661_v9, %v3157_v40  ;;  %2664 = vrcp.f32 %v3202_v61  ;;  %v3219_v25 = vadd.f32 1.0, %v2657_v52  ;;  %v796_v27 = vand.u32 2147483647, %v3202_v61 }
  0x4e   : > { %v773_v26 = vmul.f32 %v2663_v41, %v3167_v50  ;;  %v3223_v58 = vadd.f32 1.0, %v2659_v59  ;;  %2666 = vpow2.f32 %v2463_v56  ;;  %vm763_vm8 = vweird.f32 %v2661_v9 }
  0x4f   : > { %v759_v30 = vsub.f32 1.0, %v758_v15  ;;  %v798_v12 = vand.u32 2147483648, %v3202_v61  ;;  %2668 = vrcp.f32 %v3204_v22  ;;  %vm778_vm1 = vweird.f32 %v2663_v41  ;;  %vm3236_vm2 = vmor %vm762_vm11, %vm763_vm8 }
  0x50   : > { %v774_v4 = vsub.f32 1.0, %v773_v26  ;;  %v811_v35 = vand.u32 2147483647, %v3204_v22  ;;  %v813_v8 = vand.u32 2147483648, %v3204_v22  ;;  %2670 = vrcp.f32 %v3219_v25  ;;  %vm3248_vm5 = vmor %vm777_vm14, %vm778_vm1  ;;  %v493_v26 = vld [vmem:[%s444_s14 + $0x8] sm:$0xff] }
  0x51   : > { %v760_v62 = vmul.f32 %v2661_v9, %v759_v30  ;;  %v2464_v19 = vmul.f32 -1.442695, %v3195_v3  ;;  %v3232_v37 = vadd.f32 %v2848_v1, %v515_v47  ;;  %vm792_vm4 = vweird.f32 %v3202_v61 }
  0x52   : > { %v775_v13 = vmul.f32 %v2663_v41, %v774_v4  ;;  %vm3241_vm3 = vcmp.eq.f32.partialorder %v796_v27, 8.507059e+37  ;;  %vm807_vm6 = vweird.f32 %v3204_v22  ;;  %v799_v38 = vor.u32 1.1754944e-38, %v798_v12 }
  0x53   : > { %v2665_v63 = vpop.eup %2664  ;;  %v761_v14 = vadd.f32 %v2661_v9, %v760_v62  ;;  %vm822_vm7 = vweird.f32 %v3219_v25  ;;  %2672 = vrcp.f32 %v3223_v58  ;;  %vm3255_vm10 = vcmp.eq.f32.partialorder %v811_v35, 8.507059e+37 }
  0x54   : > { %v2667_v40 = vpop.eup %2666  ;;  %v776_v34 = vadd.f32 %v2663_v41, %v775_v13  ;;  %v788_v48 = vmul.f32 %v2665_v63, %v3202_v61  ;;  %v814_v24 = vor.u32 1.1754944e-38, %v813_v8  ;;  %v826_v50 = vand.u32 2147483647, %v3219_v25 }
  0x55   : > { %v2669_v31 = vpop.eup %2668  ;;  %v765_v28 = vsel %vm3236_vm2, %v2661_v9, %v761_v14  ;;  %vm793_vm9 = vweird.f32 %v2665_v63  ;;  %v828_v18 = vand.u32 2147483648, %v3219_v25  ;;  %vm837_vm11 = vweird.f32 %v3223_v58 }
  0x56   : > { %v770_v39 = vsel %vm3207_vm13, %v769_v33, %v765_v28  ;;  %v780_v32 = vsel %vm3248_vm5, %v2663_v41, %v776_v34  ;;  %v789_v36 = vsub.f32 1.0, %v788_v48  ;;  %v803_v29 = vmul.f32 %v2669_v31, %v3204_v22  ;;  %v2671_v42 = vpop.eup %2670  ;;  %vm4123_vm13 = vmmov %vm4114_vm0  ;;  %v492_v22 = vld [vmem:[%s444_s14] sm:$0xff] }
  0x57   : > { %v931_v11 = vmul.f32 %v770_v39, %v2924_v44  ;;  %v785_v20 = vsel %vm3212_vm15, %v784_v57, %v780_v32  ;;  %vm808_vm12 = vweird.f32 %v2669_v31  ;;  %v841_v21 = vand.u32 2147483647, %v3223_v58  ;;  %vm3279_vm14 = vmor %vm792_vm4, %vm793_vm9 }
  0x58   : > { %v932_v43 = vmul.f32 %v785_v20, %v2927_v45  ;;  %v790_v51 = vmul.f32 %v2665_v63, %v789_v36  ;;  %v804_v52 = vsub.f32 1.0, %v803_v29  ;;  %v818_v54 = vmul.f32 %v2671_v42, %v3219_v25  ;;  %vm3296_vm8 = vmor %vm807_vm6, %vm808_vm12 }
  0x59   : > { %v2673_v55 = vpop.eup %2672  ;;  %952 = vst.msk [vmem:[#allocation2 + $0x69] sm:$0xff] %vm4123_vm13, %v931_v11  ;;  %vm823_vm15 = vweird.f32 %v2671_v42  ;;  %v3283_v56 = vadd.f32 1.0, %v2667_v40  ;;  %2674 = vpow2.f32 %v2464_v19  ;;  %v2465_v45 = vmul.f32 -1.442695, %v3232_v37  ;;  %vm4136_vm5 = vmmov %vm4114_vm0 }
  0x5a   : > { %953 = vst.msk [vmem:[#allocation2 + $0x79] sm:$0xff] %vm4114_vm0, %v932_v43  ;;  %v791_v47 = vadd.f32 %v2665_v63, %v790_v51  ;;  %v805_v59 = vmul.f32 %v2669_v31, %v804_v52  ;;  %v819_v60 = vsub.f32 1.0, %v818_v54  ;;  %v833_v61 = vmul.f32 %v2673_v55, %v3223_v58  ;;  %vm3313_vm4 = vmor %vm822_vm7, %vm823_vm15 }
  0x5b   : > { %vm3300_vm1 = vcmp.eq.f32.partialorder %v826_v50, 8.507059e+37  ;;  %vm838_vm2 = vweird.f32 %v2673_v55  ;;  %v843_v33 = vand.u32 2147483648, %v3223_v58  ;;  %2676 = vrcp.f32 %v3283_v56  ;;  %vm4137_vm7 = vmmov %vm4114_vm0 }
  0x5c   : > { %v795_v10 = vsel %vm3279_vm14, %v2665_v63, %v791_v47  ;;  %v806_v41 = vadd.f32 %v2669_v31, %v805_v59  ;;  %v820_v15 = vmul.f32 %v2671_v42, %v819_v60  ;;  %v834_v57 = vsub.f32 1.0, %v833_v61  ;;  %vm4138_vm9 = vmmov %vm4114_vm0 }
  0x5d   : > { %v800_v27 = vsel %vm3241_vm3, %v799_v38, %v795_v10  ;;  %v829_v12 = vor.u32 1.1754944e-38, %v828_v18  ;;  %vm3317_vm6 = vcmp.eq.f32.partialorder %v841_v21, 8.507059e+37  ;;  %2678 = vpow2.f32 %v2465_v45  ;;  %vm3329_vm3 = vmor %vm837_vm11, %vm838_vm2 }
  0x5e   : > { %v933_v35 = vmul.f32 %v800_v27, %v2937_v53  ;;  %v810_v8 = vsel %vm3296_vm8, %v2669_v31, %v806_v41  ;;  %v821_v62 = vadd.f32 %v2671_v42, %v820_v15  ;;  %v835_v19 = vmul.f32 %v2673_v55, %v834_v57  ;;  %vm4139_vm13 = vmmov %vm4114_vm0 }
  0x5f   : > { %v2675_v16 = vpop.eup %2674  ;;  %v815_v25 = vsel %vm3255_vm10, %v814_v24, %v810_v8  ;;  %v844_v23 = vor.u32 1.1754944e-38, %v843_v33  ;;  %v516_v63 = vmul.f32 %v2836_v0, %v492_v22  ;;  %v517_v53 = vmul.f32 %v2836_v0, %v493_v26 }
  0x60   : > { %954 = vst.msk [vmem:[#allocation2 + $0x81] sm:$0xff] %vm4136_vm5, %v933_v35  ;;  %v934_v14 = vmul.f32 %v815_v25, %v3101_v46  ;;  %v825_v2 = vsel %vm3313_vm4, %v2671_v42, %v821_v62  ;;  %v836_v38 = vadd.f32 %v2673_v55, %v835_v19  ;;  %v3339_v40 = vadd.f32 1.0, %v2675_v16 }
  0x61   : > { %v2677_v58 = vpop.eup %2676  ;;  %v830_v34 = vsel %vm3300_vm1, %v829_v12, %v825_v2  ;;  %v3344_v48 = vadd.f32 %v2848_v1, %v516_v63  ;;  %v3347_v7 = vadd.f32 %v2848_v1, %v517_v53  ;;  %vm852_vm10 = vweird.f32 %v3283_v56  ;;  %vm4140_vm1 = vmmov %vm4136_vm5 }
  0x62   : > { %955 = vst.msk [vmem:[#allocation2 + $0x91] sm:$0xff] %vm4137_vm7, %v934_v14  ;;  %v935_v0 = vmul.f32 %v830_v34, %v3129_v6  ;;  %v840_v46 = vsel %vm3329_vm3, %v2673_v55, %v836_v38  ;;  %v848_v24 = vmul.f32 %v2677_v58, %v3283_v56  ;;  %v856_v28 = vand.u32 2147483647, %v3283_v56 }
  0x63   : > { %v2679_v50 = vpop.eup %2678  ;;  %v845_v31 = vsel %vm3317_vm6, %v844_v23, %v840_v46  ;;  %v858_v1 = vand.u32 2147483648, %v3283_v56  ;;  %2680 = vrcp.f32 %v3339_v40  ;;  %vm853_vm11 = vweird.f32 %v2677_v58 }
  0x64   : > { %956 = vst.msk [vmem:[#allocation2 + $0x99] sm:$0xff] %vm4138_vm9, %v935_v0  ;;  %v936_v6 = vmul.f32 %v845_v31, %v3150_v5  ;;  %v849_v18 = vsub.f32 1.0, %v848_v24  ;;  %v619_v39 = vadd.f32 1.0, %v2679_v50  ;;  %v2466_v32 = vmul.f32 -1.442695, %v3344_v48  ;;  %vm854_vm14 = vmor %vm852_vm10, %vm853_vm11 }
  0x65   : > { %v2467_v36 = vmul.f32 -1.442695, %v3347_v7  ;;  %vm963_vm12 = vcmask 57344   ;;  %v859_v42 = vor.u32 1.1754944e-38, %v858_v1  ;;  %vm857_vm15 = vcmp.eq.f32.partialorder %v856_v28, 8.507059e+37  ;;  %vm4143_vm10 = vmmov %vm4140_vm1 }
  0x66   : > { %957 = vst.msk [vmem:[#allocation2 + $0xa9] sm:$0xff] %vm4139_vm13, %v936_v6  ;;  %v850_v29 = vmul.f32 %v2677_v58, %v849_v18  ;;  %2682 = vrcp.f32 %v619_v39  ;;  %v2733_v5 = vmov 0.0   ;;  %v873_v21 = vand.u32 2147483648, %v3339_v40  ;;  %vm4144_vm11 = vmmov %vm4140_vm1 }
  0x67   : > { %2684 = vpow2.f32 %v2466_v32  ;;  %964 = vst.msk [vmem:[#allocation2] sm:$0x1] %vm963_vm12, %v2733_v5  ;;  %vm867_vm0 = vweird.f32 %v3339_v40  ;;  %v871_v56 = vand.u32 2147483647, %v3339_v40  ;;  %vm882_vm2 = vweird.f32 %v619_v39 }
  0x68   : > { %v851_v11 = vadd.f32 %v2677_v58, %v850_v29  ;;  %2686 = vpow2.f32 %v2467_v36  ;;  %965 = vst.msk [vmem:[#allocation2 + $0x18] sm:$0x1] %vm963_vm12, %v2733_v5  ;;  %v874_v47 = vor.u32 1.1754944e-38, %v873_v21  ;;  %v888_v9 = vand.u32 2147483648, %v619_v39 }
  0x69   : > { %v2681_v20 = vpop.eup %2680  ;;  %966 = vst.msk [vmem:[#allocation2 + $0x30] sm:$0x1] %vm963_vm12, %v2733_v5  ;;  %v886_v10 = vand.u32 2147483647, %v619_v39  ;;  %vm872_vm3 = vcmp.eq.f32.partialorder %v871_v56, 8.507059e+37 }
  0x6a   : > { %v855_v43 = vsel %vm854_vm14, %v2677_v58, %v851_v11  ;;  %v863_v51 = vmul.f32 %v2681_v20, %v3339_v40  ;;  %967 = vst.msk [vmem:[#allocation2 + $0x48] sm:$0x1] %vm963_vm12, %v2733_v5  ;;  %vm868_vm8 = vweird.f32 %v2681_v20  ;;  %v889_v26 = vor.u32 1.1754944e-38, %v888_v9 }
  0x6b   : > { %v860_v52 = vsel %vm857_vm15, %v859_v42, %v855_v43  ;;  %968 = vst.msk [vmem:[#allocation2 + $0x60] sm:$0x1] %vm963_vm12, %v2733_v5  ;;  %vm3387_vm4 = vmor %vm867_vm0, %vm868_vm8  ;;  %vm887_vm7 = vcmp.eq.f32.partialorder %v886_v10, 8.507059e+37 }
  0x6c   : > { %v2683_v54 = vpop.eup %2682  ;;  %v937_v55 = vmul.f32 %v860_v52, %v3179_v17  ;;  %v864_v44 = vsub.f32 1.0, %v863_v51  ;;  %969 = vst.msk [vmem:[#allocation2 + $0x78] sm:$0x1] %vm963_vm12, %v2733_v5 }
  0x6d   : > { %v2685_v45 = vpop.eup %2684  ;;  %v878_v59 = vmul.f32 %v2683_v54, %v619_v39  ;;  %vm883_vm6 = vweird.f32 %v2683_v54  ;;  %970 = vst.msk [vmem:[#allocation2 + $0x90] sm:$0x1] %vm963_vm12, %v2733_v5 }
  0x6e   : > { %v2687_v60 = vpop.eup %2686  ;;  %958 = vst.msk [vmem:[#allocation2 + $0xb1] sm:$0xff] %vm4140_vm1, %v937_v55  ;;  %v865_v61 = vmul.f32 %v2681_v20, %v864_v44  ;;  %v620_v17 = vadd.f32 1.0, %v2685_v45  ;;  %vm884_vm5 = vmor %vm882_vm2, %vm883_vm6 }
  0x6f   : > { %v879_v33 = vsub.f32 1.0, %v878_v59  ;;  %v621_v41 = vadd.f32 1.0, %v2687_v60  ;;  %971 = vst.msk [vmem:[#allocation2 + $0xa8] sm:$0x1] %vm963_vm12, %v2733_v5 }
  0x70   : > { %v866_v15 = vadd.f32 %v2681_v20, %v865_v61  ;;  %2688 = vrcp.f32 %v620_v17  ;;  %972 = vst.msk [vmem:[#allocation2 + $0xc0] sm:$0x1] %vm963_vm12, %v2733_v5  ;;  %vm897_vm9 = vweird.f32 %v620_v17  ;;  %v901_v23 = vand.u32 2147483647, %v620_v17 }
  0x71   : > { %v880_v57 = vmul.f32 %v2683_v54, %v879_v33  ;;  %2690 = vrcp.f32 %v621_v41  ;;  %973 = vst.msk [vmem:[#allocation2 + $0xd8] sm:$0x1] %vm963_vm12, %v2733_v5  ;;  %v918_v63 = vand.u32 2147483648, %v621_v41  ;;  %vm912_vm14 = vweird.f32 %v621_v41 }
  0x72   : > { %v870_v22 = vsel %vm3387_vm4, %v2681_v20, %v866_v15  ;;  %974 = vst.msk [vmem:[#allocation2 + $0x11] sm:$0x1] %vm963_vm12, %v2733_v5  ;;  %vm902_vm8 = vcmp.eq.f32.partialorder %v901_v23, 8.507059e+37  ;;  %vm4145_vm4 = vmmov %vm4143_vm10 }
  0x73   : > { %v875_v27 = vsel %vm872_vm3, %v874_v47, %v870_v22  ;;  %v881_v30 = vadd.f32 %v2683_v54, %v880_v57  ;;  %975 = vst.msk [vmem:[#allocation2 + $0x29] sm:$0x1] %vm963_vm12, %v2733_v5  ;;  %v919_v58 = vor.u32 1.1754944e-38, %v918_v63  ;;  %vm4146_vm6 = vmmov %vm4145_vm4 }
  0x74   : > { %v938_v12 = vmul.f32 %v875_v27, %v3195_v3  ;;  %976 = vst.msk [vmem:[#allocation2 + $0x41] sm:$0x1] %vm963_vm12, %v2733_v5  ;;  %v903_v3 = vand.u32 2147483648, %v620_v17 }
  0x75   : > { %v885_v4 = vsel %vm884_vm5, %v2683_v54, %v881_v30  ;;  %977 = vst.msk [vmem:[#allocation2 + $0x59] sm:$0x1] %vm963_vm12, %v2733_v5 }
  0x76   : > { %v2689_v35 = vpop.eup %2688  ;;  %959 = vst.msk [vmem:[#allocation2 + $0xc1] sm:$0xff] %vm4143_vm10, %v938_v12  ;;  %v890_v8 = vsel %vm887_vm7, %v889_v26, %v885_v4  ;;  %v904_v2 = vor.u32 1.1754944e-38, %v903_v3 }
  0x77   : > { %v2691_v62 = vpop.eup %2690  ;;  %v939_v19 = vmul.f32 %v890_v8, %v3232_v37  ;;  %v893_v16 = vmul.f32 %v2689_v35, %v620_v17  ;;  %978 = vst.msk [vmem:[#allocation2 + $0x71] sm:$0x1] %vm963_vm12, %v2733_v5  ;;  %vm898_vm13 = vweird.f32 %v2689_v35  ;;  %v916_v37 = vand.u32 2147483647, %v621_v41 }
  0x78   : > { %v908_v25 = vmul.f32 %v2691_v62, %v621_v41  ;;  %vm913_vm15 = vweird.f32 %v2691_v62  ;;  %979 = vst.msk [vmem:[#allocation2 + $0x89] sm:$0x1] %vm963_vm12, %v2733_v5  ;;  %vm899_vm0 = vmor %vm897_vm9, %vm898_vm13 }
  0x79   : > { %960 = vst.msk [vmem:[#allocation2 + $0xc9] sm:$0xff] %vm4144_vm11, %v939_v19  ;;  %v894_v13 = vsub.f32 1.0, %v893_v16  ;;  %vm914_vm1 = vmor %vm912_vm14, %vm913_vm15  ;;  %vm917_vm2 = vcmp.eq.f32.partialorder %v916_v37, 8.507059e+37 }
  0x7a   : > { %v909_v53 = vsub.f32 1.0, %v908_v25  ;;  %980 = vst.msk [vmem:[#allocation2 + $0xa1] sm:$0x1] %vm963_vm12, %v2733_v5 }
  0x7b   : > { %v895_v14 = vmul.f32 %v2689_v35, %v894_v13  ;;  %981 = vst.msk [vmem:[#allocation2 + $0xb9] sm:$0x1] %vm963_vm12, %v2733_v5 }
  0x7c   : > { %v910_v38 = vmul.f32 %v2691_v62, %v909_v53  ;;  %982 = vst.msk [vmem:[#allocation2 + $0xd1] sm:$0x1] %vm963_vm12, %v2733_v5 }
  0x7d   : > { %v896_v40 = vadd.f32 %v2689_v35, %v895_v14  ;;  %983 = vst.msk [vmem:[#allocation2 + $0xe9] sm:$0x1] %vm963_vm12, %v2733_v5 }
  0x7e   : > { %v911_v34 = vadd.f32 %v2691_v62, %v910_v38 }
  0x7f   : > { %v900_v0 = vsel %vm899_vm0, %v2689_v35, %v896_v40 }
  0x80   : > { %v905_v46 = vsel %vm902_vm8, %v904_v2, %v900_v0  ;;  %v915_v24 = vsel %vm914_vm1, %v2691_v62, %v911_v34  ;;  %987 = sbr.rel (%p2468_p7) target bundleno = 137 (0x89), region = 52 }
  0x81   : > { %v940_v50 = vmul.f32 %v905_v46, %v3344_v48  ;;  %v920_v31 = vsel %vm917_vm2, %v919_v58, %v915_v24 }
  0x82   : > { %v941_v28 = vmul.f32 %v920_v31, %v3347_v7 }
  0x83   : > { %961 = vst.msk [vmem:[#allocation2 + $0xd9] sm:$0xff] %vm4145_vm4, %v940_v50 }
  0x84   : > { %962 = vst.msk [vmem:[#allocation2 + $0xe1] sm:$0xff] %vm4146_vm6, %v941_v28 }
  0x85   : > { %vm990_vm3 = vcmask 58368   ;;  %v2734_v1 = vmov 0.0   ;;  %vm4147_vm5 = vcmask 64512  }
  0x86   : > { %988 = vst.msk [vmem:[#allocation2] sm:$0xff] %vm4147_vm5, %v2734_v1  ;;  %vm4148_vm12 = vmmov %vm4147_vm5 }
  0x87   : > { %989 = vst.msk [vmem:[#allocation2 + $0x8] sm:$0xff] %vm4148_vm12, %v2734_v1 }
  0x88   : > { %991 = vst.msk [vmem:[#allocation2 + $0x10] sm:$0x3] %vm990_vm3, %v2734_v1 }
  0x89 PF: > { %p2469_p8 = scmp.ne.s32.totalorder %s2715_s27, 1 }
  0x8b   : > { %995 = sbr.rel (%p2469_p8) target bundleno = 148 (0x94), region = 56 }
  0x90   : > { %vm999_vm7 = vcmask 58368   ;;  %v2735_v48 = vmov 0.0   ;;  %vm4149_vm10 = vcmask 64512  }
  0x91   : > { %997 = vst.msk [vmem:[#allocation2 + $0xd8] sm:$0xff] %vm4149_vm10, %v2735_v48  ;;  %vm4150_vm9 = vmmov %vm4149_vm10 }
  0x92   : > { %998 = vst.msk [vmem:[#allocation2 + $0xe0] sm:$0xff] %vm4150_vm9, %v2735_v48 }
  0x93   : > { %1000 = vst.msk [vmem:[#allocation2 + $0xe8] sm:$0x3] %vm999_vm7, %v2735_v48 }
  0x94 PF: > { %v1052_v7 = vld [vmem:[#allocation2 + $0x19] sm:$0xff]  ;;  %v1050_v6 = vld [vmem:[#allocation2 + $0x1] sm:$0xff]  ;;  %v1054_v32 = vld [vmem:[#allocation2 + $0x31] sm:$0xff]  ;;  %s2736_s13 = smov 8   ;;  %s2737_s27 = smov 16   ;;  %vm1033_vm11 = vcmask 60416  }
  0x95   : > { %v3437_v18 = vpack.c.bf16 %v1052_v7, %v1052_v7  ;;  %v1066_v39 = vpack.c.bf16 %v1050_v6, %v1050_v6  ;;  %v3442_v36 = vpack.c.bf16 %v1054_v32, %v1054_v32  ;;  %v1053_v29 = vld [vmem:[#allocation2 + $0x21] sm:$0xff]  ;;  %v1051_v42 = vld [vmem:[#allocation2 + $0x9] sm:$0xff]  ;;  %v1055_v11 = vld [vmem:[#allocation2 + $0x39] sm:$0xff]  ;;  %s2738_s21 = smov 24   ;;  %vm1146_vm13 = vcmask 126016   ;;  %s2739_s15 = smov 32  }
  0x96   : > { %v3446_v5 = vpack.c.bf16 %v1053_v29, %v1053_v29  ;;  %v1067_v20 = vpack.c.bf16 %v1051_v42, %v1051_v42  ;;  %v3448_v21 = vpack.c.bf16 %v1055_v11, %v1055_v11  ;;  %v1057_v43 = vld [vmem:[#allocation2 + $0x51] sm:$0xff]  ;;  %v1056_v51 = vld [vmem:[#allocation2 + $0x49] sm:$0xff]  ;;  %v1058_v52 = vld [vmem:[#allocation2 + $0x61] sm:$0xff]  ;;  %s2740_s17 = smov 40   ;;  %s2741_s18 = smov 48   ;;  %vm1259_vm14 = vcmask 191616  }
  0x97   : > { %1102 = vrot.lane.b32.xlu1 %v3437_v18, %s2736_s13  ;;  %1098 = vrot.lane.b32.xlu0 %v1066_v39, %s2736_s13  ;;  %v3455_v54 = vpack.c.bf16 %v1057_v43, %v1057_v43  ;;  %v3457_v55 = vpack.c.bf16 %v1056_v51, %v1056_v51  ;;  %v3459_v44 = vpack.c.bf16 %v1058_v52, %v1058_v52  ;;  %v1060_v56 = vld [vmem:[#allocation2 + $0x79] sm:$0xff]  ;;  %v1059_v45 = vld [vmem:[#allocation2 + $0x69] sm:$0xff]  ;;  %v1061_v47 = vld [vmem:[#allocation2 + $0x81] sm:$0xff]  ;;  %s2742_s20 = smov 56   ;;  %s2743_s23 = smov 64   ;;  %vm1373_vm15 = vcmask 257216  }
  0x98   : > { %1106 = vrot.lane.b32.xlu2 %v3442_v36, %s2736_s13  ;;  %v3467_v59 = vpack.c.bf16 %v1060_v56, %v1060_v56  ;;  %v3469_v60 = vpack.c.bf16 %v1059_v45, %v1059_v45  ;;  %v3471_v61 = vpack.c.bf16 %v1061_v47, %v1061_v47  ;;  %v1063_v9 = vld [vmem:[#allocation2 + $0x99] sm:$0xff]  ;;  %v1062_v17 = vld [vmem:[#allocation2 + $0x91] sm:$0xff]  ;;  %v1064_v49 = vld [vmem:[#allocation2 + $0xa9] sm:$0xff]  ;;  %vm1486_vm0 = vcmask 322816  }
  0x99   : > { %v3479_v33 = vpack.c.bf16 %v1063_v9, %v1063_v9  ;;  %v3481_v10 = vpack.c.bf16 %v1062_v17, %v1062_v17  ;;  %v3483_v41 = vpack.c.bf16 %v1064_v49, %v1064_v49  ;;  %v1163_v15 = vld [vmem:[#allocation2 + $0x2] sm:$0xff]  ;;  %v1065_v57 = vld [vmem:[#allocation2 + $0xb1] sm:$0xff]  ;;  %v1165_v4 = vld [vmem:[#allocation2 + $0x1a] sm:$0xff]  ;;  %vm2077_vm8 = vcmask 1043456  }
  0x9a   : > { %v1164_v22 = vld [vmem:[#allocation2 + $0xa] sm:$0xff]  ;;  %v1179_v26 = vpack.c.bf16 %v1163_v15, %v1163_v15  ;;  %v3491_v27 = vpack.c.bf16 %v1065_v57, %v1065_v57  ;;  %v1166_v12 = vld [vmem:[#allocation2 + $0x22] sm:$0xff]  ;;  %v1167_v35 = vld [vmem:[#allocation2 + $0x32] sm:$0xff]  ;;  %v3499_v62 = vpack.c.bf16 %v1165_v4, %v1165_v4  ;;  %vm1599_vm1 = vcmask 388416  }
  0x9b   : > { %v1180_v30 = vpack.c.bf16 %v1164_v22, %v1164_v22  ;;  %v3497_v8 = vpack.c.bf16 %v1166_v12, %v1166_v12  ;;  %v3501_v19 = vpack.c.bf16 %v1167_v35, %v1167_v35  ;;  %v1169_v16 = vld [vmem:[#allocation2 + $0x4a] sm:$0xff]  ;;  %v1168_v3 = vld [vmem:[#allocation2 + $0x3a] sm:$0xff]  ;;  %v1170_v25 = vld [vmem:[#allocation2 + $0x52] sm:$0xff]  ;;  %vm1713_vm2 = vcmask 454016  }
  0x9c   : > { %v3509_v13 = vpack.c.bf16 %v1169_v16, %v1169_v16  ;;  %v3511_v23 = vpack.c.bf16 %v1168_v3, %v1168_v3  ;;  %v3513_v63 = vpack.c.bf16 %v1170_v25, %v1170_v25  ;;  %v1172_v53 = vld [vmem:[#allocation2 + $0x6a] sm:$0xff]  ;;  %v1171_v37 = vld [vmem:[#allocation2 + $0x62] sm:$0xff]  ;;  %v1173_v14 = vld [vmem:[#allocation2 + $0x7a] sm:$0xff]  ;;  %vm1826_vm4 = vcmask 519616  }
  0x9d   : > { %v3521_v2 = vpack.c.bf16 %v1172_v53, %v1172_v53  ;;  %v3523_v38 = vpack.c.bf16 %v1171_v37, %v1171_v37  ;;  %v3525_v40 = vpack.c.bf16 %v1173_v14, %v1173_v14  ;;  %v1175_v58 = vld [vmem:[#allocation2 + $0x92] sm:$0xff]  ;;  %v1174_v34 = vld [vmem:[#allocation2 + $0x82] sm:$0xff]  ;;  %v1176_v0 = vld [vmem:[#allocation2 + $0x9a] sm:$0xff]  ;;  %vm1939_vm6 = vcmask 585216  }
  0x9e   : > { %v3533_v46 = vpack.c.bf16 %v1175_v58, %v1175_v58  ;;  %v3535_v24 = vpack.c.bf16 %v1174_v34, %v1174_v34  ;;  %v3537_v50 = vpack.c.bf16 %v1176_v0, %v1176_v0  ;;  %v1178_v31 = vld [vmem:[#allocation2 + $0xb2] sm:$0xff]  ;;  %v1177_v28 = vld [vmem:[#allocation2 + $0xaa] sm:$0xff]  ;;  %v1001_v42 = vld [vmem:[#allocation2] sm:$0xff]  ;;  %vm2052_vm3 = vcmask 588800  }
  0x9f   : > { %1104 = vrot.lane.b32.xlu1 %v3446_v5, %s2736_s13  ;;  %1100 = vrot.lane.b32.xlu0 %v1067_v20, %s2736_s13  ;;  %v1277_v1 = vld [vmem:[#allocation2 + $0x18] sm:$0xff]  ;;  %v3545_v48 = vpack.c.bf16 %v1178_v31, %v1178_v31  ;;  %v3547_v7 = vpack.c.bf16 %v1177_v28, %v1177_v28  ;;  %v1279_v6 = vld [vmem:[#allocation2 + $0x30] sm:$0xff]  ;;  %v1278_v11 = vld [vmem:[#allocation2 + $0x20] sm:$0xff]  ;;  %v1017_v20 = vpack.c.bf16 %v1001_v42, %v1001_v42  ;;  %vm2241_vm5 = vcmask 125952  }
  0xa0   : > { %1108 = vrot.lane.b32.xlu2 %v3448_v21, %s2736_s13  ;;  %v1293_v39 = vpack.c.bf16 %v1277_v1, %v1277_v1  ;;  %v3549_v32 = vpack.c.bf16 %v1279_v6, %v1279_v6  ;;  %v1280_v29 = vld [vmem:[#allocation2 + $0x38] sm:$0xff]  ;;  %v1282_v43 = vld [vmem:[#allocation2 + $0x50] sm:$0xff]  ;;  %v1294_v52 = vpack.c.bf16 %v1278_v11, %v1278_v11  ;;  %v1281_v56 = vld [vmem:[#allocation2 + $0x48] sm:$0xff]  ;;  %vm2130_vm12 = vcmask 130048  }
  0xa1   : > { %v3558_v51 = vpack.c.bf16 %v1280_v29, %v1280_v29  ;;  %1034 = vst.msk [vmem:[#allocation3] sm:$0xf] %vm1033_vm11, %v1017_v20  ;;  %v3562_v45 = vpack.c.bf16 %v1282_v43, %v1282_v43  ;;  %v1285_v47 = vld [vmem:[#allocation2 + $0x78] sm:$0xff]  ;;  %v1283_v9 = vld [vmem:[#allocation2 + $0x60] sm:$0xff]  ;;  %v1284_v17 = vld [vmem:[#allocation2 + $0x68] sm:$0xff]  ;;  %v3569_v15 = vpack.c.bf16 %v1281_v56, %v1281_v56  ;;  %vm2221_vm7 = vcmask 1040384  }
  0xa2   : > { %1038 = vst.msk [vmem:[#allocation3 + $0x10] sm:$0xf] %vm1033_vm11, %v3549_v32  ;;  %v3566_v49 = vpack.c.bf16 %v1283_v9, %v1283_v9  ;;  %v3573_v57 = vpack.c.bf16 %v1285_v47, %v1285_v47  ;;  %v1288_v22 = vld [vmem:[#allocation2 + $0x98] sm:$0xff]  ;;  %v1287_v12 = vld [vmem:[#allocation2 + $0x90] sm:$0xff]  ;;  %v1286_v53 = vld [vmem:[#allocation2 + $0x80] sm:$0xff]  ;;  %vm2223_vm10 = vcmask 123904  }
  0xa3   : > { %1036 = vst.msk [vmem:[#allocation3 + $0x8] sm:$0xf] %vm1033_vm11, %v1293_v39  ;;  %v3588_v35 = vpack.c.bf16 %v1288_v22, %v1288_v22  ;;  %v1290_v16 = vld [vmem:[#allocation2 + $0xb0] sm:$0xff]  ;;  %v3593_v3 = vpack.c.bf16 %v1287_v12, %v1287_v12  ;;  %v3598_v37 = vpack.c.bf16 %v1286_v53, %v1286_v53  ;;  %v1289_v34 = vld [vmem:[#allocation2 + $0xa8] sm:$0xff] }
  0xa4   : > { %1039 = vst.msk [vmem:[#allocation3 + $0x14] sm:$0xf] %vm1033_vm11, %v3558_v51  ;;  %v3600_v14 = vpack.c.bf16 %v1290_v16, %v1290_v16  ;;  %v3615_v0 = vpack.c.bf16 %v1289_v34, %v1289_v34 }
  0xa5   : > { %1037 = vst.msk [vmem:[#allocation3 + $0xc] sm:$0xf] %vm1033_vm11, %v1294_v52 }
  0xa6   : > { %1041 = vst.msk [vmem:[#allocation3 + $0x1c] sm:$0xf] %vm1033_vm11, %v3562_v45 }
  0xa7   : > { %1112 = vrot.lane.b32.xlu1 %v3455_v54, %s2736_s13  ;;  %1110 = vrot.lane.b32.xlu0 %v3457_v55, %s2736_s13  ;;  %1042 = vst.msk [vmem:[#allocation3 + $0x20] sm:$0xf] %vm1033_vm11, %v3566_v49 }
  0xa8   : > { %1114 = vrot.lane.b32.xlu2 %v3459_v44, %s2736_s13  ;;  %1040 = vst.msk [vmem:[#allocation3 + $0x18] sm:$0xf] %vm1033_vm11, %v3569_v15 }
  0xa9   : > { %1044 = vst.msk [vmem:[#allocation3 + $0x28] sm:$0xf] %vm1033_vm11, %v3573_v57 }
  0xaa   : > { %1047 = vst.msk [vmem:[#allocation3 + $0x34] sm:$0xf] %vm1033_vm11, %v3588_v35 }
  0xab   : > { %1046 = vst.msk [vmem:[#allocation3 + $0x30] sm:$0xf] %vm1033_vm11, %v3593_v3 }
  0xac   : > { %1045 = vst.msk [vmem:[#allocation3 + $0x2c] sm:$0xf] %vm1033_vm11, %v3598_v37 }
  0xad   : > { %1049 = vst.msk [vmem:[#allocation3 + $0x3c] sm:$0xf] %vm1033_vm11, %v3600_v14 }
  0xae   : > { %1048 = vst.msk [vmem:[#allocation3 + $0x38] sm:$0xf] %vm1033_vm11, %v3615_v0 }
  0xaf   : > { %1118 = vrot.lane.b32.xlu1 %v3467_v59, %s2736_s13  ;;  %1116 = vrot.lane.b32.xlu0 %v3469_v60, %s2736_s13 }
  0xb0   : > { %1120 = vrot.lane.b32.xlu2 %v3471_v61, %s2736_s13 }
  0xb7   : > { %1124 = vrot.lane.b32.xlu1 %v3479_v33, %s2736_s13  ;;  %1122 = vrot.lane.b32.xlu0 %v3481_v10, %s2736_s13 }
  0xb8   : > { %1126 = vrot.lane.b32.xlu2 %v3483_v41, %s2736_s13 }
  0xbf   : > { %1211 = vrot.lane.b32.xlu1 %v1179_v26, %s2737_s27  ;;  %1128 = vrot.lane.b32.xlu0 %v3491_v27, %s2736_s13  ;;  %v3580_v26 = vpack.c.bf16 %v1284_v17, %v1284_v17 }
  0xc0   : > { %1213 = vrot.lane.b32.xlu2 %v1180_v30, %s2737_s27  ;;  %v1002_v30 = vld [vmem:[#allocation2 + $0x8] sm:$0xff] }
  0xc1   : > { %v1018_v4 = vpack.c.bf16 %v1002_v30, %v1002_v30  ;;  %1043 = vst.msk [vmem:[#allocation3 + $0x24] sm:$0xf] %vm1033_vm11, %v3580_v26 }
  0xc3   : > { %1035 = vst.msk [vmem:[#allocation3 + $0x4] sm:$0xf] %vm1033_vm11, %v1018_v4 }
  0xc7   : > { %1217 = vrot.lane.b32.xlu1 %v3497_v8, %s2737_s27  ;;  %1215 = vrot.lane.b32.xlu0 %v3499_v62, %s2737_s27 }
  0xc8   : > { %1219 = vrot.lane.b32.xlu2 %v3501_v19, %s2737_s27 }
  0xcf   : > { %1223 = vrot.lane.b32.xlu1 %v3509_v13, %s2737_s27  ;;  %1221 = vrot.lane.b32.xlu0 %v3511_v23, %s2737_s27 }
  0xd0   : > { %1225 = vrot.lane.b32.xlu2 %v3513_v63, %s2737_s27 }
  0xd7   : > { %1229 = vrot.lane.b32.xlu1 %v3521_v2, %s2737_s27  ;;  %1227 = vrot.lane.b32.xlu0 %v3523_v38, %s2737_s27 }
  0xd8   : > { %1231 = vrot.lane.b32.xlu2 %v3525_v40, %s2737_s27 }
  0xdf   : > { %1235 = vrot.lane.b32.xlu1 %v3533_v46, %s2737_s27  ;;  %1233 = vrot.lane.b32.xlu0 %v3535_v24, %s2737_s27 }
  0xe0   : > { %1237 = vrot.lane.b32.xlu2 %v3537_v50, %s2737_s27 }
  0xe7   : > { %1241 = vrot.lane.b32.xlu1 %v3545_v48, %s2737_s27  ;;  %1239 = vrot.lane.b32.xlu0 %v3547_v7, %s2737_s27 }
  0xe8   : > { %1325 = vrot.lane.b32.xlu2 %v1293_v39, %s2738_s21 }
  0xef   : > { %1329 = vrot.lane.b32.xlu1 %v3549_v32, %s2738_s21  ;;  %1327 = vrot.lane.b32.xlu0 %v1294_v52, %s2738_s21 }
  0xf0   : > { %1331 = vrot.lane.b32.xlu2 %v3558_v51, %s2738_s21 }
  0xf2   : > { %v1107_v25 = vpop.permute.xlu2 %1106 }
  0xf3   : > { %1151 = vst.msk [vmem:[#allocation3 + $0x10] sm:$0xf] %vm1146_vm13, %v1107_v25 }
  0xf7   : > { %1335 = vrot.lane.b32.xlu1 %v3562_v45, %s2738_s21  ;;  %1333 = vrot.lane.b32.xlu0 %v3569_v15, %s2738_s21 }
  0xf8   : > { %1337 = vrot.lane.b32.xlu2 %v3566_v49, %s2738_s21 }
  0xfa   : > { %v1109_v58 = vpop.permute.xlu2 %1108 }
  0xfb   : > { %1152 = vst.msk [vmem:[#allocation3 + $0x14] sm:$0xf] %vm1146_vm13, %v1109_v58 }
  0xff   : > { %1341 = vrot.lane.b32.xlu1 %v3573_v57, %s2738_s21  ;;  %1339 = vrot.lane.b32.xlu0 %v3580_v26, %s2738_s21 }
 0x100   : > { %1343 = vrot.lane.b32.xlu2 %v3598_v37, %s2738_s21 }
 0x102   : > { %v1115_v31 = vpop.permute.xlu2 %1114 }
 0x103   : > { %1155 = vst.msk [vmem:[#allocation3 + $0x20] sm:$0xf] %vm1146_vm13, %v1115_v31 }
 0x107   : > { %1347 = vrot.lane.b32.xlu1 %v3588_v35, %s2738_s21  ;;  %1345 = vrot.lane.b32.xlu0 %v3593_v3, %s2738_s21 }
 0x108   : > { %1349 = vrot.lane.b32.xlu2 %v3615_v0, %s2738_s21 }
 0x109   : > { %v1103_v28 = vpop.permute.xlu1 %1102  ;;  %v1099_v1 = vpop.permute.xlu0 %1098 }
 0x10a   : > { %1149 = vst.msk [vmem:[#allocation3 + $0x8] sm:$0xf] %vm1146_vm13, %v1103_v28  ;;  %v1121_v6 = vpop.permute.xlu2 %1120  ;;  %v1980_v28 = vld [vmem:[%s4063_s5 + $0x20] sm:$0xf] }
 0x10b   : > { %1147 = vst.msk [vmem:[#allocation3] sm:$0xf] %vm1146_vm13, %v1099_v1 }
 0x10c   : > { %1158 = vst.msk [vmem:[#allocation3 + $0x2c] sm:$0xf] %vm1146_vm13, %v1121_v6 }
 0x10f   : > { %1438 = vrot.lane.b32.xlu1 %v3437_v18, %s2739_s15  ;;  %1351 = vrot.lane.b32.xlu0 %v3600_v14, %s2738_s21 }
 0x110   : > { %1440 = vrot.lane.b32.xlu2 %v3446_v5, %s2739_s15 }
 0x111   : > { %v1105_v39 = vpop.permute.xlu1 %1104  ;;  %v1101_v29 = vpop.permute.xlu0 %1100 }
 0x112   : > { %1150 = vst.msk [vmem:[#allocation3 + $0xc] sm:$0xf] %vm1146_vm13, %v1105_v39  ;;  %v1127_v42 = vpop.permute.xlu2 %1126 }
 0x113   : > { %1148 = vst.msk [vmem:[#allocation3 + $0x4] sm:$0xf] %vm1146_vm13, %v1101_v29 }
 0x114   : > { %1161 = vst.msk [vmem:[#allocation3 + $0x38] sm:$0xf] %vm1146_vm13, %v1127_v42 }
 0x117   : > { %1553 = vrot.lane.b32.xlu1 %v3497_v8, %s2740_s17  ;;  %1551 = vrot.lane.b32.xlu0 %v3499_v62, %s2740_s17 }
 0x118   : > { %1665 = vrot.lane.b32.xlu2 %v3549_v32, %s2741_s18 }
 0x119   : > { %v1113_v18 = vpop.permute.xlu1 %1112  ;;  %v1111_v11 = vpop.permute.xlu0 %1110 }
 0x11a   : > { %1154 = vst.msk [vmem:[#allocation3 + $0x1c] sm:$0xf] %vm1146_vm13, %v1113_v18  ;;  %v1214_v5 = vpop.permute.xlu2 %1213 }
 0x11b   : > { %1153 = vst.msk [vmem:[#allocation3 + $0x18] sm:$0xf] %vm1146_vm13, %v1111_v11  ;;  %v1630_v11 = vld [vmem:[#allocation2 + $0xc8] sm:$0xff] }
 0x11c   : > { %1261 = vst.msk [vmem:[#allocation3 + $0x4] sm:$0xf] %vm1259_vm14, %v1214_v5 }
 0x11f   : > { %1778 = vrot.lane.b32.xlu1 %v3442_v36, %s2742_s20  ;;  %1667 = vrot.lane.b32.xlu0 %v3558_v51, %s2741_s18 }
 0x120   : > { %1780 = vrot.lane.b32.xlu2 %v3448_v21, %s2742_s20 }
 0x121   : > { %v1119_v8 = vpop.permute.xlu1 %1118  ;;  %v1117_v62 = vpop.permute.xlu0 %1116 }
 0x122   : > { %1157 = vst.msk [vmem:[#allocation3 + $0x28] sm:$0xf] %vm1146_vm13, %v1119_v8  ;;  %v1220_v32 = vpop.permute.xlu2 %1219 }
 0x123   : > { %1156 = vst.msk [vmem:[#allocation3 + $0x24] sm:$0xf] %vm1146_vm13, %v1117_v62  ;;  %v2541_v62 = vld [vmem:[%s4063_s5 + $0x8] sm:$0xff] }
 0x124   : > { %1264 = vst.msk [vmem:[#allocation3 + $0x10] sm:$0xf] %vm1259_vm14, %v1220_v32  ;;  %v3773_v32 = vpack.c.bf16 %v1630_v11, %v1630_v11 }
 0x127   : > { %1893 = vrot.lane.b32.xlu1 %v3511_v23, %s2743_s23  ;;  %1891 = vrot.lane.b32.xlu0 %v3501_v19, %s2743_s23 }
 0x128   : > { %1446 = vrot.lane.b32.xlu2 %v3457_v55, %s2739_s15 }
 0x129   : > { %v1125_v20 = vpop.permute.xlu1 %1124  ;;  %v1123_v43 = vpop.permute.xlu0 %1122 }
 0x12a   : > { %1160 = vst.msk [vmem:[#allocation3 + $0x34] sm:$0xf] %vm1146_vm13, %v1125_v20  ;;  %v1226_v51 = vpop.permute.xlu2 %1225 }
 0x12b   : > { %1159 = vst.msk [vmem:[#allocation3 + $0x30] sm:$0xf] %vm1146_vm13, %v1123_v43 }
 0x12c   : > { %1267 = vst.msk [vmem:[#allocation3 + $0x1c] sm:$0xf] %vm1259_vm14, %v1226_v51  ;;  %v1742_v51 = vld [vmem:[#allocation2 + $0xc1] sm:$0xff] }
 0x12f   : > { %1559 = vrot.lane.b32.xlu1 %v3509_v13, %s2740_s17  ;;  %1448 = vrot.lane.b32.xlu0 %v3455_v54, %s2739_s15 }
 0x130   : > { %1561 = vrot.lane.b32.xlu2 %v3513_v63, %s2740_s17 }
 0x131   : > { %v1212_v52 = vpop.permute.xlu1 %1211  ;;  %v1129_v56 = vpop.permute.xlu0 %1128 }
 0x132   : > { %1260 = vst.msk [vmem:[#allocation3] sm:$0xf] %vm1259_vm14, %v1212_v52  ;;  %v1232_v47 = vpop.permute.xlu2 %1231 }
 0x133   : > { %1162 = vst.msk [vmem:[#allocation3 + $0x3c] sm:$0xf] %vm1146_vm13, %v1129_v56  ;;  %v1855_v56 = vld [vmem:[#allocation2 + $0xc2] sm:$0xff] }
 0x134   : > { %1270 = vst.msk [vmem:[#allocation3 + $0x28] sm:$0xf] %vm1259_vm14, %v1232_v47  ;;  %v1743_v47 = vld [vmem:[#allocation2 + $0xc9] sm:$0xff] }
 0x137   : > { %1456 = vrot.lane.b32.xlu1 %v3471_v61, %s2739_s15  ;;  %1454 = vrot.lane.b32.xlu0 %v3467_v59, %s2739_s15 }
 0x138   : > { %1673 = vrot.lane.b32.xlu2 %v3566_v49, %s2741_s18 }
 0x139   : > { %v1218_v9 = vpop.permute.xlu1 %1217  ;;  %v1216_v17 = vpop.permute.xlu0 %1215 }
 0x13a   : > { %1263 = vst.msk [vmem:[#allocation3 + $0xc] sm:$0xf] %vm1259_vm14, %v1218_v9  ;;  %v1238_v22 = vpop.permute.xlu2 %1237 }
 0x13b   : > { %1262 = vst.msk [vmem:[#allocation3 + $0x8] sm:$0xf] %vm1259_vm14, %v1216_v17 }
 0x13c   : > { %1273 = vst.msk [vmem:[#allocation3 + $0x34] sm:$0xf] %vm1259_vm14, %v1238_v22  ;;  %v1856_v22 = vld [vmem:[#allocation2 + $0xca] sm:$0xff] }
 0x13f   : > { %1567 = vrot.lane.b32.xlu1 %v3525_v40, %s2740_s17  ;;  %1675 = vrot.lane.b32.xlu0 %v3580_v26, %s2741_s18 }
 0x140   : > { %1569 = vrot.lane.b32.xlu2 %v3535_v24, %s2740_s17 }
 0x141   : > { %v1224_v61 = vpop.permute.xlu1 %1223  ;;  %v1222_v30 = vpop.permute.xlu0 %1221 }
 0x142   : > { %1266 = vst.msk [vmem:[#allocation3 + $0x18] sm:$0xf] %vm1259_vm14, %v1224_v61  ;;  %v1326_v49 = vpop.permute.xlu2 %1325  ;;  %v3797_v61 = vpack.c.bf16 %v1855_v56, %v1855_v56 }
 0x143   : > { %1265 = vst.msk [vmem:[#allocation3 + $0x14] sm:$0xf] %vm1259_vm14, %v1222_v30 }
 0x144   : > { %1374 = vst.msk [vmem:[#allocation3] sm:$0xf] %vm1373_vm15, %v1326_v49 }
 0x147   : > { %1788 = vrot.lane.b32.xlu1 %v3469_v60, %s2742_s20  ;;  %1786 = vrot.lane.b32.xlu0 %v3459_v44, %s2742_s20 }
 0x148   : > { %1681 = vrot.lane.b32.xlu2 %v3593_v3, %s2741_s18 }
 0x149   : > { %v1230_v40 = vpop.permute.xlu1 %1229  ;;  %v1228_v26 = vpop.permute.xlu0 %1227 }
 0x14a   : > { %1269 = vst.msk [vmem:[#allocation3 + $0x24] sm:$0xf] %vm1259_vm14, %v1230_v40  ;;  %v1332_v12 = vpop.permute.xlu2 %1331 }
 0x14b   : > { %1268 = vst.msk [vmem:[#allocation3 + $0x20] sm:$0xf] %vm1259_vm14, %v1228_v26 }
 0x14c   : > { %1377 = vst.msk [vmem:[#allocation3 + $0xc] sm:$0xf] %vm1373_vm15, %v1332_v12 }
 0x14f   : > { %1899 = vrot.lane.b32.xlu1 %v3523_v38, %s2743_s23  ;;  %1683 = vrot.lane.b32.xlu0 %v3588_v35, %s2741_s18 }
 0x150   : > { %1901 = vrot.lane.b32.xlu2 %v3521_v2, %s2743_s23 }
 0x151   : > { %v1236_v4 = vpop.permute.xlu1 %1235  ;;  %v1234_v16 = vpop.permute.xlu0 %1233 }
 0x152   : > { %1272 = vst.msk [vmem:[#allocation3 + $0x30] sm:$0xf] %vm1259_vm14, %v1236_v4  ;;  %v1338_v3 = vpop.permute.xlu2 %1337 }
 0x153   : > { %1271 = vst.msk [vmem:[#allocation3 + $0x2c] sm:$0xf] %vm1259_vm14, %v1234_v16 }
 0x154   : > { %1380 = vst.msk [vmem:[#allocation3 + $0x18] sm:$0xf] %vm1373_vm15, %v1338_v3  ;;  %v1401_v3 = vld [vmem:[#allocation2 + $0x99] sm:$0xff] }
 0x157   : > { %1796 = vrot.lane.b32.xlu1 %v3479_v33, %s2742_s20  ;;  %1794 = vrot.lane.b32.xlu0 %v3481_v10, %s2742_s20 }
 0x158   : > { %1907 = vrot.lane.b32.xlu2 %v3533_v46, %s2743_s23 }
 0x159   : > { %v1242_v25 = vpop.permute.xlu1 %1241  ;;  %v1240_v35 = vpop.permute.xlu0 %1239 }
 0x15a   : > { %1275 = vst.msk [vmem:[#allocation3 + $0x3c] sm:$0xf] %vm1259_vm14, %v1242_v25  ;;  %v1344_v53 = vpop.permute.xlu2 %1343  ;;  %v1417_v25 = vpack.c.bf16 %v1401_v3, %v1401_v3 }
 0x15b   : > { %1274 = vst.msk [vmem:[#allocation3 + $0x38] sm:$0xf] %vm1259_vm14, %v1240_v35 }
 0x15c   : > { %1383 = vst.msk [vmem:[#allocation3 + $0x24] sm:$0xf] %vm1373_vm15, %v1344_v53 }
 0x15f   : > { %1442 = vrot.lane.b32.xlu1 %v3442_v36, %s2739_s15  ;;  %1909 = vrot.lane.b32.xlu0 %v3537_v50, %s2743_s23 }
 0x160   : > { %1444 = vrot.lane.b32.xlu2 %v3448_v21, %s2739_s15 }
 0x161   : > { %v1330_v33 = vpop.permute.xlu1 %1329  ;;  %v1328_v58 = vpop.permute.xlu0 %1327 }
 0x162   : > { %1376 = vst.msk [vmem:[#allocation3 + $0x8] sm:$0xf] %vm1373_vm15, %v1330_v33  ;;  %v1350_v34 = vpop.permute.xlu2 %1349  ;;  %v1737_v33 = vld [vmem:[#allocation2 + $0x81] sm:$0xff] }
 0x163   : > { %1375 = vst.msk [vmem:[#allocation3 + $0x4] sm:$0xf] %vm1373_vm15, %v1328_v58  ;;  %v1753_v58 = vpack.c.bf16 %v1737_v33, %v1737_v33  ;;  %v3928_v33 = vld [vmem:[%s455_s16] ss:$0 sm:$0xff] }
 0x164   : > { %1386 = vst.msk [vmem:[#allocation3 + $0x30] sm:$0xf] %vm1373_vm15, %v1350_v34  ;;  %v1849_v34 = vld [vmem:[#allocation2 + $0x7a] sm:$0xff] }
 0x167   : > { %1557 = vrot.lane.b32.xlu1 %v3511_v23, %s2740_s17  ;;  %1555 = vrot.lane.b32.xlu0 %v3501_v19, %s2740_s17  ;;  %v2042_v23 = vunpack.c.l.b16 %v1980_v28 }
 0x168   : > { %1462 = vrot.lane.b32.xlu2 %v3483_v41, %s2739_s15 }
 0x169   : > { %v1336_v36 = vpop.permute.xlu1 %1335  ;;  %v1334_v31 = vpop.permute.xlu0 %1333  ;;  %v2047_v1 = vpack.c.b16 %v2042_v23, %v2042_v23 }
 0x16a   : > { %1379 = vst.msk [vmem:[#allocation3 + $0x14] sm:$0xf] %vm1373_vm15, %v1336_v36  ;;  %v1441_v21 = vpop.permute.xlu2 %1440  ;;  %v1865_v36 = vpack.c.bf16 %v1849_v34, %v1849_v34 }
 0x16b   : > { %1378 = vst.msk [vmem:[#allocation3 + $0x10] sm:$0xf] %vm1373_vm15, %v1334_v31  ;;  %v2079_v19 = vsel %vm2077_vm8, %v2047_v1, 0 }
 0x16c   : > { %1488 = vst.msk [vmem:[#allocation3 + $0x4] sm:$0xf] %vm1486_vm0, %v1441_v21  ;;  %2084 = vmatpush.bf16.msra.mxu0 %v2079_v19  ;;  %2544 = vmatpush.bf16.msra.mxu1 %v2079_v19  ;;  %v1741_v21 = vld [vmem:[#allocation2 + $0xb1] sm:$0xff] }
 0x16d   : > { %2545 = vmatpush.bf16.msra.mxu2 %v2079_v19  ;;  %2546 = vmatpush.bf16.msra.mxu3 %v2079_v19  ;;  %v1757_v28 = vpack.c.bf16 %v1741_v21, %v1741_v21 }
 0x16f   : > { %1669 = vrot.lane.b32.xlu1 %v3569_v15, %s2741_s18  ;;  %1464 = vrot.lane.b32.xlu0 %v3491_v27, %s2739_s15  ;;  %v2543_v15 = vld [vmem:[%s4063_s5 + $0x18] sm:$0xff]  ;;  %v2542_v27 = vld [vmem:[%s4063_s5 + $0x10] sm:$0xff] }
 0x170   : > { %1671 = vrot.lane.b32.xlu2 %v3562_v45, %s2741_s18  ;;  %2085 = vmatpush.bf16.msra.mxu0 %v2543_v15  ;;  %v1629_v45 = vld [vmem:[#allocation2 + $0xc0] sm:$0xff] }
 0x171   : > { %v1342_v6 = vpop.permute.xlu1 %1341  ;;  %v1340_v39 = vpop.permute.xlu0 %1339  ;;  %2547 = vmatpush.bf16.msra.mxu1 %v2543_v15  ;;  %2548 = vmatpush.bf16.msra.mxu2 %v2543_v15  ;;  %v3768_v5 = vpack.c.bf16 %v1629_v45, %v1629_v45 }
 0x172   : > { %1382 = vst.msk [vmem:[#allocation3 + $0x20] sm:$0xf] %vm1373_vm15, %v1342_v6  ;;  %v1666_v29 = vpop.permute.xlu2 %1665  ;;  %2549 = vmatpush.bf16.msra.mxu3 %v2543_v15  ;;  %v1744_v15 = vld [vmem:[#allocation2 + $0xd9] sm:$0xff] }
 0x173   : > { %1381 = vst.msk [vmem:[#allocation3 + $0x1c] sm:$0xf] %vm1373_vm15, %v1340_v39  ;;  %v1631_v39 = vld [vmem:[#allocation2 + $0xd8] sm:$0xff]  ;;  %v1760_v11 = vpack.c.bf16 %v1744_v15, %v1744_v15 }
 0x174   : > { %2086 = vmatpush.bf16.msra.mxu0 %v2542_v27 }
 0x175   : > { %2550 = vmatpush.bf16.msra.mxu1 %v2542_v27  ;;  %2551 = vmatpush.bf16.msra.mxu2 %v2542_v27 }
 0x176   : > { %2552 = vmatpush.bf16.msra.mxu3 %v2542_v27  ;;  %v1632_v27 = vld [vmem:[#allocation2 + $0xe0] sm:$0xff] }
 0x177   : > { %1577 = vrot.lane.b32.xlu1 %v3545_v48, %s2740_s17  ;;  %1575 = vrot.lane.b32.xlu0 %v3547_v7, %s2740_s17 }
 0x178   : > { %1782 = vrot.lane.b32.xlu2 %v3457_v55, %s2742_s20  ;;  %2087 = vmatpush.bf16.msra.mxu0 %v2541_v62  ;;  %v2540_v55 = vld [vmem:[%s4063_s5] sm:$0xff] }
 0x179   : > { %v1348_v42 = vpop.permute.xlu1 %1347  ;;  %v1346_v18 = vpop.permute.xlu0 %1345  ;;  %2553 = vmatpush.bf16.msra.mxu1 %v2541_v62  ;;  %2554 = vmatpush.bf16.msra.mxu2 %v2541_v62 }
 0x17a   : > { %1385 = vst.msk [vmem:[#allocation3 + $0x2c] sm:$0xf] %vm1373_vm15, %v1348_v42  ;;  %v1781_v8 = vpop.permute.xlu2 %1780  ;;  %2555 = vmatpush.bf16.msra.mxu3 %v2541_v62  ;;  %v1745_v62 = vld [vmem:[#allocation2 + $0xe1] sm:$0xff] }
 0x17b   : > { %1384 = vst.msk [vmem:[#allocation3 + $0x28] sm:$0xf] %vm1373_vm15, %v1346_v18 }
 0x17c   : > { %2088 = vmatpush.bf16.msra.mxu0 %v2540_v55 }
 0x17d   : > { %2556 = vmatpush.bf16.msra.mxu1 %v2540_v55  ;;  %2557 = vmatpush.bf16.msra.mxu2 %v2540_v55 }
 0x17e   : > { %2558 = vmatpush.bf16.msra.mxu3 %v2540_v55  ;;  %v1858_v55 = vld [vmem:[#allocation2 + $0xe2] sm:$0xff] }
 0x17f   : > { %1689 = vrot.lane.b32.xlu1 %v3768_v5, %s2741_s18  ;;  %1784 = vrot.lane.b32.xlu0 %v3455_v54, %s2742_s20  ;;  %v3787_v54 = vpack.c.bf16 %v1742_v51, %v1742_v51 }
 0x180   : > { %1691 = vrot.lane.b32.xlu2 %v3773_v32, %s2741_s18 }
 0x181   : > { %v1439_v20 = vpop.permute.xlu1 %1438  ;;  %v1352_v43 = vpop.permute.xlu0 %1351 }
 0x182   : > { %1487 = vst.msk [vmem:[#allocation3] sm:$0xf] %vm1486_vm0, %v1439_v20  ;;  %v1447_v52 = vpop.permute.xlu2 %1446  ;;  %v1857_v20 = vld [vmem:[#allocation2 + $0xda] sm:$0xff] }
 0x183   : > { %1387 = vst.msk [vmem:[#allocation3 + $0x34] sm:$0xf] %vm1373_vm15, %v1352_v43 }
 0x184   : > { %1491 = vst.msk [vmem:[#allocation3 + $0x10] sm:$0xf] %vm1486_vm0, %v1447_v52  ;;  %v1874_v52 = vpack.c.bf16 %v1858_v55, %v1858_v55 }
 0x187   : > { %1897 = vrot.lane.b32.xlu1 %v3513_v63, %s2743_s23  ;;  %1895 = vrot.lane.b32.xlu0 %v3509_v13, %s2743_s23  ;;  %v3799_v63 = vpack.c.bf16 %v1743_v47, %v1743_v47  ;;  %v3802_v13 = vpack.c.bf16 %v1856_v22, %v1856_v22 }
 0x188   : > { %1802 = vrot.lane.b32.xlu2 %v3787_v54, %s2742_s20 }
 0x189   : > { %v1554_v9 = vpop.permute.xlu1 %1553  ;;  %v1552_v17 = vpop.permute.xlu0 %1551 }
 0x18a   : > { %1601 = vst.msk [vmem:[#allocation3 + $0x4] sm:$0xf] %vm1599_vm1, %v1554_v9  ;;  %v1562_v30 = vpop.permute.xlu2 %1561 }
 0x18b   : > { %1600 = vst.msk [vmem:[#allocation3] sm:$0xf] %vm1599_vm1, %v1552_v17 }
 0x18c   : > { %1714 = vst.msk [vmem:[#allocation3] sm:$0xf] %vm1713_vm2, %v1666_v29  ;;  %v1647_v29 = vpack.c.bf16 %v1631_v39, %v1631_v39 }
 0x18f   : > { %1915 = vrot.lane.b32.xlu1 %v3797_v61, %s2743_s23  ;;  %1804 = vrot.lane.b32.xlu0 %v3799_v63, %s2742_s20 }
 0x190   : > { %1917 = vrot.lane.b32.xlu2 %v3802_v13, %s2743_s23 }
 0x191   : > { %v1779_v49 = vpop.permute.xlu1 %1778  ;;  %v1668_v40 = vpop.permute.xlu0 %1667 }
 0x192   : > { %1827 = vst.msk [vmem:[#allocation3] sm:$0xf] %vm1826_vm4, %v1779_v49  ;;  %v1674_v26 = vpop.permute.xlu2 %1673 }
 0x193   : > { %1715 = vst.msk [vmem:[#allocation3 + $0x4] sm:$0xf] %vm1713_vm2, %v1668_v40 }
 0x194   : > { %1828 = vst.msk [vmem:[#allocation3 + $0x4] sm:$0xf] %vm1826_vm4, %v1781_v8 }
 0x197   : > { %1452 = vrot.lane.b32.xlu1 %v3469_v60, %s2739_s15  ;;  %1450 = vrot.lane.b32.xlu0 %v3459_v44, %s2739_s15 }
 0x198   : > { %1563 = vrot.lane.b32.xlu2 %v3523_v38, %s2740_s17 }
 0x199   : > { %v1894_v12 = vpop.permute.xlu1 %1893  ;;  %v1892_v4 = vpop.permute.xlu0 %1891 }
 0x19a   : > { %1941 = vst.msk [vmem:[#allocation3 + $0x4] sm:$0xf] %vm1939_vm6, %v1894_v12  ;;  %v1570_v16 = vpop.permute.xlu2 %1569 }
 0x19b   : > { %1940 = vst.msk [vmem:[#allocation3] sm:$0xf] %vm1939_vm6, %v1892_v4 }
 0x19f   : > { %1458 = vrot.lane.b32.xlu1 %v3481_v10, %s2739_s15  ;;  %1565 = vrot.lane.b32.xlu0 %v3521_v2, %s2740_s17 }
 0x1a0   : > { %1460 = vrot.lane.b32.xlu2 %v1417_v25, %s2739_s15 }
 0x1a1   : > { %v1560_v44 = vpop.permute.xlu1 %1559  ;;  %v1449_v60 = vpop.permute.xlu0 %1448 }
 0x1a2   : > { %1604 = vst.msk [vmem:[#allocation3 + $0x10] sm:$0xf] %vm1599_vm1, %v1560_v44  ;;  %v2532_v38 = vld [vmem:[#allocation3] sm:$0xff]  ;;  %v1682_v35 = vpop.permute.xlu2 %1681 }
 0x1a3   : > { %1492 = vst.msk [vmem:[#allocation3 + $0x14] sm:$0xf] %vm1486_vm0, %v1449_v60  ;;  %2518 = vmatmul.msk.bf16.vlgmr.msra.gmra.mxu0 %vm2052_vm3, %v2532_v38 }
 0x1a4   : > { %1605 = vst.msk [vmem:[#allocation3 + $0x14] sm:$0xf] %vm1599_vm1, %v1562_v30 }
 0x1a5   : > { %1718 = vst.msk [vmem:[#allocation3 + $0x10] sm:$0xf] %vm1713_vm2, %v1674_v26 }
 0x1a7   : > { %1679 = vrot.lane.b32.xlu1 %v3598_v37, %s2741_s18  ;;  %1677 = vrot.lane.b32.xlu0 %v3573_v57, %s2741_s18 }
 0x1a8   : > { %1571 = vrot.lane.b32.xlu2 %v3533_v46, %s2740_s17 }
 0x1a9   : > { %v1457_v10 = vpop.permute.xlu1 %1456  ;;  %v1455_v2 = vpop.permute.xlu0 %1454 }
 0x1aa   : > { %1496 = vst.msk [vmem:[#allocation3 + $0x24] sm:$0xf] %vm1486_vm0, %v1457_v10  ;;  %v1902_v53 = vpop.permute.xlu2 %1901 }
 0x1ab   : > { %1495 = vst.msk [vmem:[#allocation3 + $0x20] sm:$0xf] %vm1486_vm0, %v1455_v2 }
 0x1ac   : > { %1609 = vst.msk [vmem:[#allocation3 + $0x24] sm:$0xf] %vm1599_vm1, %v1570_v16 }
 0x1af   : > { %1790 = vrot.lane.b32.xlu1 %v3467_v59, %s2742_s20  ;;  %1573 = vrot.lane.b32.xlu0 %v3537_v50, %s2740_s17 }
 0x1b0   : > { %1792 = vrot.lane.b32.xlu2 %v1753_v58, %s2742_s20 }
 0x1b1   : > { %v1568_v57 = vpop.permute.xlu1 %1567  ;;  %v1676_v37 = vpop.permute.xlu0 %1675 }
 0x1b2   : > { %1608 = vst.msk [vmem:[#allocation3 + $0x20] sm:$0xf] %vm1599_vm1, %v1568_v57  ;;  %v1908_v46 = vpop.permute.xlu2 %1907 }
 0x1b3   : > { %1719 = vst.msk [vmem:[#allocation3 + $0x14] sm:$0xf] %vm1713_vm2, %v1676_v37 }
 0x1b4   : > { %1722 = vst.msk [vmem:[#allocation3 + $0x20] sm:$0xf] %vm1713_vm2, %v1682_v35 }
 0x1b7   : > { %1687 = vrot.lane.b32.xlu1 %v3600_v14, %s2741_s18  ;;  %1685 = vrot.lane.b32.xlu0 %v3615_v0, %s2741_s18 }
 0x1b8   : > { %1903 = vrot.lane.b32.xlu2 %v1865_v36, %s2743_s23 }
 0x1b9   : > { %v1789_v59 = vpop.permute.xlu1 %1788  ;;  %v1787_v50 = vpop.permute.xlu0 %1786 }
 0x1ba   : > { %1832 = vst.msk [vmem:[#allocation3 + $0x14] sm:$0xf] %vm1826_vm4, %v1789_v59  ;;  %v1445_v31 = vpop.permute.xlu2 %1444 }
 0x1bb   : > { %1831 = vst.msk [vmem:[#allocation3 + $0x10] sm:$0xf] %vm1826_vm4, %v1787_v50 }
 0x1bc   : > { %1945 = vst.msk [vmem:[#allocation3 + $0x14] sm:$0xf] %vm1939_vm6, %v1902_v53 }
 0x1bd   : > { %1490 = vst.msk [vmem:[#allocation3 + $0xc] sm:$0xf] %vm1486_vm0, %v1445_v31 }
 0x1bf   : > { %1798 = vrot.lane.b32.xlu1 %v3483_v41, %s2742_s20  ;;  %1905 = vrot.lane.b32.xlu0 %v3535_v24, %s2743_s23 }
 0x1c0   : > { %1800 = vrot.lane.b32.xlu2 %v1757_v28, %s2742_s20 }
 0x1c1   : > { %v1900_v14 = vpop.permute.xlu1 %1899  ;;  %v1684_v0 = vpop.permute.xlu0 %1683 }
 0x1c2   : > { %1944 = vst.msk [vmem:[#allocation3 + $0x10] sm:$0xf] %vm1939_vm6, %v1900_v14  ;;  %v1463_v23 = vpop.permute.xlu2 %1462 }
 0x1c3   : > { %1723 = vst.msk [vmem:[#allocation3 + $0x24] sm:$0xf] %vm1713_vm2, %v1684_v0 }
 0x1c4   : > { %1499 = vst.msk [vmem:[#allocation3 + $0x30] sm:$0xf] %vm1486_vm0, %v1463_v23 }
 0x1c7   : > { %1913 = vrot.lane.b32.xlu1 %v3545_v48, %s2743_s23  ;;  %1911 = vrot.lane.b32.xlu0 %v3547_v7, %s2743_s23 }
 0x1c8   : > { %1353 = vrot.lane.b32.xlu2 %v3768_v5, %s2738_s21  ;;  %v1648_v5 = vpack.c.bf16 %v1632_v27, %v1632_v27 }
 0x1c9   : > { %v1797_v41 = vpop.permute.xlu1 %1796  ;;  %v1795_v1 = vpop.permute.xlu0 %1794  ;;  %v2534_v24 = vld [vmem:[#allocation3 + $0x10] sm:$0xff] }
 0x1ca   : > { %1836 = vst.msk [vmem:[#allocation3 + $0x24] sm:$0xf] %vm1826_vm4, %v1797_v41  ;;  %2520 = vmatmul.msk.bf16.vlgmr.msra.gmra.mxu1 %vm2052_vm3, %v2534_v24  ;;  %v1672_v19 = vpop.permute.xlu2 %1671 }
 0x1cb   : > { %1835 = vst.msk [vmem:[#allocation3 + $0x20] sm:$0xf] %vm1826_vm4, %v1795_v1 }
 0x1cc   : > { %1948 = vst.msk [vmem:[#allocation3 + $0x20] sm:$0xf] %vm1939_vm6, %v1908_v46 }
 0x1cf   : > { %1466 = vrot.lane.b32.xlu1 %v3787_v54, %s2739_s15  ;;  %1355 = vrot.lane.b32.xlu0 %v3773_v32, %s2738_s21  ;;  %v1761_v32 = vpack.c.bf16 %v1745_v62, %v1745_v62  ;;  %v1873_v54 = vpack.c.bf16 %v1857_v20, %v1857_v20 }
 0x1d0   : > { %1468 = vrot.lane.b32.xlu2 %v3799_v63, %s2739_s15 }
 0x1d1   : > { %v1443_v48 = vpop.permute.xlu1 %1442  ;;  %v1910_v7 = vpop.permute.xlu0 %1909 }
 0x1d2   : > { %1489 = vst.msk [vmem:[#allocation3 + $0x8] sm:$0xf] %vm1486_vm0, %v1443_v48  ;;  %v1783_v6 = vpop.permute.xlu2 %1782 }
 0x1d3   : > { %1949 = vst.msk [vmem:[#allocation3 + $0x24] sm:$0xf] %vm1939_vm6, %v1910_v7 }
 0x1d7   : > { %1581 = vrot.lane.b32.xlu1 %v3802_v13, %s2740_s17  ;;  %1579 = vrot.lane.b32.xlu0 %v3797_v61, %s2740_s17 }
 0x1d8   : > { %1693 = vrot.lane.b32.xlu2 %v1647_v29, %s2741_s18 }
 0x1d9   : > { %v1558_v45 = vpop.permute.xlu1 %1557  ;;  %v1556_v42 = vpop.permute.xlu0 %1555 }
 0x1da   : > { %1603 = vst.msk [vmem:[#allocation3 + $0xc] sm:$0xf] %vm1599_vm1, %v1558_v45  ;;  %v2536_v18 = vld [vmem:[#allocation3 + $0x20] sm:$0xff]  ;;  %v1692_v8 = vpop.permute.xlu2 %1691 }
 0x1db   : > { %1602 = vst.msk [vmem:[#allocation3 + $0x8] sm:$0xf] %vm1599_vm1, %v1556_v42  ;;  %2522 = vmatmul.msk.bf16.vlgmr.msra.gmra.mxu2 %vm2052_vm3, %v2536_v18 }
 0x1dc   : > { %1717 = vst.msk [vmem:[#allocation3 + $0xc] sm:$0xf] %vm1713_vm2, %v1672_v19 }
 0x1df   : > { %1806 = vrot.lane.b32.xlu1 %v1760_v11, %s2742_s20  ;;  %1695 = vrot.lane.b32.xlu0 %v1648_v5, %s2741_s18 }
 0x1e0   : > { %1808 = vrot.lane.b32.xlu2 %v1761_v32, %s2742_s20 }
 0x1e1   : > { %v1670_v43 = vpop.permute.xlu1 %1669  ;;  %v1465_v51 = vpop.permute.xlu0 %1464 }
 0x1e2   : > { %1716 = vst.msk [vmem:[#allocation3 + $0x8] sm:$0xf] %vm1713_vm2, %v1670_v43  ;;  %v1803_v56 = vpop.permute.xlu2 %1802 }
 0x1e3   : > { %1500 = vst.msk [vmem:[#allocation3 + $0x34] sm:$0xf] %vm1486_vm0, %v1465_v51 }
 0x1e4   : > { %1829 = vst.msk [vmem:[#allocation3 + $0x8] sm:$0xf] %vm1826_vm4, %v1783_v6 }
 0x1e7   : > { %1921 = vrot.lane.b32.xlu1 %v1874_v52, %s2743_s23  ;;  %1919 = vrot.lane.b32.xlu0 %v1873_v54, %s2743_s23 }
 0x1e9   : > { %v1578_v47 = vpop.permute.xlu1 %1577  ;;  %v1576_v9 = vpop.permute.xlu0 %1575 }
 0x1ea   : > { %1613 = vst.msk [vmem:[#allocation3 + $0x34] sm:$0xf] %vm1599_vm1, %v1578_v47  ;;  %v1918_v17 = vpop.permute.xlu2 %1917 }
 0x1eb   : > { %1612 = vst.msk [vmem:[#allocation3 + $0x30] sm:$0xf] %vm1599_vm1, %v1576_v9 }
 0x1ec   : > { %1727 = vst.msk [vmem:[#allocation3 + $0x34] sm:$0xf] %vm1713_vm2, %v1692_v8 }
 0x1f1   : > { %v1690_v22 = vpop.permute.xlu1 %1689  ;;  %v1785_v61 = vpop.permute.xlu0 %1784 }
 0x1f2   : > { %1726 = vst.msk [vmem:[#allocation3 + $0x30] sm:$0xf] %vm1713_vm2, %v1690_v22  ;;  %v1564_v63 = vpop.permute.xlu2 %1563 }
 0x1f3   : > { %1830 = vst.msk [vmem:[#allocation3 + $0xc] sm:$0xf] %vm1826_vm4, %v1785_v61 }
 0x1f4   : > { %1839 = vst.msk [vmem:[#allocation3 + $0x30] sm:$0xf] %vm1826_vm4, %v1803_v56 }
 0x1f9   : > { %v1898_v30 = vpop.permute.xlu1 %1897  ;;  %v1896_v13 = vpop.permute.xlu0 %1895 }
 0x1fa   : > { %1943 = vst.msk [vmem:[#allocation3 + $0xc] sm:$0xf] %vm1939_vm6, %v1898_v30  ;;  %v1461_v49 = vpop.permute.xlu2 %1460 }
 0x1fb   : > { %1942 = vst.msk [vmem:[#allocation3 + $0x8] sm:$0xf] %vm1939_vm6, %v1896_v13 }
 0x1fc   : > { %1498 = vst.msk [vmem:[#allocation3 + $0x2c] sm:$0xf] %vm1486_vm0, %v1461_v49 }
 0x201   : > { %v1916_v40 = vpop.permute.xlu1 %1915  ;;  %v1805_v26 = vpop.permute.xlu0 %1804 }
 0x202   : > { %1952 = vst.msk [vmem:[#allocation3 + $0x30] sm:$0xf] %vm1939_vm6, %v1916_v40  ;;  %v2533_v12 = vld [vmem:[#allocation3 + $0x8] sm:$0xff]  ;;  %v1572_v4 = vpop.permute.xlu2 %1571 }
 0x203   : > { %1840 = vst.msk [vmem:[#allocation3 + $0x34] sm:$0xf] %vm1826_vm4, %v1805_v26  ;;  %2519 = vmatmul.msk.bf16.gmra.mxu0 %vm2052_vm3, %v2533_v12 }
 0x204   : > { %1953 = vst.msk [vmem:[#allocation3 + $0x34] sm:$0xf] %vm1939_vm6, %v1918_v17 }
 0x209   : > { %v1453_v16 = vpop.permute.xlu1 %1452  ;;  %v1451_v3 = vpop.permute.xlu0 %1450 }
 0x20a   : > { %1494 = vst.msk [vmem:[#allocation3 + $0x1c] sm:$0xf] %vm1486_vm0, %v1453_v16  ;;  %v1793_v44 = vpop.permute.xlu2 %1792 }
 0x20b   : > { %1493 = vst.msk [vmem:[#allocation3 + $0x18] sm:$0xf] %vm1486_vm0, %v1451_v3  ;;  %v2538_v25 = vld [vmem:[#allocation3 + $0x30] sm:$0xff] }
 0x20c   : > { %1606 = vst.msk [vmem:[#allocation3 + $0x18] sm:$0xf] %vm1599_vm1, %v1564_v63  ;;  %2524 = vmatmul.msk.bf16.vlgmr.msra.gmra.mxu3 %vm2052_vm3, %v2538_v25 }
 0x211   : > { %v1459_v60 = vpop.permute.xlu1 %1458  ;;  %v1566_v38 = vpop.permute.xlu0 %1565 }
 0x212   : > { %1497 = vst.msk [vmem:[#allocation3 + $0x28] sm:$0xf] %vm1486_vm0, %v1459_v60  ;;  %v1904_v35 = vpop.permute.xlu2 %1903 }
 0x213   : > { %1607 = vst.msk [vmem:[#allocation3 + $0x1c] sm:$0xf] %vm1599_vm1, %v1566_v38 }
 0x214   : > { %1610 = vst.msk [vmem:[#allocation3 + $0x28] sm:$0xf] %vm1599_vm1, %v1572_v4 }
 0x219   : > { %v1680_v10 = vpop.permute.xlu1 %1679  ;;  %v1678_v2 = vpop.permute.xlu0 %1677 }
 0x21a   : > { %1721 = vst.msk [vmem:[#allocation3 + $0x1c] sm:$0xf] %vm1713_vm2, %v1680_v10  ;;  %v1801_v53 = vpop.permute.xlu2 %1800 }
 0x21b   : > { %1720 = vst.msk [vmem:[#allocation3 + $0x18] sm:$0xf] %vm1713_vm2, %v1678_v2 }
 0x21c   : > { %1834 = vst.msk [vmem:[#allocation3 + $0x1c] sm:$0xf] %vm1826_vm4, %v1793_v44 }
 0x220   : > { %v2090_v37 = vpop.f32.mrf.mxu0 }
 0x221   : > { %v1791_v58 = vpop.permute.xlu1 %1790  ;;  %v1574_v57 = vpop.permute.xlu0 %1573  ;;  %v2091_v46 = vadd.f32 %v3928_v33, %v2090_v37 }
 0x222   : > { %1833 = vst.msk [vmem:[#allocation3 + $0x18] sm:$0xf] %vm1826_vm4, %v1791_v58  ;;  %v1354_v34 = vpop.permute.xlu2 %1353 }
 0x223   : > { %1611 = vst.msk [vmem:[#allocation3 + $0x2c] sm:$0xf] %vm1599_vm1, %v1574_v57  ;;  %v2225_v36 = vpack.c.bf16 %v2091_v46, %v2091_v46  ;;  %v2168_v21 = vmul.f32 %v2091_v46, %v2091_v46  ;;  %v2131_v14 = vsel %vm2130_vm12, %v2091_v46, 0.0 }
 0x224   : > { %1946 = vst.msk [vmem:[#allocation3 + $0x18] sm:$0xf] %vm1939_vm6, %v1904_v35 }
 0x225   : > { %1388 = vst.msk [vmem:[#allocation3 + $0x38] sm:$0xf] %vm1373_vm15, %v1354_v34  ;;  %v2184_v24 = vsel %vm2130_vm12, %v2168_v21, 0.0 }
 0x226   : > { %2242 = vst.msk [vmem:[%s2859_s22] sm:$0xf] %vm2241_vm5, %v2225_v36 }
 0x228   : > { %v2092_v31 = vpop.f32.mrf.mxu0 }
 0x229   : > { %v1688_v59 = vpop.permute.xlu1 %1687  ;;  %v1686_v50 = vpop.permute.xlu0 %1685  ;;  %v2093_v28 = vadd.f32 %v3928_v33, %v2092_v31 }
 0x22a   : > { %1725 = vst.msk [vmem:[#allocation3 + $0x2c] sm:$0xf] %vm1713_vm2, %v1688_v59  ;;  %v1469_v27 = vpop.permute.xlu2 %1468 }
 0x22b   : > { %1724 = vst.msk [vmem:[#allocation3 + $0x28] sm:$0xf] %vm1713_vm2, %v1686_v50  ;;  %v2132_v0 = vsel %vm2130_vm12, %v2093_v28, 0.0  ;;  %v2169_v23 = vmul.f32 %v2093_v28, %v2093_v28  ;;  %v2226_v41 = vpack.c.bf16 %v2093_v28, %v2093_v28 }
 0x22c   : > { %1838 = vst.msk [vmem:[#allocation3 + $0x2c] sm:$0xf] %vm1826_vm4, %v1801_v53  ;;  %v2133_v1 = vadd.f32 %v2132_v0, %v2131_v14 }
 0x22d   : > { %v2185_v19 = vsel %vm2130_vm12, %v2169_v23, 0.0  ;;  %2243 = vst.msk [vmem:[%s2859_s22 + $0x4] sm:$0xf] %vm2241_vm5, %v2226_v41 }
 0x22e   : > { %v2186_v48 = vadd.f32 %v2185_v19, %v2184_v24 }
 0x231   : > { %v1799_v7 = vpop.permute.xlu1 %1798  ;;  %v1906_v6 = vpop.permute.xlu0 %1905 }
 0x232   : > { %1837 = vst.msk [vmem:[#allocation3 + $0x28] sm:$0xf] %vm1826_vm4, %v1799_v7  ;;  %v1694_v11 = vpop.permute.xlu2 %1693 }
 0x233   : > { %1947 = vst.msk [vmem:[#allocation3 + $0x1c] sm:$0xf] %vm1939_vm6, %v1906_v6 }
 0x239   : > { %v1914_v39 = vpop.permute.xlu1 %1913  ;;  %v1912_v29 = vpop.permute.xlu0 %1911 }
 0x23a   : > { %1951 = vst.msk [vmem:[#allocation3 + $0x2c] sm:$0xf] %vm1939_vm6, %v1914_v39  ;;  %v2535_v15 = vld [vmem:[#allocation3 + $0x18] sm:$0xff]  ;;  %v1809_v43 = vpop.permute.xlu2 %1808 }
 0x23b   : > { %1950 = vst.msk [vmem:[#allocation3 + $0x28] sm:$0xf] %vm1939_vm6, %v1912_v29  ;;  %2521 = vmatmul.msk.bf16.gmra.mxu1 %vm2052_vm3, %v2535_v15 }
 0x241   : > { %v1467_v45 = vpop.permute.xlu1 %1466  ;;  %v1356_v42 = vpop.permute.xlu0 %1355 }
 0x242   : > { %1501 = vst.msk [vmem:[#allocation3 + $0x38] sm:$0xf] %vm1486_vm0, %v1467_v45  ;;  %v2537_v18 = vld [vmem:[#allocation3 + $0x28] sm:$0xff] }
 0x243   : > { %1389 = vst.msk [vmem:[#allocation3 + $0x3c] sm:$0xf] %vm1373_vm15, %v1356_v42  ;;  %2523 = vmatmul.msk.bf16.gmra.mxu2 %vm2052_vm3, %v2537_v18 }
 0x244   : > { %1502 = vst.msk [vmem:[#allocation3 + $0x3c] sm:$0xf] %vm1486_vm0, %v1469_v27 }
 0x247   : > { %v2100_v5 = vpop.f32.mrf.mxu1 }
 0x248   : > { %v2101_v32 = vadd.f32 %v3928_v33, %v2100_v5 }
 0x249   : > { %v1582_v8 = vpop.permute.xlu1 %1581  ;;  %v1580_v62 = vpop.permute.xlu0 %1579 }
 0x24a   : > { %1615 = vst.msk [vmem:[#allocation3 + $0x3c] sm:$0xf] %vm1599_vm1, %v1582_v8  ;;  %v2229_v55 = vpack.c.bf16 %v2101_v32, %v2101_v32  ;;  %v2172_v35 = vmul.f32 %v2101_v32, %v2101_v32  ;;  %v2138_v57 = vsel %vm2130_vm12, %v2101_v32, 0.0 }
 0x24b   : > { %1614 = vst.msk [vmem:[#allocation3 + $0x38] sm:$0xf] %vm1599_vm1, %v1580_v62 }
 0x24c   : > { %1728 = vst.msk [vmem:[#allocation3 + $0x38] sm:$0xf] %vm1713_vm2, %v1694_v11  ;;  %v2191_v59 = vsel %vm2130_vm12, %v2172_v35, 0.0 }
 0x24d   : > { %2246 = vst.msk [vmem:[%s2859_s22 + $0x10] sm:$0xf] %vm2241_vm5, %v2229_v55 }
 0x24f   : > { %v2102_v20 = vpop.f32.mrf.mxu1 }
 0x250   : > { %v2103_v54 = vadd.f32 %v3928_v33, %v2102_v20 }
 0x251   : > { %v1807_v51 = vpop.permute.xlu1 %1806  ;;  %v1696_v52 = vpop.permute.xlu0 %1695 }
 0x252   : > { %1841 = vst.msk [vmem:[#allocation3 + $0x38] sm:$0xf] %vm1826_vm4, %v1807_v51  ;;  %v2230_v56 = vpack.c.bf16 %v2103_v54, %v2103_v54  ;;  %v2173_v37 = vmul.f32 %v2103_v54, %v2103_v54  ;;  %v2140_v50 = vsel %vm2130_vm12, %v2103_v54, 0.0 }
 0x253   : > { %1729 = vst.msk [vmem:[#allocation3 + $0x3c] sm:$0xf] %vm1713_vm2, %v1696_v52 }
 0x254   : > { %1842 = vst.msk [vmem:[#allocation3 + $0x3c] sm:$0xf] %vm1826_vm4, %v1809_v43  ;;  %v2193_v0 = vsel %vm2130_vm12, %v2173_v37, 0.0 }
 0x255   : > { %2247 = vst.msk [vmem:[%s2859_s22 + $0x14] sm:$0xf] %vm2241_vm5, %v2230_v56 }
 0x259   : > { %v1922_v47 = vpop.permute.xlu1 %1921  ;;  %v1920_v9 = vpop.permute.xlu0 %1919 }
 0x25a   : > { %1955 = vst.msk [vmem:[#allocation3 + $0x3c] sm:$0xf] %vm1939_vm6, %v1922_v47 }
 0x25b   : > { %1954 = vst.msk [vmem:[#allocation3 + $0x38] sm:$0xf] %vm1939_vm6, %v1920_v9 }
 0x25e   : > { %v2110_v17 = vpop.f32.mrf.mxu2 }
 0x25f   : > { %v2111_v22 = vadd.f32 %v3928_v33, %v2110_v17 }
 0x261   : > { %v2233_v61 = vpack.c.bf16 %v2111_v22, %v2111_v22  ;;  %v2176_v18 = vmul.f32 %v2111_v22, %v2111_v22  ;;  %v2146_v55 = vsel %vm2130_vm12, %v2111_v22, 0.0 }
 0x262   : > { %v2539_v63 = vld [vmem:[#allocation3 + $0x38] sm:$0xff] }
 0x263   : > { %2250 = vst.msk [vmem:[%s2859_s22 + $0x20] sm:$0xf] %vm2241_vm5, %v2233_v61  ;;  %2525 = vmatmul.msk.bf16.gmra.mxu3 %vm2052_vm3, %v2539_v63  ;;  %v2199_v56 = vsel %vm2130_vm12, %v2176_v18, 0.0 }
 0x266   : > { %v2112_v30 = vpop.f32.mrf.mxu2 }
 0x267   : > { %v3975_v13 = vadd.f32 %v3928_v33, %v2112_v30 }
 0x269   : > { %v2234_v49 = vpack.c.bf16 %v3975_v13, %v3975_v13  ;;  %v2177_v20 = vmul.f32 %v3975_v13, %v3975_v13  ;;  %v2148_v47 = vsel %vm2130_vm12, %v3975_v13, 0.0 }
 0x26b   : > { %2251 = vst.msk [vmem:[%s2859_s22 + $0x24] sm:$0xf] %vm2241_vm5, %v2234_v49  ;;  %v2201_v61 = vsel %vm2130_vm12, %v2177_v20, 0.0 }
 0x280   : > { %v2095_v40 = vpop.f32.mrf.mxu0 }
 0x281   : > { %v2096_v26 = vadd.f32 %v3928_v33, %v2095_v40 }
 0x283   : > { %v2134_v12 = vsel %vm2130_vm12, %v2096_v26, 0.0  ;;  %v2170_v4 = vmul.f32 %v2096_v26, %v2096_v26  ;;  %v2227_v16 = vpack.c.bf16 %v2096_v26, %v2096_v26 }
 0x284   : > { %v2135_v3 = vadd.f32 %v2134_v12, %v2133_v1 }
 0x285   : > { %v2187_v25 = vsel %vm2130_vm12, %v2170_v4, 0.0  ;;  %2244 = vst.msk [vmem:[%s2859_s22 + $0x8] sm:$0xf] %vm2241_vm5, %v2227_v16 }
 0x286   : > { %v2188_v44 = vadd.f32 %v2187_v25, %v2186_v48 }
 0x288   : > { %v2097_v60 = vpop.f32.mrf.mxu0 }
 0x289   : > { %v2098_v38 = vadd.f32 %v3928_v33, %v2097_v60 }
 0x28b   : > { %v2136_v10 = vsel %vm2130_vm12, %v2098_v38, 0.0  ;;  %v2171_v2 = vmul.f32 %v2098_v38, %v2098_v38  ;;  %v2228_v53 = vpack.c.bf16 %v2098_v38, %v2098_v38 }
 0x28c   : > { %v2137_v58 = vadd.f32 %v2136_v10, %v2135_v3 }
 0x28d   : > { %v2189_v46 = vsel %vm2130_vm12, %v2171_v2, 0.0  ;;  %2245 = vst.msk [vmem:[%s2859_s22 + $0xc] sm:$0xf] %vm2241_vm5, %v2228_v53 }
 0x28e   : > { %v2139_v34 = vadd.f32 %v2138_v57, %v2137_v58  ;;  %v2190_v36 = vadd.f32 %v2189_v46, %v2188_v44 }
 0x28f   : > { %v2120_v31 = vpop.f32.mrf.mxu3 }
 0x290   : > { %v2192_v21 = vadd.f32 %v2191_v59, %v2190_v36  ;;  %v2121_v28 = vadd.f32 %v3928_v33, %v2120_v31  ;;  %v2141_v14 = vadd.f32 %v2140_v50, %v2139_v34 }
 0x292   : > { %v2237_v23 = vpack.c.bf16 %v2121_v28, %v2121_v28  ;;  %v2194_v41 = vadd.f32 %v2193_v0, %v2192_v21  ;;  %v2180_v16 = vmul.f32 %v2121_v28, %v2121_v28  ;;  %v2154_v35 = vsel %vm2130_vm12, %v2121_v28, 0.0 }
 0x294   : > { %2254 = vst.msk [vmem:[%s2859_s22 + $0x30] sm:$0xf] %vm2241_vm5, %v2237_v23  ;;  %v2207_v57 = vsel %vm2130_vm12, %v2180_v16, 0.0 }
 0x297   : > { %v2122_v1 = vpop.f32.mrf.mxu3 }
 0x298   : > { %v2123_v24 = vadd.f32 %v3928_v33, %v2122_v1 }
 0x29a   : > { %v2238_v19 = vpack.c.bf16 %v2123_v24, %v2123_v24  ;;  %v2181_v10 = vmul.f32 %v2123_v24, %v2123_v24  ;;  %v2156_v37 = vsel %vm2130_vm12, %v2123_v24, 0.0 }
 0x29c   : > { %2255 = vst.msk [vmem:[%s2859_s22 + $0x34] sm:$0xf] %vm2241_vm5, %v2238_v19  ;;  %v2209_v36 = vsel %vm2130_vm12, %v2181_v10, 0.0 }
 0x2b8   : > { %v2105_v48 = vpop.f32.mrf.mxu1 }
 0x2b9   : > { %v2106_v7 = vadd.f32 %v3928_v33, %v2105_v48 }
 0x2bb   : > { %v2231_v6 = vpack.c.bf16 %v2106_v7, %v2106_v7  ;;  %v2174_v39 = vmul.f32 %v2106_v7, %v2106_v7  ;;  %v2142_v29 = vsel %vm2130_vm12, %v2106_v7, 0.0 }
 0x2bc   : > { %v2143_v42 = vadd.f32 %v2142_v29, %v2141_v14 }
 0x2bd   : > { %2248 = vst.msk [vmem:[%s2859_s22 + $0x18] sm:$0xf] %vm2241_vm5, %v2231_v6  ;;  %v2195_v27 = vsel %vm2130_vm12, %v2174_v39, 0.0 }
 0x2be   : > { %v2196_v62 = vadd.f32 %v2195_v27, %v2194_v41 }
 0x2c0   : > { %v2107_v15 = vpop.f32.mrf.mxu1 }
 0x2c1   : > { %v2108_v45 = vadd.f32 %v3928_v33, %v2107_v15 }
 0x2c3   : > { %v2144_v11 = vsel %vm2130_vm12, %v2108_v45, 0.0  ;;  %v2175_v5 = vmul.f32 %v2108_v45, %v2108_v45  ;;  %v2232_v8 = vpack.c.bf16 %v2108_v45, %v2108_v45 }
 0x2c4   : > { %v2145_v32 = vadd.f32 %v2144_v11, %v2143_v42 }
 0x2c5   : > { %v2197_v43 = vsel %vm2130_vm12, %v2175_v5, 0.0  ;;  %2249 = vst.msk [vmem:[%s2859_s22 + $0x1c] sm:$0xf] %vm2241_vm5, %v2232_v8 }
 0x2c6   : > { %v2147_v51 = vadd.f32 %v2146_v55, %v2145_v32  ;;  %v2198_v52 = vadd.f32 %v2197_v43, %v2196_v62  ;;  %v2115_v54 = vpop.f32.mrf.mxu2 }
 0x2c7   : > { %v2116_v9 = vadd.f32 %v3928_v33, %v2115_v54 }
 0x2c8   : > { %v2200_v17 = vadd.f32 %v2199_v56, %v2198_v52  ;;  %v2149_v22 = vadd.f32 %v2148_v47, %v2147_v51 }
 0x2c9   : > { %v2235_v63 = vpack.c.bf16 %v2116_v9, %v2116_v9  ;;  %v2178_v49 = vmul.f32 %v2116_v9, %v2116_v9  ;;  %v2150_v40 = vsel %vm2130_vm12, %v2116_v9, 0.0 }
 0x2ca   : > { %v2202_v30 = vadd.f32 %v2201_v61, %v2200_v17  ;;  %v2151_v13 = vadd.f32 %v2150_v40, %v2149_v22 }
 0x2cb   : > { %2252 = vst.msk [vmem:[%s2859_s22 + $0x28] sm:$0xf] %vm2241_vm5, %v2235_v63  ;;  %v2203_v12 = vsel %vm2130_vm12, %v2178_v49, 0.0 }
 0x2cc   : > { %v2204_v60 = vadd.f32 %v2203_v12, %v2202_v30 }
 0x2ce   : > { %v2117_v26 = vpop.f32.mrf.mxu2 }
 0x2cf   : > { %v2118_v4 = vadd.f32 %v3928_v33, %v2117_v26 }
 0x2d1   : > { %v2152_v3 = vsel %vm2130_vm12, %v2118_v4, 0.0  ;;  %v2179_v25 = vmul.f32 %v2118_v4, %v2118_v4  ;;  %v2236_v44 = vpack.c.bf16 %v2118_v4, %v2118_v4 }
 0x2d2   : > { %v2153_v38 = vadd.f32 %v2152_v3, %v2151_v13 }
 0x2d3   : > { %v2205_v2 = vsel %vm2130_vm12, %v2179_v25, 0.0  ;;  %2253 = vst.msk [vmem:[%s2859_s22 + $0x2c] sm:$0xf] %vm2241_vm5, %v2236_v44 }
 0x2d4   : > { %v2155_v53 = vadd.f32 %v2154_v35, %v2153_v38  ;;  %v2206_v58 = vadd.f32 %v2205_v2, %v2204_v60 }
 0x2d6   : > { %v2208_v46 = vadd.f32 %v2207_v57, %v2206_v58  ;;  %v2157_v34 = vadd.f32 %v2156_v37, %v2155_v53 }
 0x2d8   : > { %v2210_v59 = vadd.f32 %v2209_v36, %v2208_v46 }
 0x2e6   : > { %v2125_v50 = vpop.f32.mrf.mxu3 }
 0x2e7   : > { %v2126_v31 = vadd.f32 %v3928_v33, %v2125_v50 }
 0x2e9   : > { %v2239_v21 = vpack.c.bf16 %v2126_v31, %v2126_v31  ;;  %v2182_v28 = vmul.f32 %v2126_v31, %v2126_v31  ;;  %v2158_v14 = vsel %vm2130_vm12, %v2126_v31, 0.0 }
 0x2ea   : > { %v2159_v1 = vadd.f32 %v2158_v14, %v2157_v34 }
 0x2eb   : > { %2256 = vst.msk [vmem:[%s2859_s22 + $0x38] sm:$0xf] %vm2241_vm5, %v2239_v21  ;;  %v2211_v23 = vsel %vm2130_vm12, %v2182_v28, 0.0 }
 0x2ec   : > { %v2212_v7 = vadd.f32 %v2211_v23, %v2210_v59 }
 0x2ee   : > { %v2127_v0 = vpop.f32.mrf.mxu3 }
 0x2ef   : > { %v2128_v41 = vadd.f32 %v3928_v33, %v2127_v0 }
 0x2f1   : > { %v2160_v24 = vsel %vm2130_vm12, %v2128_v41, 0.0  ;;  %v2183_v19 = vmul.f32 %v2128_v41, %v2128_v41  ;;  %v2240_v48 = vpack.c.bf16 %v2128_v41, %v2128_v41 }
 0x2f2   : > { %v2161_v6 = vadd.f32 %v2160_v24, %v2159_v1 }
 0x2f3   : > { %v2213_v39 = vsel %vm2130_vm12, %v2183_v19, 0.0  ;;  %2257 = vst.msk [vmem:[%s2859_s22 + $0x3c] sm:$0xf] %vm2241_vm5, %v2240_v48 }
 0x2f4   : > { %v2162_v29 = vrot.slane %v2161_v6, 4  ;;  %v2214_v15 = vadd.f32 %v2213_v39, %v2212_v7 }
 0x2f6   : > { %v2163_v27 = vadd.f32 %v2162_v29, %v2161_v6  ;;  %v2215_v45 = vrot.slane %v2214_v15, 4 }
 0x2f8   : > { %v2164_v42 = vrot.slane %v2163_v27, 2  ;;  %v2216_v18 = vadd.f32 %v2215_v45, %v2214_v15 }
 0x2fa   : > { %v2165_v11 = vadd.f32 %v2164_v42, %v2163_v27  ;;  %v2217_v33 = vrot.slane %v2216_v18, 2 }
 0x2fc   : > { %v2166_v5 = vrot.slane %v2165_v11, 1  ;;  %v2218_v8 = vadd.f32 %v2217_v33, %v2216_v18 }
 0x2fe   : > { %v2219_v62 = vrot.slane %v2218_v8, 1  ;;  %v2167_v32 = vadd.f32 %v2166_v5, %v2165_v11 }
 0x300   : > { %v2220_v55 = vadd.f32 %v2219_v62, %v2218_v8 }
 0x302   : > { %v2222_v20 = vsel %vm2221_vm7, %v2167_v32, %v2220_v55 }
 0x303   : > { %2224 = vst.msk [vmem:[%s2871_s26] sm:$0x3] %vm2223_vm10, %v2222_v20 }
 0x304 PF: > { %s19_s9 = sadd.s32 1, %s2731_s9   ;;  %s4151_s27 = smov %s2723_s29 }
 0x305   : > { %p16_p9 = scmp.ge.s32.totalorder %s19_s9, 6   ;;  %s4152_s28 = smov %s2727_s30 }
 0x306   : > { %s4153_s29 = smov %s4156_s10  ;;  %s4154_s30 = smov %s4160_s11 }
 0x307   :  { %18 = sbr.rel (!%p16_p9) target bundleno = 3 (0x3), region = 116 }

</bundles_post_ra>
